<compile_context>
chip_gen: v6e
topology: v6e:2x2x1
jax: 0.10.0
libtpu: 0.0.40
codegen_flags: <defaults>
</compile_context>

<pallas_src>
import functools
import math

import jax
import jax.numpy as jnp
from jax.experimental import pallas as pl
from jax.experimental.pallas import tpu as pltpu


LEAKY_SLOPE = 0.2
BN_EPS = 0.8      # nn.BatchNorm1d(out_feat, 0.8): second positional arg is eps
LANE = 128


def _round_up(n, m):
    return (n + m - 1) // m * m


def _leaky_relu(x):
    return jnp.where(x >= 0, x, LEAKY_SLOPE * x)


def _matmul(x_f32, w):
    # bf16 operands into the MXU (fast path on v6e/v7x, fine on v5e),
    # f32 accumulation via preferred_element_type.
    return jnp.dot(x_f32.astype(w.dtype), w, preferred_element_type=jnp.float32)


def _bn_leaky(x, gamma, beta):
    # Training-mode batch statistics, one-pass form (biased variance):
    #   var = E[x^2] - mean^2
    # Saves one reduction pass over x and a full-size temporary vs. two-pass.
    mean = jnp.mean(x, axis=0, keepdims=True)
    mean_sq = jnp.mean(x * x, axis=0, keepdims=True)
    var = mean_sq - mean * mean
    # Fused affine: 2 VPU ops per element (mul, add).
    s = gamma * jax.lax.rsqrt(var + BN_EPS)
    t = beta - mean * s
    return _leaky_relu(x * s + t)


def generator_kernel(z_ref, w1_ref, w2_ref, w3_ref, vec_ref,
                     w4_hbm, w5_hbm,
                     out_ref,
                     w4_buf, w5_buf, sem,
                     *, out_dim_p):
    # Kick off the two big weight copies (HBM -> VMEM scratch) immediately so
    # the DMA overlaps with layers 1-3 compute; wait just before each is used.
    cp4 = pltpu.make_async_copy(w4_hbm, w4_buf, sem.at[0])
    cp5 = pltpu.make_async_copy(w5_hbm, w5_buf, sem.at[1])
    cp4.start()
    cp5.start()

    x = z_ref[...].astype(jnp.float32)

    # vec_ref rows: 0:b1 | 1:gamma2 2:beta2 | 3:gamma3 4:beta3
    #               5:gamma4 6:beta4 | 7:b5   (each row uses its leading lanes)
    # Layer 1: Linear(latent,128) + bias -> LeakyReLU
    h = _leaky_relu(_matmul(x, w1_ref[...]) + vec_ref[0:1, :128])

    # Layers 2-4: Linear (bias dropped — it is algebraically cancelled by the
    # BN mean subtraction in training mode) -> BN -> LeakyReLU
    h = _bn_leaky(_matmul(h, w2_ref[...]),
                  vec_ref[1:2, :256], vec_ref[2:3, :256])
    h = _bn_leaky(_matmul(h, w3_ref[...]),
                  vec_ref[3:4, :512], vec_ref[4:5, :512])

    cp4.wait()
    h = _bn_leaky(_matmul(h, w4_buf[...]),
                  vec_ref[5:6, :1024], vec_ref[6:7, :1024])

    cp5.wait()
    # Layer 5: Linear(1024, out_dim_p) + bias -> Tanh
    out = jnp.tanh(_matmul(h, w5_buf[...]) + vec_ref[7:8, :out_dim_p])

    out_ref[...] = out.astype(out_ref.dtype)


def init_params(key, latent_dim, img_shape):
    """Deterministic init mirroring the PyTorch module's parameter shapes."""
    out_dim = int(math.prod(img_shape))
    out_dim_p = _round_up(out_dim, LANE)
    max_d = max(1024, out_dim_p)
    dims = [latent_dim, 128, 256, 512, 1024, out_dim]

    keys = jax.random.split(key, 2 * (len(dims) - 1))
    ws, bs = [], []
    for i in range(len(dims) - 1):
        fan_in, fan_out = dims[i], dims[i + 1]
        bound = 1.0 / math.sqrt(fan_in)
        ws.append(jax.random.uniform(keys[2 * i], (fan_in, fan_out),
                                     jnp.float32, -bound, bound))
        bs.append(jax.random.uniform(keys[2 * i + 1], (fan_out,),
                                     jnp.float32, -bound, bound))

    # Pad final layer to a lane-dense (multiple-of-128) output width.
    if out_dim_p != out_dim:
        ws[4] = jnp.pad(ws[4], ((0, 0), (0, out_dim_p - out_dim)))
        bs[4] = jnp.pad(bs[4], (0, out_dim_p - out_dim))

    # Pack every small per-feature vector into one (8, max_d) f32 slab (one
    # DMA instead of five).  Pre-BN linear biases (layers 2-4) are dropped:
    # BN mean subtraction cancels them exactly.  BatchNorm affine params use
    # the PyTorch default (weight=1, bias=0).
    vec = jnp.zeros((8, max_d), jnp.float32)
    vec = vec.at[0, :128].set(bs[0])           # b1
    vec = vec.at[1, :256].set(1.0)             # gamma2   (row 2 beta2 = 0)
    vec = vec.at[3, :512].set(1.0)             # gamma3   (row 4 beta3 = 0)
    vec = vec.at[5, :1024].set(1.0)            # gamma4   (row 6 beta4 = 0)
    vec = vec.at[7, :out_dim_p].set(bs[4])     # b5

    return {
        "w1": ws[0].astype(jnp.bfloat16),
        "w2": ws[1].astype(jnp.bfloat16),
        "w3": ws[2].astype(jnp.bfloat16),
        "w4": ws[3].astype(jnp.bfloat16),
        "w5": ws[4].astype(jnp.bfloat16),
        "vec": vec,
    }


def _vmem_limit_bytes(B, latent, out_dim_p, max_d):
    # VMEM-resident operands + DMA landing buffers + output + activations,
    # with 2x headroom for temporaries; clamped to v7x's 64 MiB physical VMEM
    # (smaller than v5e/v6e's 128 MiB).
    weight_bytes = (latent * 128 + 128 * 256 + 256 * 512
                    + 512 * 1024 + 1024 * out_dim_p) * 2
    vec_bytes = 8 * max_d * 4
    act_bytes = B * (latent + 128 + 256 + 512 + 1024 + 2 * out_dim_p) * 4
    footprint = weight_bytes + vec_bytes + act_bytes
    return int(min(max(2 * footprint, 8 << 20), 64 << 20))


@functools.partial(jax.jit, static_argnames=("img_shape",))
def generator_forward(z, params, img_shape):
    B, latent = z.shape
    out_dim = int(math.prod(img_shape))        # static python ints, no tracing
    out_dim_p = _round_up(out_dim, LANE)
    max_d = max(1024, out_dim_p)

    # TODO(synk): no-grid design keeps every (B, feat) f32 activation resident
    #             in VMEM; add a batch-tiled grid (weights resident via a
    #             constant index_map, two-pass BN) before B reaches ~1-2K.
    # TODO(synk): at realistic batch (>=256) add a grid=(2,) batch split with
    #             dimension_semantics=("parallel",) and cross-core BN stats in
    #             shared scratch to use both v7x TensorCores; at tiny B the
    #             overhead exceeds the work.

    operands = (z, params["w1"], params["w2"], params["w3"], params["vec"],
                params["w4"], params["w5"])

    dims = (latent, 128, 256, 512, 1024, out_dim_p)
    flops = 2 * B * sum(a * b for a, b in zip(dims[:-1], dims[1:]))
    bytes_accessed = (sum(int(x.size) * x.dtype.itemsize for x in operands)
                      + B * out_dim_p * 4)
    cost = pl.CostEstimate(flops=flops,
                           transcendentals=B * out_dim_p,   # tanh
                           bytes_accessed=bytes_accessed)

    vmem_spec = pl.BlockSpec(memory_space=pltpu.MemorySpace.VMEM)
    hbm_spec = pl.BlockSpec(memory_space=pl.ANY)

    flat = pl.pallas_call(
        functools.partial(generator_kernel, out_dim_p=out_dim_p),
        out_shape=jax.ShapeDtypeStruct((B, out_dim_p), jnp.float32),
        in_specs=[vmem_spec] * 5 + [hbm_spec, hbm_spec],
        out_specs=vmem_spec,
        scratch_shapes=[
            pltpu.VMEM((512, 1024), jnp.bfloat16),         # w4 landing buffer
            pltpu.VMEM((1024, out_dim_p), jnp.bfloat16),   # w5 landing buffer
            pltpu.SemaphoreType.DMA((2,)),
        ],
        compiler_params=pltpu.CompilerParams(
            vmem_limit_bytes=_vmem_limit_bytes(B, latent, out_dim_p, max_d)),
        cost_estimate=cost,
    )(*operands)

    # PyTorch: img = img.view(B, *img_shape) after dropping lane padding.
    # TODO(synk): emit bf16 in-kernel instead (halves writeback bytes) if the
    #             downstream discriminator accepts it.
    return flat[:, :out_dim].reshape((B,) + tuple(img_shape))


if __name__ == "__main__":
    latent_dim = 64
    img_shape = (1, 16, 16)   # (C, H, W) -> prod = 256 (already lane-dense)
    batch = 16                # multiple of 16 so the bf16 LHS fills packed
                              # (16,128) sublanes; MXU only amortizes at
                              # B>=128/256 — kept small for the smoke test.

    key = jax.random.PRNGKey(0)
    k_params, k_z = jax.random.split(key)

    params = init_params(k_params, latent_dim, img_shape)
    z = jax.random.normal(k_z, (batch, latent_dim), jnp.float32)

    img = generator_forward(z, params, img_shape)
    jax.block_until_ready(img)

    assert img.shape == (batch,) + img_shape, img.shape
    assert bool(jnp.all(jnp.isfinite(img)))
    print("KERNEL_OK")
</pallas_src>

<mosaic_0001>
module attributes {stable_mosaic.version = 11 : i64} {
  func.func @generator_kernel(%arg0: memref<16x64xf32, #tpu.memory_space<vmem>>, %arg1: memref<64x128xbf16, #tpu.memory_space<vmem>>, %arg2: memref<128x256xbf16, #tpu.memory_space<vmem>>, %arg3: memref<256x512xbf16, #tpu.memory_space<vmem>>, %arg4: memref<8x1024xf32, #tpu.memory_space<vmem>>, %arg5: memref<512x1024xbf16, #tpu.memory_space<any>>, %arg6: memref<1024x256xbf16, #tpu.memory_space<any>>, %arg7: memref<16x256xf32, #tpu.memory_space<vmem>>, %arg8: memref<512x1024xbf16, #tpu.memory_space<vmem>>, %arg9: memref<1024x256xbf16, #tpu.memory_space<vmem>>, %arg10: memref<2x!tpu.dma_semaphore, #tpu.memory_space<semaphore_mem>>) attributes {dimension_semantics = [], scalar_prefetch = 0 : i64, scratch_operands = 3 : i64, tpu.core_type = #tpu.core_type<tc>} {
    %c0_i32 = arith.constant 0 : i32
    %0 = tpu.memref_slice %arg10[%c0_i32] : memref<2x!tpu.dma_semaphore, #tpu.memory_space<semaphore_mem>> -> memref<1x!tpu.dma_semaphore, #tpu.memory_space<semaphore_mem>>
    %1 = tpu.memref_squeeze %0 : memref<1x!tpu.dma_semaphore, #tpu.memory_space<semaphore_mem>> -> memref<!tpu.dma_semaphore, #tpu.memory_space<semaphore_mem>>
    tpu.enqueue_dma source(%arg5 : memref<512x1024xbf16, #tpu.memory_space<any>>) target(%arg8 : memref<512x1024xbf16, #tpu.memory_space<vmem>>) target_semaphore(%1 : memref<!tpu.dma_semaphore, #tpu.memory_space<semaphore_mem>>)
    %c1_i32 = arith.constant 1 : i32
    %2 = tpu.memref_slice %arg10[%c1_i32] : memref<2x!tpu.dma_semaphore, #tpu.memory_space<semaphore_mem>> -> memref<1x!tpu.dma_semaphore, #tpu.memory_space<semaphore_mem>>
    %3 = tpu.memref_squeeze %2 : memref<1x!tpu.dma_semaphore, #tpu.memory_space<semaphore_mem>> -> memref<!tpu.dma_semaphore, #tpu.memory_space<semaphore_mem>>
    tpu.enqueue_dma source(%arg6 : memref<1024x256xbf16, #tpu.memory_space<any>>) target(%arg9 : memref<1024x256xbf16, #tpu.memory_space<vmem>>) target_semaphore(%3 : memref<!tpu.dma_semaphore, #tpu.memory_space<semaphore_mem>>)
    %c0 = arith.constant 0 : index
    %c0_0 = arith.constant 0 : index
    %4 = vector.load %arg0[%c0, %c0_0] : memref<16x64xf32, #tpu.memory_space<vmem>>, vector<16x64xf32>
    %c0_1 = arith.constant 0 : index
    %c0_2 = arith.constant 0 : index
    %5 = vector.load %arg1[%c0_1, %c0_2] : memref<64x128xbf16, #tpu.memory_space<vmem>>, vector<64x128xbf16>
    %6 = arith.truncf %4 : vector<16x64xf32> to vector<16x64xbf16>
    %cst = arith.constant dense<0.000000e+00> : vector<16x128xf32>
    %7 = tpu.matmul %6, %5, %cst {dimension_numbers = #tpu.dot_dimension_numbers<[1], [0], [0], [1], [0, 0, 1, 1], [], []>} : vector<16x64xbf16>, vector<64x128xbf16>, vector<16x128xf32> -> vector<16x128xf32>
    %c0_3 = arith.constant 0 : index
    %c0_4 = arith.constant 0 : index
    %8 = vector.load %arg4[%c0_3, %c0_4] : memref<8x1024xf32, #tpu.memory_space<vmem>>, vector<1x128xf32>
    %9 = vector.broadcast %8 : vector<1x128xf32> to vector<16x128xf32>
    %10 = arith.addf %7, %9 : vector<16x128xf32>
    %cst_5 = arith.constant 0.000000e+00 : f32
    %11 = vector.broadcast %cst_5 : f32 to vector<16x128xf32>
    %12 = arith.cmpf oge, %10, %11 : vector<16x128xf32>
    %cst_6 = arith.constant 2.000000e-01 : f32
    %13 = vector.broadcast %cst_6 : f32 to vector<16x128xf32>
    %14 = arith.mulf %13, %10 : vector<16x128xf32>
    %15 = arith.select %12, %10, %14 : vector<16x128xi1>, vector<16x128xf32>
    %c0_7 = arith.constant 0 : index
    %c0_8 = arith.constant 0 : index
    %16 = vector.load %arg2[%c0_7, %c0_8] : memref<128x256xbf16, #tpu.memory_space<vmem>>, vector<128x256xbf16>
    %17 = arith.truncf %15 : vector<16x128xf32> to vector<16x128xbf16>
    %cst_9 = arith.constant dense<0.000000e+00> : vector<16x256xf32>
    %18 = tpu.matmul %17, %16, %cst_9 {dimension_numbers = #tpu.dot_dimension_numbers<[1], [0], [0], [1], [0, 0, 1, 1], [], []>} : vector<16x128xbf16>, vector<128x256xbf16>, vector<16x256xf32> -> vector<16x256xf32>
    %c1 = arith.constant 1 : index
    %c0_10 = arith.constant 0 : index
    %19 = vector.load %arg4[%c1, %c0_10] : memref<8x1024xf32, #tpu.memory_space<vmem>>, vector<1x256xf32>
    %c2 = arith.constant 2 : index
    %c0_11 = arith.constant 0 : index
    %20 = vector.load %arg4[%c2, %c0_11] : memref<8x1024xf32, #tpu.memory_space<vmem>>, vector<1x256xf32>
    %cst_12 = arith.constant dense<0.000000e+00> : vector<256xf32>
    %21 = vector.multi_reduction <add>, %18, %cst_12 [0] : vector<16x256xf32> to vector<256xf32>
    %22 = vector.shape_cast %21 : vector<256xf32> to vector<1x256xf32>
    %cst_13 = arith.constant 1.600000e+01 : f32
    %23 = vector.broadcast %cst_13 : f32 to vector<1x256xf32>
    %24 = arith.divf %22, %23 : vector<1x256xf32>
    %25 = arith.mulf %18, %18 : vector<16x256xf32>
    %cst_14 = arith.constant dense<0.000000e+00> : vector<256xf32>
    %26 = vector.multi_reduction <add>, %25, %cst_14 [0] : vector<16x256xf32> to vector<256xf32>
    %27 = vector.shape_cast %26 : vector<256xf32> to vector<1x256xf32>
    %cst_15 = arith.constant 1.600000e+01 : f32
    %28 = vector.broadcast %cst_15 : f32 to vector<1x256xf32>
    %29 = arith.divf %27, %28 : vector<1x256xf32>
    %30 = arith.mulf %24, %24 : vector<1x256xf32>
    %31 = arith.subf %29, %30 : vector<1x256xf32>
    %cst_16 = arith.constant 8.000000e-01 : f32
    %32 = vector.broadcast %cst_16 : f32 to vector<1x256xf32>
    %33 = arith.addf %31, %32 : vector<1x256xf32>
    %34 = math.rsqrt %33 : vector<1x256xf32>
    %35 = arith.mulf %19, %34 : vector<1x256xf32>
    %36 = arith.mulf %24, %35 : vector<1x256xf32>
    %37 = arith.subf %20, %36 : vector<1x256xf32>
    %38 = vector.broadcast %35 : vector<1x256xf32> to vector<16x256xf32>
    %39 = arith.mulf %18, %38 : vector<16x256xf32>
    %40 = vector.broadcast %37 : vector<1x256xf32> to vector<16x256xf32>
    %41 = arith.addf %39, %40 : vector<16x256xf32>
    %cst_17 = arith.constant 0.000000e+00 : f32
    %42 = vector.broadcast %cst_17 : f32 to vector<16x256xf32>
    %43 = arith.cmpf oge, %41, %42 : vector<16x256xf32>
    %cst_18 = arith.constant 2.000000e-01 : f32
    %44 = vector.broadcast %cst_18 : f32 to vector<16x256xf32>
    %45 = arith.mulf %44, %41 : vector<16x256xf32>
    %46 = arith.select %43, %41, %45 : vector<16x256xi1>, vector<16x256xf32>
    %c0_19 = arith.constant 0 : index
    %c0_20 = arith.constant 0 : index
    %47 = vector.load %arg3[%c0_19, %c0_20] : memref<256x512xbf16, #tpu.memory_space<vmem>>, vector<256x512xbf16>
    %48 = arith.truncf %46 : vector<16x256xf32> to vector<16x256xbf16>
    %cst_21 = arith.constant dense<0.000000e+00> : vector<16x512xf32>
    %49 = tpu.matmul %48, %47, %cst_21 {dimension_numbers = #tpu.dot_dimension_numbers<[1], [0], [0], [1], [0, 0, 1, 1], [], []>} : vector<16x256xbf16>, vector<256x512xbf16>, vector<16x512xf32> -> vector<16x512xf32>
    %c3 = arith.constant 3 : index
    %c0_22 = arith.constant 0 : index
    %50 = vector.load %arg4[%c3, %c0_22] : memref<8x1024xf32, #tpu.memory_space<vmem>>, vector<1x512xf32>
    %c4 = arith.constant 4 : index
    %c0_23 = arith.constant 0 : index
    %51 = vector.load %arg4[%c4, %c0_23] : memref<8x1024xf32, #tpu.memory_space<vmem>>, vector<1x512xf32>
    %cst_24 = arith.constant dense<0.000000e+00> : vector<512xf32>
    %52 = vector.multi_reduction <add>, %49, %cst_24 [0] : vector<16x512xf32> to vector<512xf32>
    %53 = vector.shape_cast %52 : vector<512xf32> to vector<1x512xf32>
    %cst_25 = arith.constant 1.600000e+01 : f32
    %54 = vector.broadcast %cst_25 : f32 to vector<1x512xf32>
    %55 = arith.divf %53, %54 : vector<1x512xf32>
    %56 = arith.mulf %49, %49 : vector<16x512xf32>
    %cst_26 = arith.constant dense<0.000000e+00> : vector<512xf32>
    %57 = vector.multi_reduction <add>, %56, %cst_26 [0] : vector<16x512xf32> to vector<512xf32>
    %58 = vector.shape_cast %57 : vector<512xf32> to vector<1x512xf32>
    %cst_27 = arith.constant 1.600000e+01 : f32
    %59 = vector.broadcast %cst_27 : f32 to vector<1x512xf32>
    %60 = arith.divf %58, %59 : vector<1x512xf32>
    %61 = arith.mulf %55, %55 : vector<1x512xf32>
    %62 = arith.subf %60, %61 : vector<1x512xf32>
    %cst_28 = arith.constant 8.000000e-01 : f32
    %63 = vector.broadcast %cst_28 : f32 to vector<1x512xf32>
    %64 = arith.addf %62, %63 : vector<1x512xf32>
    %65 = math.rsqrt %64 : vector<1x512xf32>
    %66 = arith.mulf %50, %65 : vector<1x512xf32>
    %67 = arith.mulf %55, %66 : vector<1x512xf32>
    %68 = arith.subf %51, %67 : vector<1x512xf32>
    %69 = vector.broadcast %66 : vector<1x512xf32> to vector<16x512xf32>
    %70 = arith.mulf %49, %69 : vector<16x512xf32>
    %71 = vector.broadcast %68 : vector<1x512xf32> to vector<16x512xf32>
    %72 = arith.addf %70, %71 : vector<16x512xf32>
    %cst_29 = arith.constant 0.000000e+00 : f32
    %73 = vector.broadcast %cst_29 : f32 to vector<16x512xf32>
    %74 = arith.cmpf oge, %72, %73 : vector<16x512xf32>
    %cst_30 = arith.constant 2.000000e-01 : f32
    %75 = vector.broadcast %cst_30 : f32 to vector<16x512xf32>
    %76 = arith.mulf %75, %72 : vector<16x512xf32>
    %77 = arith.select %74, %72, %76 : vector<16x512xi1>, vector<16x512xf32>
    %c0_i32_31 = arith.constant 0 : i32
    %78 = tpu.memref_slice %arg10[%c0_i32_31] : memref<2x!tpu.dma_semaphore, #tpu.memory_space<semaphore_mem>> -> memref<1x!tpu.dma_semaphore, #tpu.memory_space<semaphore_mem>>
    %79 = tpu.memref_squeeze %78 : memref<1x!tpu.dma_semaphore, #tpu.memory_space<semaphore_mem>> -> memref<!tpu.dma_semaphore, #tpu.memory_space<semaphore_mem>>
    tpu.wait_dma2 semaphore(%79 : memref<!tpu.dma_semaphore, #tpu.memory_space<semaphore_mem>>) src(%arg5 : memref<512x1024xbf16, #tpu.memory_space<any>>) dst(%arg8 : memref<512x1024xbf16, #tpu.memory_space<vmem>>)
    %c0_32 = arith.constant 0 : index
    %c0_33 = arith.constant 0 : index
    %80 = vector.load %arg8[%c0_32, %c0_33] : memref<512x1024xbf16, #tpu.memory_space<vmem>>, vector<512x1024xbf16>
    %81 = arith.truncf %77 : vector<16x512xf32> to vector<16x512xbf16>
    %cst_34 = arith.constant dense<0.000000e+00> : vector<16x1024xf32>
    %82 = tpu.matmul %81, %80, %cst_34 {dimension_numbers = #tpu.dot_dimension_numbers<[1], [0], [0], [1], [0, 0, 1, 1], [], []>} : vector<16x512xbf16>, vector<512x1024xbf16>, vector<16x1024xf32> -> vector<16x1024xf32>
    %c5 = arith.constant 5 : index
    %c0_35 = arith.constant 0 : index
    %83 = vector.load %arg4[%c5, %c0_35] : memref<8x1024xf32, #tpu.memory_space<vmem>>, vector<1x1024xf32>
    %c6 = arith.constant 6 : index
    %c0_36 = arith.constant 0 : index
    %84 = vector.load %arg4[%c6, %c0_36] : memref<8x1024xf32, #tpu.memory_space<vmem>>, vector<1x1024xf32>
    %cst_37 = arith.constant dense<0.000000e+00> : vector<1024xf32>
    %85 = vector.multi_reduction <add>, %82, %cst_37 [0] : vector<16x1024xf32> to vector<1024xf32>
    %86 = vector.shape_cast %85 : vector<1024xf32> to vector<1x1024xf32>
    %cst_38 = arith.constant 1.600000e+01 : f32
    %87 = vector.broadcast %cst_38 : f32 to vector<1x1024xf32>
    %88 = arith.divf %86, %87 : vector<1x1024xf32>
    %89 = arith.mulf %82, %82 : vector<16x1024xf32>
    %cst_39 = arith.constant dense<0.000000e+00> : vector<1024xf32>
    %90 = vector.multi_reduction <add>, %89, %cst_39 [0] : vector<16x1024xf32> to vector<1024xf32>
    %91 = vector.shape_cast %90 : vector<1024xf32> to vector<1x1024xf32>
    %cst_40 = arith.constant 1.600000e+01 : f32
    %92 = vector.broadcast %cst_40 : f32 to vector<1x1024xf32>
    %93 = arith.divf %91, %92 : vector<1x1024xf32>
    %94 = arith.mulf %88, %88 : vector<1x1024xf32>
    %95 = arith.subf %93, %94 : vector<1x1024xf32>
    %cst_41 = arith.constant 8.000000e-01 : f32
    %96 = vector.broadcast %cst_41 : f32 to vector<1x1024xf32>
    %97 = arith.addf %95, %96 : vector<1x1024xf32>
    %98 = math.rsqrt %97 : vector<1x1024xf32>
    %99 = arith.mulf %83, %98 : vector<1x1024xf32>
    %100 = arith.mulf %88, %99 : vector<1x1024xf32>
    %101 = arith.subf %84, %100 : vector<1x1024xf32>
    %102 = vector.broadcast %99 : vector<1x1024xf32> to vector<16x1024xf32>
    %103 = arith.mulf %82, %102 : vector<16x1024xf32>
    %104 = vector.broadcast %101 : vector<1x1024xf32> to vector<16x1024xf32>
    %105 = arith.addf %103, %104 : vector<16x1024xf32>
    %cst_42 = arith.constant 0.000000e+00 : f32
    %106 = vector.broadcast %cst_42 : f32 to vector<16x1024xf32>
    %107 = arith.cmpf oge, %105, %106 : vector<16x1024xf32>
    %cst_43 = arith.constant 2.000000e-01 : f32
    %108 = vector.broadcast %cst_43 : f32 to vector<16x1024xf32>
    %109 = arith.mulf %108, %105 : vector<16x1024xf32>
    %110 = arith.select %107, %105, %109 : vector<16x1024xi1>, vector<16x1024xf32>
    %c1_i32_44 = arith.constant 1 : i32
    %111 = tpu.memref_slice %arg10[%c1_i32_44] : memref<2x!tpu.dma_semaphore, #tpu.memory_space<semaphore_mem>> -> memref<1x!tpu.dma_semaphore, #tpu.memory_space<semaphore_mem>>
    %112 = tpu.memref_squeeze %111 : memref<1x!tpu.dma_semaphore, #tpu.memory_space<semaphore_mem>> -> memref<!tpu.dma_semaphore, #tpu.memory_space<semaphore_mem>>
    tpu.wait_dma2 semaphore(%112 : memref<!tpu.dma_semaphore, #tpu.memory_space<semaphore_mem>>) src(%arg6 : memref<1024x256xbf16, #tpu.memory_space<any>>) dst(%arg9 : memref<1024x256xbf16, #tpu.memory_space<vmem>>)
    %c0_45 = arith.constant 0 : index
    %c0_46 = arith.constant 0 : index
    %113 = vector.load %arg9[%c0_45, %c0_46] : memref<1024x256xbf16, #tpu.memory_space<vmem>>, vector<1024x256xbf16>
    %114 = arith.truncf %110 : vector<16x1024xf32> to vector<16x1024xbf16>
    %cst_47 = arith.constant dense<0.000000e+00> : vector<16x256xf32>
    %115 = tpu.matmul %114, %113, %cst_47 {dimension_numbers = #tpu.dot_dimension_numbers<[1], [0], [0], [1], [0, 0, 1, 1], [], []>} : vector<16x1024xbf16>, vector<1024x256xbf16>, vector<16x256xf32> -> vector<16x256xf32>
    %c7 = arith.constant 7 : index
    %c0_48 = arith.constant 0 : index
    %116 = vector.load %arg4[%c7, %c0_48] : memref<8x1024xf32, #tpu.memory_space<vmem>>, vector<1x256xf32>
    %117 = vector.broadcast %116 : vector<1x256xf32> to vector<16x256xf32>
    %118 = arith.addf %115, %117 : vector<16x256xf32>
    %119 = math.tanh %118 : vector<16x256xf32>
    %c0_49 = arith.constant 0 : index
    %c0_50 = arith.constant 0 : index
    %120 = vector.load %arg7[%c0_49, %c0_50] : memref<16x256xf32, #tpu.memory_space<vmem>>, vector<16x256xf32>
    tpu.vector_store %arg7[%c0_49, %c0_50], %119 {strides = array<i32>} : memref<16x256xf32, #tpu.memory_space<vmem>>, vector<16x256xf32>,
    return
  }
}

</mosaic_0001>

<bundles_post_ra>
// kernel: generator_forward.1
= control target key start
LH: loop header
LB: loop body
LE: loop exit
PB: predicated region body
PF: predicated region fallthrough
CT: control target
= control target key end

     0   :  { %12 = vsyncpa [#allocation6], 0  ;;  %s6000_s0 = inlined_call_operand.hbm [shape: f32[16,64], index: 0, kind: input, shape index: {}]   ;;  %s6001_s1 = inlined_call_operand.hbm [shape: bf16[64,128], index: 1, kind: input, shape index: {}]   ;;  %s6002_s2 = inlined_call_operand.hbm [shape: bf16[128,256], index: 2, kind: input, shape index: {}]   ;;  %s6003_s3 = inlined_call_operand.hbm [shape: bf16[256,512], index: 3, kind: input, shape index: {}]   ;;  %s6004_s4 = inlined_call_operand.hbm [shape: f32[8,1024], index: 4, kind: input, shape index: {}]   ;;  %s6005_s5 = inlined_call_operand.hbm [shape: bf16[512,1024], index: 5, kind: input, shape index: {}]   ;;  %s6006_s6 = inlined_call_operand.hbm [shape: bf16[1024,256], index: 6, kind: input, shape index: {}]   ;;  %s6007_s7 = inlined_call_operand.vmem [shape: f32[16,256], index: 7, kind: output, shape index: {}]  }
   0x1   :  { %13 = vsyncpa [#allocation8], 0 }
   0x2   :  { %14 = vsyncpa [#allocation11], 0  ;;  %s5540_s24 = smov [#allocation7]  }
   0x3   :  { %s32_s25 = sshll.u32 %s5540_s24, 4  ;;  %s33_s25 = int_to_ptr.vmem [resolvable:$true] %s32_s25 }
   0x4   :  { %s5398_s26 = scalar_lea.vmem %s33_s25, 512  ;;  %p5403_p1 = scmp.lt.s32.totalorder %s33_s25, %s33_s25 }
   0x5   :  { %p5399_p0 = scmp.ne.s32.totalorder %s33_s25, %s5398_s26  ;;  %p5404_p2 = scmp.lt.s32.totalorder %s5398_s26, %s5398_s26 }
   0x7   :  { %p5405_p3 = por %p5404_p2, %p5403_p1 }
   0x9   :  { %p5406_p4 = pnand %p5405_p3, %p5399_p0 }
   0xb   :  { %5409 = shalt.err (!%p5406_p4)
}
   0xc   :  { %s5541_s27 = smov 64   ;;  %s5542_s28 = smov 4  }
   0xd   :  { %38 = dma.hbm_to_vmem [thread:$0]  %s6001_s1, 512, %s33_s25, [#allocation8], %s5541_s27, %s5541_s27, %s5542_s28  }
   0xe   :  { %s5543_s8 = smov [#allocation10]  }
   0xf   :  { %s56_s9 = sshll.u32 %s5543_s8, 4  ;;  %s57_s9 = int_to_ptr.vmem [resolvable:$true] %s56_s9 }
  0x10   :  { %s5418_s10 = scalar_lea.vmem %s57_s9, 8192  ;;  %p5423_p6 = scmp.lt.s32.totalorder %s57_s9, %s57_s9 }
  0x11   :  { %p5419_p5 = scmp.ne.s32.totalorder %s57_s9, %s5418_s10  ;;  %p5424_p7 = scmp.lt.s32.totalorder %s5418_s10, %s5418_s10 }
  0x13   :  { %p5425_p8 = por %p5424_p7, %p5423_p6 }
  0x15   :  { %p5426_p9 = pnand %p5425_p8, %p5419_p5 }
  0x17   :  { %5429 = shalt.err (!%p5426_p9)
}
  0x18   :  { %s5544_s11 = smov 256   ;;  %s5545_s12 = smov 16  }
  0x19   :  { %62 = dma.hbm_to_vmem [thread:$0]  %s6003_s3, 8192, %s57_s9, [#allocation11], %s5544_s11, %s5544_s11, %s5545_s12  }
  0x1a   :  { %s5546_s15 = smov [#allocation5]  }
  0x1b   :  { %s20_s16 = sshll.u32 %s5546_s15, 4  ;;  %s21_s16 = int_to_ptr.vmem [resolvable:$true] %s20_s16 }
  0x1c   :  { %s5438_s1 = scalar_lea.vmem %s21_s16, 256  ;;  %p5443_p11 = scmp.lt.s32.totalorder %s21_s16, %s21_s16 }
  0x1d   :  { %p5439_p10 = scmp.ne.s32.totalorder %s21_s16, %s5438_s1  ;;  %p5444_p12 = scmp.lt.s32.totalorder %s5438_s1, %s5438_s1 }
  0x1f   :  { %p5445_p13 = por %p5444_p12, %p5443_p11 }
  0x21   :  { %p5446_p0 = pnand %p5445_p13, %p5439_p10 }
  0x23   :  { %5449 = shalt.err (!%p5446_p0)
}
  0x24   :  { %s5547_s17 = smov 128   ;;  %s5548_s18 = smov 8  }
  0x25   :  { %26 = dma.hbm_to_vmem [thread:$0]  %s6000_s0, 256, %s21_s16, [#allocation6], %s5547_s17, %s5547_s17, %s5548_s18  }
  0x26   :  { %s5549_s21 = smov [#allocation9]   ;;  %s5550_s3 = smov [#allocation12]  }
  0x27   :  { %s44_s22 = sshll.u32 %s5549_s21, 4  ;;  %s69_s23 = sshll.u32 %s5550_s3, 4  ;;  %s45_s22 = int_to_ptr.vmem [resolvable:$true] %s44_s22  ;;  %s70_s23 = int_to_ptr.vmem [resolvable:$true] %s69_s23 }
  0x28   :  { %s5458_s24 = scalar_lea.vmem %s45_s22, 2048  ;;  %p5463_p2 = scmp.lt.s32.totalorder %s45_s22, %s45_s22 }
  0x29   :  { %p5459_p1 = scmp.ne.s32.totalorder %s45_s22, %s5458_s24  ;;  %p5464_p3 = scmp.lt.s32.totalorder %s5458_s24, %s5458_s24 }
  0x2b   :  { %p5465_p4 = por %p5464_p3, %p5463_p2 }
  0x2d   :  { %p5466_p5 = pnand %p5465_p4, %p5459_p1 }
  0x2f   :  { %5469 = shalt.err (!%p5466_p5)
}
  0x30   :  { %50 = dma.hbm_to_vmem [thread:$0]  %s6002_s2, 2048, %s45_s22, [#allocation8], %s5547_s17, %s5547_s17, %s5548_s18  }
  0x31   :  { %s5478_s27 = scalar_lea.vmem %s70_s23, 1024  ;;  %p5483_p7 = scmp.lt.s32.totalorder %s70_s23, %s70_s23 }
  0x32   :  { %p5479_p6 = scmp.ne.s32.totalorder %s70_s23, %s5478_s27  ;;  %p5484_p8 = scmp.lt.s32.totalorder %s5478_s27, %s5478_s27 }
  0x34   :  { %p5485_p9 = por %p5484_p8, %p5483_p7 }
  0x36   :  { %p5486_p10 = pnand %p5485_p9, %p5479_p6 }
  0x38   :  { %5489 = shalt.err (!%p5486_p10)
}
  0x39   :  { %72 = dma.hbm_to_vmem [thread:$0]  %s6004_s4, 1024, %s70_s23, [#allocation11]  }
  0x3a   :  { %5530 = dma.done.wait [#allocation6], 256  }
  0x3b   :  { %5531 = vsyncadd [#allocation6], 4294967040 }
  0x3c   :  { %5532 = dma.done.wait [#allocation8], 2560  }
  0x3d   :  { %5533 = vsyncadd [#allocation8], 4294964736 }
  0x3e   :  { %5534 = dma.done.wait [#allocation11], 9216  }
  0x3f   :  { %5535 = vsyncadd [#allocation11], 4294958080  ;;  %v5551_v0 = vmov 0.0   ;;  %vm5552_vm0 = vmmov 0   ;;  %v5038_v1 = vld [vmem:[#allocation7 + $0x18] sm:$0xff]   ;;  %v5039_v2 = vld [vmem:[#allocation7 + $0x10] sm:$0xff]  }
  0x40   :  { %5009 = vmatprep.subr.bf16.mxu0 %v5551_v0  ;;  %5017 = vmatprep.mubr.msk.bf16.mxu0 %vm5552_vm0, %v5551_v0  ;;  %v5040_v3 = vld [vmem:[#allocation7 + $0x8] sm:$0xff]   ;;  %v5042_v4 = vld [vmem:[#allocation9 + $0x74] ss:$8 sps:$4 sm:$0xff]   ;;  %v5044_v5 = vld [vmem:[#allocation9 + $0x70] ss:$8 sps:$4 sm:$0xff]   ;;  %vm148_vm1 = vcmask 523264  }
  0x41   :  { %5010 = vmatpush3.bf16.msra.mxu0 %v5038_v1  ;;  %v5045_v6 = vld [vmem:[#allocation9 + $0x64] ss:$8 sps:$4 sm:$0xff]   ;;  %296 = vmatprep.subr.bf16.mxu1 %v5042_v4  ;;  %v5047_v8 = vld [vmem:[#allocation9 + $0x60] ss:$8 sps:$4 sm:$0xff]   ;;  %v112_v9 = vld [vmem:[#allocation5] sm:$0xff]  ;;  %v5553_v24 = vmov 0  }
  0x42   :  { %5011 = vmatprep.subr.bf16.mxu0 %v5551_v0  ;;  %v5041_v7 = vld [vmem:[#allocation7] sm:$0xff]   ;;  %297 = vmatpush1.bf16.msra.mxu1 %v5044_v5  ;;  %v5048_v10 = vld [vmem:[#allocation9 + $0x54] ss:$8 sps:$4 sm:$0xff]   ;;  %v5050_v12 = vld [vmem:[#allocation9 + $0x50] ss:$8 sps:$4 sm:$0xff]   ;;  %s5555_s2 = smov [#allocation2]  }
  0x43   :  { %298 = vmatprep.subr.bf16.mxu1 %v5045_v6  ;;  %v113_v11 = vld [vmem:[#allocation5 + $0x8] sm:$0xff]  ;;  %v5051_v13 = vld [vmem:[#allocation9 + $0x44] ss:$8 sps:$4 sm:$0xff]   ;;  %v5053_v15 = vld [vmem:[#allocation9 + $0x40] ss:$8 sps:$4 sm:$0xff]   ;;  %328 = vmatprep.mubr.bf16.mxu1 %v5553_v24  ;;  %s96_s4 = sshll.u32 %s5555_s2, 4  ;;  %s97_s4 = int_to_ptr.vmem [resolvable:$true] %s96_s4 }
  0x44   :  { %v122_v14 = vpack.c.bf16 %v113_v11, %v112_v9  ;;  %v5054_v16 = vld [vmem:[#allocation9 + $0x34] ss:$8 sps:$4 sm:$0xff]   ;;  %v5056_v17 = vld [vmem:[#allocation9 + $0x30] ss:$8 sps:$4 sm:$0xff]   ;;  %v5057_v18 = vld [vmem:[#allocation9 + $0x24] ss:$8 sps:$4 sm:$0xff]   ;;  %p5503_p12 = scmp.lt.s32.totalorder %s97_s4, %s97_s4 }
  0x45   :  { %5012 = vmatpush3.bf16.msra.mxu0 %v5039_v2  ;;  %v5059_v19 = vld [vmem:[#allocation9 + $0x20] ss:$8 sps:$4 sm:$0xff]   ;;  %v5060_v20 = vld [vmem:[#allocation9 + $0x14] ss:$8 sps:$4 sm:$0xff]   ;;  %v5062_v21 = vld [vmem:[#allocation9 + $0x10] ss:$8 sps:$4 sm:$0xff]  }
  0x46   :  { %5013 = vmatprep.subr.bf16.mxu0 %v5551_v0  ;;  %299 = vmatpush1.bf16.msra.mxu1 %v5047_v8  ;;  %v5063_v22 = vld [vmem:[#allocation9 + $0x4] ss:$8 sps:$4 sm:$0xff]   ;;  %v5065_v23 = vld [vmem:[#allocation9] ss:$8 sps:$4 sm:$0xff]   ;;  %s5556_s29 = smov [#allocation3]   ;;  %s5498_s8 = scalar_lea.vmem %s97_s4, 32768 }
  0x47   :  { %300 = vmatprep.subr.bf16.mxu1 %v5048_v10  ;;  %v123_v25 = vld [vmem:[#allocation12] ss:$0 sm:$0xff]  ;;  %v5068_v37 = vld [vmem:[#allocation10 + $0xe4] ss:$16 sps:$4 sm:$0xff]   ;;  %v5071_v38 = vld [vmem:[#allocation10 + $0xec] ss:$16 sps:$4 sm:$0xff]   ;;  %p5499_p11 = scmp.ne.s32.totalorder %s97_s4, %s5498_s8  ;;  %p5504_p13 = scmp.lt.s32.totalorder %s5498_s8, %s5498_s8 }
  0x48   :  { %v5066_v39 = vld [vmem:[#allocation10 + $0xe0] ss:$16 sps:$4 sm:$0xff]   ;;  %v5069_v40 = vld [vmem:[#allocation10 + $0xe8] ss:$16 sps:$4 sm:$0xff]   ;;  %v5074_v41 = vld [vmem:[#allocation10 + $0xc4] ss:$16 sps:$4 sm:$0xff]  }
  0x49   :  { %5014 = vmatpush3.bf16.msra.mxu0 %v5040_v3  ;;  %v5077_v42 = vld [vmem:[#allocation10 + $0xcc] ss:$16 sps:$4 sm:$0xff]   ;;  %v5072_v43 = vld [vmem:[#allocation10 + $0xc0] ss:$16 sps:$4 sm:$0xff]   ;;  %v5075_v44 = vld [vmem:[#allocation10 + $0xc8] ss:$16 sps:$4 sm:$0xff]   ;;  %p5505_p0 = por %p5504_p13, %p5503_p12 }
  0x4a   :  { %5015 = vmatprep.subr.bf16.mxu0 %v5551_v0  ;;  %301 = vmatpush1.bf16.msra.mxu1 %v5050_v12  ;;  %v5080_v45 = vld [vmem:[#allocation10 + $0xa4] ss:$16 sps:$4 sm:$0xff]   ;;  %v5083_v46 = vld [vmem:[#allocation10 + $0xac] ss:$16 sps:$4 sm:$0xff]   ;;  %v5078_v47 = vld [vmem:[#allocation10 + $0xa0] ss:$16 sps:$4 sm:$0xff]  }
  0x4b   :  { %302 = vmatprep.subr.bf16.mxu1 %v5051_v13  ;;  %v5081_v48 = vld [vmem:[#allocation10 + $0xa8] ss:$16 sps:$4 sm:$0xff]   ;;  %v5086_v49 = vld [vmem:[#allocation10 + $0x84] ss:$16 sps:$4 sm:$0xff]   ;;  %v5089_v50 = vld [vmem:[#allocation10 + $0x8c] ss:$16 sps:$4 sm:$0xff]   ;;  %p5506_p1 = pnand %p5505_p0, %p5499_p11 }
  0x4c   :  { %v5084_v51 = vld [vmem:[#allocation10 + $0x80] ss:$16 sps:$4 sm:$0xff]   ;;  %v5087_v52 = vld [vmem:[#allocation10 + $0x88] ss:$16 sps:$4 sm:$0xff]   ;;  %v5092_v53 = vld [vmem:[#allocation10 + $0x64] ss:$16 sps:$4 sm:$0xff]  }
  0x4d   :  { %5016 = vmatpush3.bf16.msra.mxu0 %v5041_v7  ;;  %v5095_v54 = vld [vmem:[#allocation10 + $0x6c] ss:$16 sps:$4 sm:$0xff]   ;;  %v5090_v55 = vld [vmem:[#allocation10 + $0x60] ss:$16 sps:$4 sm:$0xff]   ;;  %v5093_v56 = vld [vmem:[#allocation10 + $0x68] ss:$16 sps:$4 sm:$0xff]  }
  0x4e   :  { %303 = vmatpush1.bf16.msra.mxu1 %v5053_v15  ;;  %856 = vmatprep.subr.bf16.mxu0 %v5068_v37  ;;  %v5096_v57 = vld [vmem:[#allocation10 + $0x40] ss:$16 sps:$4 sm:$0xff]   ;;  %v5098_v58 = vld [vmem:[#allocation10 + $0x44] ss:$16 sps:$4 sm:$0xff]   ;;  %v5099_v59 = vld [vmem:[#allocation10 + $0x48] ss:$16 sps:$4 sm:$0xff]  }
  0x4f   :  { %304 = vmatprep.subr.bf16.mxu1 %v5054_v16  ;;  %v5101_v60 = vld [vmem:[#allocation10 + $0x4c] ss:$16 sps:$4 sm:$0xff]   ;;  %v5104_v61 = vld [vmem:[#allocation10 + $0x24] ss:$16 sps:$4 sm:$0xff]   ;;  %v5102_v63 = vld [vmem:[#allocation10 + $0x20] ss:$16 sps:$4 sm:$0xff]  }
  0x50   :  { %5018 = vmatmul.mubr.msk.bf16.vlgmr.msra.gmra.mxu0 %vm148_vm1, %v122_v14  ;;  %v5107_v62 = vld [vmem:[#allocation10 + $0x2c] ss:$16 sps:$4 sm:$0xff]   ;;  %v5105_v0 = vld [vmem:[#allocation10 + $0x28] ss:$16 sps:$4 sm:$0xff]   ;;  %v5110_v1 = vld [vmem:[#allocation10 + $0x4] ss:$16 sps:$4 sm:$0xff]  }
  0x51   :  { %857 = vmatpush1.bf16.msra.mxu0 %v5066_v39  ;;  %v5113_v2 = vld [vmem:[#allocation10 + $0xc] ss:$16 sps:$4 sm:$0xff]   ;;  %v5108_v3 = vld [vmem:[#allocation10] ss:$16 sps:$4 sm:$0xff]   ;;  %v5111_v4 = vld [vmem:[#allocation10 + $0x8] ss:$16 sps:$4 sm:$0xff]  }
  0x52   :  { %305 = vmatpush1.bf16.msra.mxu1 %v5056_v17  ;;  %858 = vmatprep.subr.bf16.mxu0 %v5074_v41  ;;  %v5116_v5 = vld [vmem:[#allocation10 + $0x1e4] ss:$16 sps:$4 sm:$0xff]   ;;  %v5119_v6 = vld [vmem:[#allocation10 + $0x1ec] ss:$16 sps:$4 sm:$0xff]   ;;  %v5114_v7 = vld [vmem:[#allocation10 + $0x1e0] ss:$16 sps:$4 sm:$0xff]  }
  0x53   :  { %306 = vmatprep.subr.bf16.mxu1 %v5057_v18  ;;  %v5117_v8 = vld [vmem:[#allocation10 + $0x1e8] ss:$16 sps:$4 sm:$0xff]   ;;  %v5122_v9 = vld [vmem:[#allocation10 + $0x1c4] ss:$16 sps:$4 sm:$0xff]   ;;  %v5125_v10 = vld [vmem:[#allocation10 + $0x1cc] ss:$16 sps:$4 sm:$0xff]  }
  0x54   :  { %v5120_v11 = vld [vmem:[#allocation10 + $0x1c0] ss:$16 sps:$4 sm:$0xff]   ;;  %v5123_v12 = vld [vmem:[#allocation10 + $0x1c8] ss:$16 sps:$4 sm:$0xff]   ;;  %v5128_v13 = vld [vmem:[#allocation10 + $0x1a4] ss:$16 sps:$4 sm:$0xff]  }
  0x55   :  { %859 = vmatpush1.bf16.msra.mxu0 %v5072_v43  ;;  %v5131_v14 = vld [vmem:[#allocation10 + $0x1ac] ss:$16 sps:$4 sm:$0xff]   ;;  %v5126_v15 = vld [vmem:[#allocation10 + $0x1a0] ss:$16 sps:$4 sm:$0xff]   ;;  %v5129_v16 = vld [vmem:[#allocation10 + $0x1a8] ss:$16 sps:$4 sm:$0xff]  }
  0x56   :  { %307 = vmatpush1.bf16.msra.mxu1 %v5059_v19  ;;  %860 = vmatprep.subr.bf16.mxu0 %v5080_v45  ;;  %v5134_v17 = vld [vmem:[#allocation10 + $0x184] ss:$16 sps:$4 sm:$0xff]   ;;  %v5137_v18 = vld [vmem:[#allocation10 + $0x18c] ss:$16 sps:$4 sm:$0xff]   ;;  %v5132_v19 = vld [vmem:[#allocation10 + $0x180] ss:$16 sps:$4 sm:$0xff]  }
  0x57   :  { %308 = vmatprep.subr.bf16.mxu1 %v5060_v20  ;;  %v5135_v20 = vld [vmem:[#allocation10 + $0x188] ss:$16 sps:$4 sm:$0xff]   ;;  %s108_s30 = sshll.u32 %s5556_s29, 4  ;;  %s109_s30 = int_to_ptr.vmem [resolvable:$true] %s108_s30 }
  0x58   :  { %v5141_v24 = vld [vmem:[#allocation10 + $0x168] ss:$16 sps:$4 sm:$0xff]  }
  0x59   :  { %861 = vmatpush1.bf16.msra.mxu0 %v5078_v47 }
  0x5a   :  { %309 = vmatpush1.bf16.msra.mxu1 %v5062_v21  ;;  %862 = vmatprep.subr.bf16.mxu0 %v5086_v49  ;;  %v5140_v21 = vld [vmem:[#allocation10 + $0x164] ss:$16 sps:$4 sm:$0xff]  }
  0x5b   :  { %310 = vmatprep.subr.bf16.mxu1 %v5063_v22  ;;  %v5143_v22 = vld [vmem:[#allocation10 + $0x16c] ss:$16 sps:$4 sm:$0xff]  }
  0x5d   :  { %863 = vmatpush1.bf16.msra.mxu0 %v5084_v51 }
  0x5e   :  { %311 = vmatpush1.bf16.msra.mxu1 %v5065_v23  ;;  %864 = vmatprep.subr.bf16.mxu0 %v5092_v53  ;;  %v5138_v23 = vld [vmem:[#allocation10 + $0x160] ss:$16 sps:$4 sm:$0xff]  }
  0x5f   :  { %899 = vmatprep.subr.bf16.mxu1 %v5071_v38 }
  0x61   :  { %865 = vmatpush1.bf16.msra.mxu0 %v5090_v55 }
  0x62   :  { %866 = vmatprep.subr.bf16.mxu0 %v5098_v58 }
  0x65   :  { %867 = vmatpush1.bf16.msra.mxu0 %v5096_v57 }
  0x66   :  { %868 = vmatprep.subr.bf16.mxu0 %v5104_v61 }
  0x69   :  { %869 = vmatpush1.bf16.msra.mxu0 %v5102_v63 }
  0x6a   :  { %870 = vmatprep.subr.bf16.mxu0 %v5110_v1 }
  0x6d   :  { %871 = vmatpush1.bf16.msra.mxu0 %v5108_v3 }
  0x6e   :  { %872 = vmatprep.subr.bf16.mxu0 %v5116_v5 }
  0x71   :  { %873 = vmatpush2.bf16.msra.mxu0 %v5114_v7 }
  0x72   :  { %874 = vmatprep.subr.bf16.mxu0 %v5122_v9 }
  0x75   :  { %875 = vmatpush2.bf16.msra.mxu0 %v5120_v11 }
  0x76   :  { %876 = vmatprep.subr.bf16.mxu0 %v5128_v13 }
  0x79   :  { %877 = vmatpush2.bf16.msra.mxu0 %v5126_v15 }
  0x7a   :  { %878 = vmatprep.subr.bf16.mxu0 %v5134_v17 }
  0x7d   :  { %879 = vmatpush2.bf16.msra.mxu0 %v5132_v19  ;;  %v5554_v19 = vmov 1966171168  }
  0x7e   :  { %880 = vmatprep.subr.bf16.mxu0 %v5140_v21  ;;  %v394_v21 = vlaneseq }
  0x81   :  { %881 = vmatpush2.bf16.msra.mxu0 %v5138_v23  ;;  %v5632_v23 = vshrl.u32 %v394_v21, 7 }
 0x110   :  { %v186_v26 = vpop.f32.mrf.mxu0 }
 0x111   :  { %v187_v27 = vadd.f32 %v186_v26, %v123_v25  ;;  %v5149_v26 = vld [vmem:[#allocation10 + $0x14c] ss:$16 sps:$4 sm:$0xff]  }
 0x112   :  { %v5019_v28 = vpop.f32.mrf.mxu0 }
 0x113   :  { %v195_v30 = vmul.f32 0.2, %v187_v27  ;;  %vm193_vm2 = vcmp.ge.f32.partialorder %v187_v27, 0.0  ;;  %v5147_v28 = vld [vmem:[#allocation10 + $0x148] ss:$16 sps:$4 sm:$0xff]  }
 0x114   :  { %v189_v29 = vpop.f32.mrf.mxu0 }
 0x115   :  { %v190_v31 = vadd.f32 %v189_v29, %v123_v25  ;;  %v197_v34 = vsel %vm193_vm2, %v187_v27, %v195_v30  ;;  %v5146_v25 = vld [vmem:[#allocation10 + $0x144] ss:$16 sps:$4 sm:$0xff]   ;;  %v5144_v27 = vld [vmem:[#allocation10 + $0x140] ss:$16 sps:$4 sm:$0xff]   ;;  %v5155_v30 = vld [vmem:[#allocation10 + $0x12c] ss:$16 sps:$4 sm:$0xff]  }
 0x116   :  { %v5020_v32 = vpop.f32.mrf.mxu0  ;;  %882 = vmatprep.subr.bf16.mxu0 %v5146_v25  ;;  %v5152_v29 = vld [vmem:[#allocation10 + $0x124] ss:$16 sps:$4 sm:$0xff]  }
 0x117   :  { %vm194_vm3 = vcmp.ge.f32.partialorder %v190_v31, 0.0  ;;  %v196_v33 = vmul.f32 0.2, %v190_v31  ;;  %883 = vmatpush2.bf16.msra.mxu0 %v5144_v27  ;;  %v5153_v32 = vld [vmem:[#allocation10 + $0x128] ss:$16 sps:$4 sm:$0xff]  }
 0x118   :  { %884 = vmatprep.subr.bf16.mxu0 %v5152_v29  ;;  %v340_v29 = vld [vmem:[#allocation12 + $0x1] ss:$8 sm:$0x3] }
 0x119   :  { %v198_v35 = vsel %vm194_vm3, %v190_v31, %v196_v33  ;;  %v5150_v31 = vld [vmem:[#allocation10 + $0x120] ss:$16 sps:$4 sm:$0xff]   ;;  %v5158_v33 = vld [vmem:[#allocation10 + $0x104] ss:$16 sps:$4 sm:$0xff]  }
 0x11a   :  { %v215_v36 = vpack.c.bf16 %v198_v35, %v197_v34  ;;  %v5161_v34 = vld [vmem:[#allocation10 + $0x10c] ss:$16 sps:$4 sm:$0xff]   ;;  %v5156_v35 = vld [vmem:[#allocation10 + $0x100] ss:$16 sps:$4 sm:$0xff]  }
 0x11b   :  { %885 = vmatpush2.bf16.msra.mxu0 %v5150_v31  ;;  %v5640_v31 = vsub.s32 0, %v5632_v23 }
 0x11c   :  { %329 = vmatmul.mubr.bf16.vlgmr.msra.gmra.mxu1 %v215_v36  ;;  %886 = vmatprep.subr.bf16.mxu0 %v5158_v33  ;;  %v5159_v36 = vld [vmem:[#allocation10 + $0x108] ss:$16 sps:$4 sm:$0xff]  }
 0x11d   :  { %900 = vmatpush1.bf16.msra.mxu1 %v5069_v40 }
 0x11e   :  { %901 = vmatprep.subr.bf16.mxu1 %v5077_v42 }
 0x11f   :  { %887 = vmatpush2.bf16.msra.mxu0 %v5156_v35 }
 0x121   :  { %902 = vmatpush1.bf16.msra.mxu1 %v5075_v44 }
 0x122   :  { %903 = vmatprep.subr.bf16.mxu1 %v5083_v46 }
 0x125   :  { %904 = vmatpush1.bf16.msra.mxu1 %v5081_v48 }
 0x126   :  { %905 = vmatprep.subr.bf16.mxu1 %v5089_v50 }
 0x129   :  { %906 = vmatpush1.bf16.msra.mxu1 %v5087_v52 }
 0x12a   :  { %907 = vmatprep.subr.bf16.mxu1 %v5095_v54 }
 0x12d   :  { %908 = vmatpush1.bf16.msra.mxu1 %v5093_v56 }
 0x12e   :  { %909 = vmatprep.subr.bf16.mxu1 %v5101_v60 }
 0x131   :  { %910 = vmatpush1.bf16.msra.mxu1 %v5099_v59 }
 0x132   :  { %911 = vmatprep.subr.bf16.mxu1 %v5107_v62 }
 0x135   :  { %912 = vmatpush1.bf16.msra.mxu1 %v5105_v0 }
 0x136   :  { %913 = vmatprep.subr.bf16.mxu1 %v5113_v2 }
 0x139   :  { %914 = vmatpush1.bf16.msra.mxu1 %v5111_v4 }
 0x13a   :  { %915 = vmatprep.subr.bf16.mxu1 %v5119_v6 }
 0x13d   :  { %916 = vmatpush2.bf16.msra.mxu1 %v5117_v8 }
 0x13e   :  { %917 = vmatprep.subr.bf16.mxu1 %v5125_v10 }
 0x141   :  { %918 = vmatpush2.bf16.msra.mxu1 %v5123_v12 }
 0x142   :  { %919 = vmatprep.subr.bf16.mxu1 %v5131_v14 }
 0x145   :  { %920 = vmatpush2.bf16.msra.mxu1 %v5129_v16 }
 0x146   :  { %921 = vmatprep.subr.bf16.mxu1 %v5137_v18 }
 0x149   :  { %922 = vmatpush2.bf16.msra.mxu1 %v5135_v20  ;;  %v392_v20 = vunpack.c.l.s4 %v5554_v19 }
 0x14a   :  { %923 = vmatprep.subr.bf16.mxu1 %v5143_v22 }
 0x14b   :  { %v393_v22 = vunpack.c.0.s8 %v392_v20 }
 0x14d   :  { %924 = vmatpush2.bf16.msra.mxu1 %v5141_v24  ;;  %v5635_v25 = vsub.s32 %v393_v22, %v5632_v23 }
 0x14e   :  { %925 = vmatprep.subr.bf16.mxu1 %v5149_v26 }
 0x151   :  { %926 = vmatpush2.bf16.msra.mxu1 %v5147_v28 }
 0x152   :  { %927 = vmatprep.subr.bf16.mxu1 %v5155_v30 }
 0x155   :  { %928 = vmatpush2.bf16.msra.mxu1 %v5153_v32  ;;  %v5643_v32 = vsub.s32 1, %v5632_v23 }
 0x156   :  { %929 = vmatprep.subr.bf16.mxu1 %v5161_v34 }
 0x159   :  { %930 = vmatpush2.bf16.msra.mxu1 %v5159_v36 }
 0x1dc   :  { %v5612_v37 = vpop.f32.mrf.mxu1 }
 0x1dd   :  { %v360_v40 = vmul.f32 %v5612_v37, %v5612_v37 }
 0x1de   :  { %v5614_v38 = vpop.f32.mrf.mxu1 }
 0x1df   :  { %v361_v43 = vmul.f32 %v5614_v38, %v5614_v38 }
 0x1e0   :  { %v5616_v39 = vpop.f32.mrf.mxu1 }
 0x1e1   :  { %v343_v41 = vadd.f32 %v5616_v39, %v5612_v37  ;;  %v362_v42 = vmul.f32 %v5616_v39, %v5616_v39 }
 0x1e2   :  { %v5626_v44 = vpop.f32.mrf.mxu1 }
 0x1e3   :  { %v344_v45 = vrot.slane %v343_v41, 4  ;;  %v364_v46 = vadd.f32 %v362_v42, %v360_v40  ;;  %v350_v47 = vadd.f32 %v5626_v44, %v5614_v38  ;;  %v363_v48 = vmul.f32 %v5626_v44, %v5626_v44 }
 0x1e5   :  { %v345_v49 = vadd.f32 %v344_v45, %v343_v41  ;;  %v365_v50 = vrot.slane %v364_v46, 4  ;;  %v351_v51 = vrot.slane %v350_v47, 4  ;;  %v371_v52 = vadd.f32 %v363_v48, %v361_v43  ;;  %v342_v43 = vld [vmem:[#allocation12 + $0x2] ss:$8 sm:$0x3] }
 0x1e7   :  { %v346_v53 = vrot.slane %v345_v49, 2  ;;  %v366_v54 = vadd.f32 %v365_v50, %v364_v46  ;;  %v352_v55 = vadd.f32 %v351_v51, %v350_v47  ;;  %v372_v56 = vrot.slane %v371_v52, 4 }
 0x1e9   :  { %v347_v57 = vadd.f32 %v346_v53, %v345_v49  ;;  %v367_v58 = vrot.slane %v366_v54, 2  ;;  %v353_v59 = vrot.slane %v352_v55, 2  ;;  %v373_v60 = vadd.f32 %v372_v56, %v371_v52 }
 0x1eb   :  { %v348_v61 = vrot.slane %v347_v57, 1  ;;  %v368_v62 = vadd.f32 %v367_v58, %v366_v54  ;;  %v354_v63 = vadd.f32 %v353_v59, %v352_v55  ;;  %v374_v0 = vrot.slane %v373_v60, 2 }
 0x1ed   :  { %v349_v1 = vadd.f32 %v348_v61, %v347_v57  ;;  %v369_v2 = vrot.slane %v368_v62, 1  ;;  %v355_v3 = vrot.slane %v354_v63, 1  ;;  %v375_v4 = vadd.f32 %v374_v0, %v373_v60 }
 0x1ef   :  { %v358_v5 = vmul.f32 0.0625, %v349_v1  ;;  %v370_v6 = vadd.f32 %v369_v2, %v368_v62  ;;  %v356_v7 = vadd.f32 %v355_v3, %v354_v63  ;;  %v376_v8 = vrot.slane %v375_v4, 1 }
 0x1f1   :  { %v378_v9 = vmul.f32 0.0625, %v370_v6  ;;  %v380_v10 = vmul.f32 %v358_v5, %v358_v5  ;;  %v359_v11 = vmul.f32 0.0625, %v356_v7  ;;  %v377_v12 = vadd.f32 %v376_v8, %v375_v4 }
 0x1f3   :  { %v382_v13 = vsub.f32 %v378_v9, %v380_v10  ;;  %v379_v14 = vmul.f32 0.0625, %v377_v12  ;;  %v381_v15 = vmul.f32 %v359_v11, %v359_v11 }
 0x1f5   :  { %v384_v16 = vadd.f32 0.8, %v382_v13  ;;  %v383_v17 = vsub.f32 %v379_v14, %v381_v15 }
 0x1f7   :  { %v385_v18 = vadd.f32 0.8, %v383_v17  ;;  %5162 = vrsqrt.f32 %v384_v16 }
 0x1f9   :  { %5164 = vrsqrt.f32 %v385_v18 }
 0x204   :  { %v5163_v24 = vpop.eup %5162 }
 0x206   :  { %v5165_v26 = vpop.eup %5164 }
 0x207   :  { %v390_v27 = vcombine.low %v5163_v24, %v5165_v26 }
 0x209   :  { %v397_v28 = vrot.slane %v390_v27, %v5635_v25 }
 0x20b   :  { %v404_v30 = vrot.slane %v397_v28, %v5635_v25 }
 0x20d   :  { %v406_v33 = vmul.f32 %v404_v30, %v340_v29 }
 0x20f   :  { %v411_v34 = vrot.slane %v406_v33, %v5640_v31  ;;  %v415_v35 = vrot.slane %v406_v33, %v5643_v32 }
 0x211   :  { %v418_v36 = vmul.f32 %v411_v34, %v358_v5  ;;  %v419_v40 = vmul.f32 %v415_v35, %v359_v11  ;;  %v442_v47 = vmul.f32 %v415_v35, %v5626_v44  ;;  %v440_v48 = vmul.f32 %v415_v35, %v5614_v38 }
 0x212   :  { %v439_v51 = vmul.f32 %v411_v34, %v5612_v37  ;;  %v441_v52 = vmul.f32 %v411_v34, %v5616_v39 }
 0x213   :  { %v422_v41 = vcombine.low %v418_v36, %v419_v40 }
 0x215   :  { %v429_v42 = vrot.slane %v422_v41, %v5635_v25 }
 0x217   :  { %v436_v45 = vrot.slane %v429_v42, %v5635_v25 }
 0x219   :  { %v438_v46 = vsub.f32 %v342_v43, %v436_v45 }
 0x21b   :  { %v447_v49 = vrot.slane %v438_v46, %v5640_v31  ;;  %v451_v50 = vrot.slane %v438_v46, %v5643_v32 }
 0x21d   :  { %v457_v53 = vadd.f32 %v451_v50, %v442_v47  ;;  %v455_v54 = vadd.f32 %v451_v50, %v440_v48  ;;  %v454_v55 = vadd.f32 %v447_v49, %v439_v51  ;;  %v456_v56 = vadd.f32 %v447_v49, %v441_v52 }
 0x21f   :  { %vm459_vm4 = vcmp.ge.f32.partialorder %v455_v54, 0.0  ;;  %vm461_vm5 = vcmp.ge.f32.partialorder %v457_v53, 0.0  ;;  %v463_v57 = vmul.f32 0.2, %v455_v54  ;;  %v465_v58 = vmul.f32 0.2, %v457_v53 }
 0x220   :  { %vm458_vm6 = vcmp.ge.f32.partialorder %v454_v55, 0.0  ;;  %vm460_vm7 = vcmp.ge.f32.partialorder %v456_v56, 0.0  ;;  %v462_v44 = vmul.f32 0.2, %v454_v55  ;;  %v464_v38 = vmul.f32 0.2, %v456_v56 }
 0x221   :  { %v467_v59 = vsel %vm459_vm4, %v455_v54, %v463_v57  ;;  %v469_v60 = vsel %vm461_vm5, %v457_v53, %v465_v58 }
 0x222   :  { %v535_v61 = vpack.c.bf16 %v469_v60, %v467_v59  ;;  %v466_v62 = vsel %vm458_vm6, %v454_v55, %v462_v44  ;;  %v468_v63 = vsel %vm460_vm7, %v456_v56, %v464_v38 }
 0x223   :  { %v534_v37 = vpack.c.bf16 %v468_v63, %v466_v62 }
 0x224   :  { %888 = vmatprep.mubr.bf16.mxu0 %v535_v61  ;;  %931 = vmatprep.mubr.bf16.mxu1 %v535_v61 }
 0x225   :  { %889 = vmatmul.mubr.bf16.vlgmr.msra.gmra.mxu0 %v534_v37  ;;  %932 = vmatmul.mubr.bf16.vlgmr.msra.gmra.mxu1 %v534_v37 }
 0x226   :  { %5509 = shalt.err (!%p5506_p1)  }
 0x227   :  { %99 = dma.hbm_to_vmem [thread:$0]  %s6005_s5, 32768, %s97_s4, [#allocation4] }
 0x228   :  { %s5518_s11 = scalar_lea.vmem %s109_s30, 16384  ;;  %p5523_p3 = scmp.lt.s32.totalorder %s109_s30, %s109_s30 }
 0x229   :  { %p5519_p2 = scmp.ne.s32.totalorder %s109_s30, %s5518_s11  ;;  %p5524_p4 = scmp.lt.s32.totalorder %s5518_s11, %s5518_s11 }
 0x22b   :  { %p5525_p5 = por %p5524_p4, %p5523_p3 }
 0x22d   :  { %p5526_p6 = pnand %p5525_p5, %p5519_p2 }
 0x22f   :  { %5529 = shalt.err (!%p5526_p6)  }
 0x230   :  { %111 = dma.hbm_to_vmem [thread:$0]  %s6006_s6, 16384, %s109_s30, [#allocation4 + $0x1] }
 0x2e5   :  { %v5661_v39 = vpop.f32.mrf.mxu0  ;;  %v5663_v0 = vpop.f32.mrf.mxu1 }
 0x2e6   :  { %v978_v3 = vmul.f32 %v5661_v39, %v5661_v39  ;;  %v980_v4 = vmul.f32 %v5663_v0, %v5663_v0 }
 0x2e7   :  { %v5665_v1 = vpop.f32.mrf.mxu0  ;;  %v5667_v2 = vpop.f32.mrf.mxu1 }
 0x2e8   :  { %v979_v11 = vmul.f32 %v5665_v1, %v5665_v1  ;;  %v981_v12 = vmul.f32 %v5667_v2, %v5667_v2 }
 0x2e9   :  { %v5673_v5 = vpop.f32.mrf.mxu0  ;;  %v5675_v6 = vpop.f32.mrf.mxu1 }
 0x2ea   :  { %v946_v7 = vadd.f32 %v5673_v5, %v5661_v39  ;;  %v982_v8 = vmul.f32 %v5673_v5, %v5673_v5  ;;  %v960_v9 = vadd.f32 %v5675_v6, %v5663_v0  ;;  %v984_v10 = vmul.f32 %v5675_v6, %v5675_v6 }
 0x2eb   :  { %v5689_v13 = vpop.f32.mrf.mxu0  ;;  %v5691_v14 = vpop.f32.mrf.mxu1 }
 0x2ec   :  { %v947_v15 = vrot.slane %v946_v7, 4  ;;  %v986_v16 = vadd.f32 %v982_v8, %v978_v3  ;;  %v961_v17 = vrot.slane %v960_v9, 4  ;;  %v1000_v18 = vadd.f32 %v984_v10, %v980_v4 }
 0x2ed   :  { %v953_v19 = vadd.f32 %v5689_v13, %v5665_v1  ;;  %v983_v20 = vmul.f32 %v5689_v13, %v5689_v13  ;;  %v967_v21 = vadd.f32 %v5691_v14, %v5667_v2  ;;  %v985_v22 = vmul.f32 %v5691_v14, %v5691_v14 }
 0x2ee   :  { %v948_v24 = vadd.f32 %v947_v15, %v946_v7  ;;  %v987_v26 = vrot.slane %v986_v16, 4  ;;  %v962_v27 = vadd.f32 %v961_v17, %v960_v9  ;;  %v1001_v28 = vrot.slane %v1000_v18, 4 }
 0x2ef   :  { %v954_v29 = vrot.slane %v953_v19, 4  ;;  %v993_v30 = vadd.f32 %v983_v20, %v979_v11  ;;  %v968_v33 = vrot.slane %v967_v21, 4  ;;  %v1007_v34 = vadd.f32 %v985_v22, %v981_v12 }
 0x2f0   :  { %v949_v35 = vrot.slane %v948_v24, 2  ;;  %v988_v36 = vadd.f32 %v987_v26, %v986_v16  ;;  %v963_v40 = vrot.slane %v962_v27, 2  ;;  %v1002_v41 = vadd.f32 %v1001_v28, %v1000_v18 }
 0x2f1   :  { %v955_v42 = vadd.f32 %v954_v29, %v953_v19  ;;  %v994_v43 = vrot.slane %v993_v30, 4  ;;  %v969_v45 = vadd.f32 %v968_v33, %v967_v21  ;;  %v1008_v46 = vrot.slane %v1007_v34, 4 }
 0x2f2   :  { %v950_v47 = vadd.f32 %v949_v35, %v948_v24  ;;  %v989_v48 = vrot.slane %v988_v36, 2  ;;  %v964_v49 = vadd.f32 %v963_v40, %v962_v27  ;;  %v1003_v50 = vrot.slane %v1002_v41, 2 }
 0x2f3   :  { %v956_v51 = vrot.slane %v955_v42, 2  ;;  %v995_v52 = vadd.f32 %v994_v43, %v993_v30  ;;  %v970_v53 = vrot.slane %v969_v45, 2  ;;  %v1009_v54 = vadd.f32 %v1008_v46, %v1007_v34 }
 0x2f4   :  { %v951_v55 = vrot.slane %v950_v47, 1  ;;  %v990_v56 = vadd.f32 %v989_v48, %v988_v36  ;;  %v965_v57 = vrot.slane %v964_v49, 1  ;;  %v1004_v58 = vadd.f32 %v1003_v50, %v1002_v41 }
 0x2f5   :  { %v957_v44 = vadd.f32 %v956_v51, %v955_v42  ;;  %v996_v38 = vrot.slane %v995_v52, 2  ;;  %v971_v59 = vadd.f32 %v970_v53, %v969_v45  ;;  %v1010_v60 = vrot.slane %v1009_v54, 2 }
 0x2f6   :  { %v952_v61 = vadd.f32 %v951_v55, %v950_v47  ;;  %v991_v62 = vrot.slane %v990_v56, 1  ;;  %v966_v63 = vadd.f32 %v965_v57, %v964_v49  ;;  %v1005_v37 = vrot.slane %v1004_v58, 1 }
 0x2f7   :  { %v958_v3 = vrot.slane %v957_v44, 1  ;;  %v997_v4 = vadd.f32 %v996_v38, %v995_v52  ;;  %v972_v7 = vrot.slane %v971_v59, 1  ;;  %v1011_v8 = vadd.f32 %v1010_v60, %v1009_v54 }
 0x2f8   :  { %v974_v9 = vmul.f32 0.0625, %v952_v61  ;;  %v992_v10 = vadd.f32 %v991_v62, %v990_v56  ;;  %v976_v11 = vmul.f32 0.0625, %v966_v63  ;;  %v1006_v12 = vadd.f32 %v1005_v37, %v1004_v58  ;;  %v943_v56 = vld [vmem:[#allocation12 + $0x3] ss:$8 sm:$0xf] }
 0x2f9   :  { %v959_v15 = vadd.f32 %v958_v3, %v957_v44  ;;  %v998_v16 = vrot.slane %v997_v4, 1  ;;  %v973_v17 = vadd.f32 %v972_v7, %v971_v59  ;;  %v1012_v18 = vrot.slane %v1011_v8, 1 }
 0x2fa   :  { %v1014_v19 = vmul.f32 0.0625, %v992_v10  ;;  %v1018_v20 = vmul.f32 %v974_v9, %v974_v9  ;;  %v1016_v21 = vmul.f32 0.0625, %v1006_v12  ;;  %v1020_v22 = vmul.f32 %v976_v11, %v976_v11 }
 0x2fb   :  { %v975_v24 = vmul.f32 0.0625, %v959_v15  ;;  %v999_v26 = vadd.f32 %v998_v16, %v997_v4  ;;  %v977_v27 = vmul.f32 0.0625, %v973_v17  ;;  %v1013_v28 = vadd.f32 %v1012_v18, %v1011_v8  ;;  %v945_v16 = vld [vmem:[#allocation12 + $0x4] ss:$8 sm:$0xf] }
 0x2fc   :  { %v1022_v29 = vsub.f32 %v1014_v19, %v1018_v20  ;;  %v1024_v30 = vsub.f32 %v1016_v21, %v1020_v22  ;;  %v5705_v58 = vsub.s32 2, %v5632_v23  ;;  %v5708_v44 = vsub.s32 3, %v5632_v23 }
 0x2fd   :  { %v1015_v33 = vmul.f32 0.0625, %v999_v26  ;;  %v1019_v34 = vmul.f32 %v975_v24, %v975_v24  ;;  %v1017_v35 = vmul.f32 0.0625, %v1013_v28  ;;  %v1021_v36 = vmul.f32 %v977_v27, %v977_v27 }
 0x2fe   :  { %v1026_v40 = vadd.f32 0.8, %v1022_v29  ;;  %v1028_v41 = vadd.f32 0.8, %v1024_v30 }
 0x2ff   :  { %v1023_v42 = vsub.f32 %v1015_v33, %v1019_v34  ;;  %v1025_v43 = vsub.f32 %v1017_v35, %v1021_v36 }
 0x300   :  { %5166 = vrsqrt.f32 %v1026_v40 }
 0x301   :  { %v1027_v45 = vadd.f32 0.8, %v1023_v42  ;;  %v1029_v46 = vadd.f32 0.8, %v1025_v43  ;;  %5168 = vrsqrt.f32 %v1028_v41 }
 0x303   :  { %5170 = vrsqrt.f32 %v1027_v45 }
 0x304   :  { %5172 = vrsqrt.f32 %v1029_v46 }
 0x30d   :  { %v5167_v47 = vpop.eup %5166 }
 0x30e   :  { %v5169_v48 = vpop.eup %5168 }
 0x310   :  { %v5171_v49 = vpop.eup %5170 }
 0x311   :  { %v5173_v50 = vpop.eup %5172  ;;  %v1038_v51 = vcombine.low %v5167_v47, %v5171_v49 }
 0x312   :  { %v1039_v52 = vcombine.low %v5169_v48, %v5173_v50 }
 0x313   :  { %v1046_v53 = vrot.slane %v1038_v51, %v5635_v25 }
 0x314   :  { %v1053_v54 = vrot.slane %v1039_v52, %v5635_v25 }
 0x316   :  { %v1054_v55 = vcombine.low %v1046_v53, %v1053_v54 }
 0x318   :  { %v1061_v57 = vrot.slane %v1054_v55, %v5635_v25 }
 0x31a   :  { %v1063_v38 = vmul.f32 %v1061_v57, %v943_v56 }
 0x31c   :  { %v1068_v59 = vrot.slane %v1063_v38, %v5640_v31  ;;  %v1072_v60 = vrot.slane %v1063_v38, %v5643_v32  ;;  %v1076_v61 = vrot.slane %v1063_v38, %v5705_v58  ;;  %v1080_v62 = vrot.slane %v1063_v38, %v5708_v44 }
 0x31e   :  { %v1085_v63 = vmul.f32 %v1068_v59, %v974_v9  ;;  %v1086_v37 = vmul.f32 %v1072_v60, %v975_v24  ;;  %v1087_v3 = vmul.f32 %v1076_v61, %v976_v11  ;;  %v1088_v4 = vmul.f32 %v1080_v62, %v977_v27 }
 0x31f   :  { %v1119_v19 = vmul.f32 %v1068_v59, %v5661_v39  ;;  %v1120_v20 = vmul.f32 %v1072_v60, %v5665_v1  ;;  %v1121_v9 = vmul.f32 %v1076_v61, %v5663_v0  ;;  %v1122_v11 = vmul.f32 %v1080_v62, %v5667_v2 }
 0x320   :  { %v1093_v7 = vcombine.low %v1085_v63, %v1086_v37  ;;  %v1094_v8 = vcombine.low %v1087_v3, %v1088_v4  ;;  %v1123_v27 = vmul.f32 %v1068_v59, %v5673_v5  ;;  %v1124_v28 = vmul.f32 %v1072_v60, %v5689_v13 }
 0x321   :  { %v1125_v39 = vmul.f32 %v1076_v61, %v5675_v6  ;;  %v1126_v1 = vmul.f32 %v1080_v62, %v5691_v14 }
 0x322   :  { %v1101_v10 = vrot.slane %v1093_v7, %v5635_v25  ;;  %v1108_v12 = vrot.slane %v1094_v8, %v5635_v25 }
 0x324   :  { %v1109_v15 = vcombine.low %v1101_v10, %v1108_v12 }
 0x326   :  { %v1116_v17 = vrot.slane %v1109_v15, %v5635_v25 }
 0x328   :  { %v1118_v18 = vsub.f32 %v945_v16, %v1116_v17 }
 0x32a   :  { %v1131_v21 = vrot.slane %v1118_v18, %v5640_v31  ;;  %v1135_v22 = vrot.slane %v1118_v18, %v5643_v32  ;;  %v1139_v24 = vrot.slane %v1118_v18, %v5705_v58  ;;  %v1143_v26 = vrot.slane %v1118_v18, %v5708_v44 }
 0x32c   :  { %v1148_v29 = vadd.f32 %v1131_v21, %v1119_v19  ;;  %v1149_v0 = vadd.f32 %v1135_v22, %v1120_v20  ;;  %v1150_v30 = vadd.f32 %v1139_v24, %v1121_v9  ;;  %v1151_v2 = vadd.f32 %v1143_v26, %v1122_v11 }
 0x32d   :  { %v1152_v33 = vadd.f32 %v1131_v21, %v1123_v27  ;;  %v1153_v34 = vadd.f32 %v1135_v22, %v1124_v28  ;;  %v1154_v35 = vadd.f32 %v1139_v24, %v1125_v39  ;;  %v1155_v36 = vadd.f32 %v1143_v26, %v1126_v1 }
 0x32e   :  { %vm1156_vm8 = vcmp.ge.f32.partialorder %v1148_v29, 0.0  ;;  %vm1157_vm9 = vcmp.ge.f32.partialorder %v1149_v0, 0.0  ;;  %vm1158_vm10 = vcmp.ge.f32.partialorder %v1150_v30, 0.0  ;;  %vm1159_vm11 = vcmp.ge.f32.partialorder %v1151_v2, 0.0 }
 0x32f   :  { %vm1160_vm12 = vcmp.ge.f32.partialorder %v1152_v33, 0.0  ;;  %vm1161_vm13 = vcmp.ge.f32.partialorder %v1153_v34, 0.0  ;;  %vm1162_vm14 = vcmp.ge.f32.partialorder %v1154_v35, 0.0  ;;  %vm1163_vm15 = vcmp.ge.f32.partialorder %v1155_v36, 0.0 }
 0x330   :  { %v1164_v5 = vmul.f32 0.2, %v1148_v29  ;;  %v1165_v6 = vmul.f32 0.2, %v1149_v0  ;;  %v1166_v13 = vmul.f32 0.2, %v1150_v30 }
 0x331   :  { %v1167_v14 = vmul.f32 0.2, %v1151_v2  ;;  %v1168_v40 = vmul.f32 0.2, %v1152_v33  ;;  %v1169_v41 = vmul.f32 0.2, %v1153_v34 }
 0x332   :  { %v1170_v42 = vmul.f32 0.2, %v1154_v35  ;;  %v1171_v43 = vmul.f32 0.2, %v1155_v36  ;;  %v5730_v45 = vsel %vm1156_vm8, %v1148_v29, %v1164_v5  ;;  %v1173_v46 = vsel %vm1157_vm9, %v1149_v0, %v1165_v6 }
 0x333   :  { %v5734_v47 = vsel %vm1158_vm10, %v1150_v30, %v1166_v13  ;;  %v1175_v48 = vsel %vm1159_vm11, %v1151_v2, %v1167_v14  ;;  %v5738_v49 = vsel %vm1160_vm12, %v1152_v33, %v1168_v40  ;;  %v1177_v50 = vsel %vm1161_vm13, %v1153_v34, %v1169_v41 }
 0x334   :  { %v5742_v51 = vsel %vm1162_vm14, %v1154_v35, %v1170_v42  ;;  %v1179_v52 = vsel %vm1163_vm15, %v1155_v36, %v1171_v43 }
 0x335   :  { %5536 = dma.done.wait [#allocation4], 32768 }
 0x336   :  { %5537 = vsyncadd [#allocation4], 4294934528  ;;  %v5745_v53 = vpack.c.bf16 %v1177_v50, %v1173_v46  ;;  %v5747_v54 = vpack.c.bf16 %v1179_v52, %v1175_v48  ;;  %v1240_v55 = vld [vmem:[#allocation2 + $0x1c0] sm:$0xff] }
 0x337   :  { %v1244_v56 = vld [vmem:[#allocation2 + $0x1e0] sm:$0xff] }
 0x338   :  { %2756 = vmatprep.mubr.bf16.mxu0 %v5745_v53  ;;  %2799 = vmatprep.mubr.bf16.mxu1 %v5747_v54  ;;  %v1368_v57 = vld [vmem:[#allocation2 + $0x5c0] sm:$0xff]  ;;  %v4675_v38 = vcombine.high %v1240_v55, %v1244_v56  ;;  %v4674_v60 = vcombine.low %v1240_v55, %v1244_v56 }
 0x339   :  { %v1372_v59 = vld [vmem:[#allocation2 + $0x5e0] sm:$0xff] }
 0x33a   :  { %v1232_v61 = vld [vmem:[#allocation2 + $0x180] sm:$0xff]  ;;  %v4803_v63 = vcombine.high %v1368_v57, %v1372_v59  ;;  %v4802_v37 = vcombine.low %v1368_v57, %v1372_v59  ;;  %2724 = vmatprep.subr.bf16.mxu0 %v4675_v38 }
 0x33b   :  { %v1236_v62 = vld [vmem:[#allocation2 + $0x1a0] sm:$0xff]  ;;  %2725 = vmatpush1.bf16.msra.mxu0 %v4674_v60 }
 0x33c   :  { %v4667_v3 = vcombine.high %v1232_v61, %v1236_v62  ;;  %v1360_v4 = vld [vmem:[#allocation2 + $0x580] sm:$0xff]  ;;  %2767 = vmatprep.subr.bf16.mxu1 %v4803_v63  ;;  %v4666_v17 = vcombine.low %v1232_v61, %v1236_v62 }
 0x33d   :  { %v1364_v7 = vld [vmem:[#allocation2 + $0x5a0] sm:$0xff]  ;;  %2768 = vmatpush1.bf16.msra.mxu1 %v4802_v37 }
 0x33e   :  { %v1224_v8 = vld [vmem:[#allocation2 + $0x140] sm:$0xff]  ;;  %v4795_v10 = vcombine.high %v1360_v4, %v1364_v7  ;;  %2726 = vmatprep.subr.bf16.mxu0 %v4667_v3  ;;  %v4794_v18 = vcombine.low %v1360_v4, %v1364_v7 }
 0x33f   :  { %v1228_v12 = vld [vmem:[#allocation2 + $0x160] sm:$0xff]  ;;  %2727 = vmatpush1.bf16.msra.mxu0 %v4666_v17 }
 0x340   :  { %v1352_v15 = vld [vmem:[#allocation2 + $0x540] sm:$0xff]  ;;  %v4659_v19 = vcombine.high %v1224_v8, %v1228_v12  ;;  %2769 = vmatprep.subr.bf16.mxu1 %v4795_v10  ;;  %v4658_v24 = vcombine.low %v1224_v8, %v1228_v12 }
 0x341   :  { %v1356_v16 = vld [vmem:[#allocation2 + $0x560] sm:$0xff]  ;;  %2770 = vmatpush1.bf16.msra.mxu1 %v4794_v18 }
 0x342   :  { %v4787_v20 = vcombine.high %v1352_v15, %v1356_v16  ;;  %v1216_v9 = vld [vmem:[#allocation2 + $0x100] sm:$0xff]  ;;  %2728 = vmatprep.subr.bf16.mxu0 %v4659_v19  ;;  %v4786_v26 = vcombine.low %v1352_v15, %v1356_v16 }
 0x343   :  { %v1220_v11 = vld [vmem:[#allocation2 + $0x120] sm:$0xff]  ;;  %2729 = vmatpush1.bf16.msra.mxu0 %v4658_v24 }
 0x344   :  { %v1344_v21 = vld [vmem:[#allocation2 + $0x500] sm:$0xff]  ;;  %v4651_v27 = vcombine.high %v1216_v9, %v1220_v11  ;;  %2771 = vmatprep.subr.bf16.mxu1 %v4787_v20  ;;  %v4650_v30 = vcombine.low %v1216_v9, %v1220_v11 }
 0x345   :  { %v1348_v22 = vld [vmem:[#allocation2 + $0x520] sm:$0xff]  ;;  %2772 = vmatpush1.bf16.msra.mxu1 %v4786_v26 }
 0x346   :  { %v4779_v28 = vcombine.high %v1344_v21, %v1348_v22  ;;  %v1208_v39 = vld [vmem:[#allocation2 + $0xc0] sm:$0xff]  ;;  %2730 = vmatprep.subr.bf16.mxu0 %v4651_v27  ;;  %v4778_v2 = vcombine.low %v1344_v21, %v1348_v22 }
 0x347   :  { %v1212_v1 = vld [vmem:[#allocation2 + $0xe0] sm:$0xff]  ;;  %2731 = vmatpush1.bf16.msra.mxu0 %v4650_v30 }
 0x348   :  { %v1336_v29 = vld [vmem:[#allocation2 + $0x4c0] sm:$0xff]  ;;  %v4643_v33 = vcombine.high %v1208_v39, %v1212_v1  ;;  %2773 = vmatprep.subr.bf16.mxu1 %v4779_v28  ;;  %v4642_v13 = vcombine.low %v1208_v39, %v1212_v1 }
 0x349   :  { %v1340_v0 = vld [vmem:[#allocation2 + $0x4e0] sm:$0xff]  ;;  %2774 = vmatpush1.bf16.msra.mxu1 %v4778_v2 }
 0x34a   :  { %v4771_v34 = vcombine.high %v1336_v29, %v1340_v0  ;;  %v1200_v35 = vld [vmem:[#allocation2 + $0x80] sm:$0xff]  ;;  %2732 = vmatprep.subr.bf16.mxu0 %v4643_v33  ;;  %v4770_v14 = vcombine.low %v1336_v29, %v1340_v0 }
 0x34b   :  { %v1204_v36 = vld [vmem:[#allocation2 + $0xa0] sm:$0xff]  ;;  %2733 = vmatpush1.bf16.msra.mxu0 %v4642_v13 }
 0x34c   :  { %v1328_v5 = vld [vmem:[#allocation2 + $0x480] sm:$0xff]  ;;  %v4635_v40 = vcombine.high %v1200_v35, %v1204_v36  ;;  %2775 = vmatprep.subr.bf16.mxu1 %v4771_v34  ;;  %v4634_v50 = vcombine.low %v1200_v35, %v1204_v36 }
 0x34d   :  { %v1332_v6 = vld [vmem:[#allocation2 + $0x4a0] sm:$0xff]  ;;  %2776 = vmatpush1.bf16.msra.mxu1 %v4770_v14 }
 0x34e   :  { %v4763_v41 = vcombine.high %v1328_v5, %v1332_v6  ;;  %v1192_v42 = vld [vmem:[#allocation2 + $0x40] sm:$0xff]  ;;  %2734 = vmatprep.subr.bf16.mxu0 %v4635_v40  ;;  %v4762_v52 = vcombine.low %v1328_v5, %v1332_v6 }
 0x34f   :  { %v1196_v43 = vld [vmem:[#allocation2 + $0x60] sm:$0xff]  ;;  %2735 = vmatpush1.bf16.msra.mxu0 %v4634_v50 }
 0x350   :  { %v1320_v46 = vld [vmem:[#allocation2 + $0x440] sm:$0xff]  ;;  %v4627_v55 = vcombine.high %v1192_v42, %v1196_v43  ;;  %2777 = vmatprep.subr.bf16.mxu1 %v4763_v41  ;;  %v4626_v61 = vcombine.low %v1192_v42, %v1196_v43 }
 0x351   :  { %v1324_v48 = vld [vmem:[#allocation2 + $0x460] sm:$0xff]  ;;  %2778 = vmatpush1.bf16.msra.mxu1 %v4762_v52 }
 0x352   :  { %v4755_v56 = vcombine.high %v1320_v46, %v1324_v48  ;;  %v1184_v57 = vld [vmem:[#allocation2] sm:$0xff]  ;;  %2736 = vmatprep.subr.bf16.mxu0 %v4627_v55  ;;  %v4754_v62 = vcombine.low %v1320_v46, %v1324_v48 }
 0x353   :  { %v1188_v38 = vld [vmem:[#allocation2 + $0x20] sm:$0xff]  ;;  %2737 = vmatpush1.bf16.msra.mxu0 %v4626_v61 }
 0x354   :  { %v1312_v59 = vld [vmem:[#allocation2 + $0x400] sm:$0xff]  ;;  %v4619_v63 = vcombine.high %v1184_v57, %v1188_v38  ;;  %2779 = vmatprep.subr.bf16.mxu1 %v4755_v56  ;;  %v4618_v10 = vcombine.low %v1184_v57, %v1188_v38 }
 0x355   :  { %v1316_v60 = vld [vmem:[#allocation2 + $0x420] sm:$0xff]  ;;  %2780 = vmatpush1.bf16.msra.mxu1 %v4754_v62 }
 0x356   :  { %v4747_v37 = vcombine.high %v1312_v59, %v1316_v60  ;;  %v1304_v3 = vld [vmem:[#allocation2 + $0x3c0] sm:$0xff]  ;;  %2738 = vmatprep.subr.bf16.mxu0 %v4619_v63  ;;  %v4746_v12 = vcombine.low %v1312_v59, %v1316_v60 }
 0x357   :  { %v1308_v4 = vld [vmem:[#allocation2 + $0x3e0] sm:$0xff]  ;;  %2739 = vmatpush1.bf16.msra.mxu0 %v4618_v10 }
 0x358   :  { %v1432_v7 = vld [vmem:[#allocation2 + $0x7c0] sm:$0xff]  ;;  %v4739_v15 = vcombine.high %v1304_v3, %v1308_v4  ;;  %2781 = vmatprep.subr.bf16.mxu1 %v4747_v37  ;;  %v4738_v9 = vcombine.low %v1304_v3, %v1308_v4 }
 0x359   :  { %v1436_v8 = vld [vmem:[#allocation2 + $0x7e0] sm:$0xff]  ;;  %2782 = vmatpush1.bf16.msra.mxu1 %v4746_v12 }
 0x35a   :  { %v4867_v16 = vcombine.high %v1432_v7, %v1436_v8  ;;  %v1296_v17 = vld [vmem:[#allocation2 + $0x380] sm:$0xff]  ;;  %2740 = vmatprep.subr.bf16.mxu0 %v4739_v15  ;;  %v4866_v11 = vcombine.low %v1432_v7, %v1436_v8 }
 0x35b   :  { %v1300_v18 = vld [vmem:[#allocation2 + $0x3a0] sm:$0xff]  ;;  %2741 = vmatpush2.bf16.msra.mxu0 %v4738_v9  ;;  %v1241_v9 = vld [vmem:[#allocation2 + $0x1c8] sm:$0xff] }
 0x35c   :  { %v1424_v19 = vld [vmem:[#allocation2 + $0x780] sm:$0xff]  ;;  %v4731_v21 = vcombine.high %v1296_v17, %v1300_v18  ;;  %2783 = vmatprep.subr.bf16.mxu1 %v4867_v16  ;;  %v4730_v39 = vcombine.low %v1296_v17, %v1300_v18 }
 0x35d   :  { %v1428_v20 = vld [vmem:[#allocation2 + $0x7a0] sm:$0xff]  ;;  %2784 = vmatpush2.bf16.msra.mxu1 %v4866_v11  ;;  %v1245_v11 = vld [vmem:[#allocation2 + $0x1e8] sm:$0xff] }
 0x35e   :  { %v4859_v22 = vcombine.high %v1424_v19, %v1428_v20  ;;  %v1288_v24 = vld [vmem:[#allocation2 + $0x340] sm:$0xff]  ;;  %2742 = vmatprep.subr.bf16.mxu0 %v4731_v21  ;;  %v4858_v1 = vcombine.low %v1424_v19, %v1428_v20  ;;  %v1369_v21 = vld [vmem:[#allocation2 + $0x5c8] sm:$0xff] }
 0x35f   :  { %v1292_v26 = vld [vmem:[#allocation2 + $0x360] sm:$0xff]  ;;  %2743 = vmatpush2.bf16.msra.mxu0 %v4730_v39  ;;  %v1233_v39 = vld [vmem:[#allocation2 + $0x188] sm:$0xff] }
 0x360   :  { %v1416_v27 = vld [vmem:[#allocation2 + $0x740] sm:$0xff]  ;;  %v4723_v29 = vcombine.high %v1288_v24, %v1292_v26  ;;  %2785 = vmatprep.subr.bf16.mxu1 %v4859_v22  ;;  %v4722_v35 = vcombine.low %v1288_v24, %v1292_v26  ;;  %v1373_v22 = vld [vmem:[#allocation2 + $0x5e8] sm:$0xff] }
 0x361   :  { %v1420_v28 = vld [vmem:[#allocation2 + $0x760] sm:$0xff]  ;;  %2786 = vmatpush2.bf16.msra.mxu1 %v4858_v1  ;;  %v1237_v1 = vld [vmem:[#allocation2 + $0x1a8] sm:$0xff] }
 0x362   :  { %v4851_v0 = vcombine.high %v1416_v27, %v1420_v28  ;;  %v1280_v30 = vld [vmem:[#allocation2 + $0x300] sm:$0xff]  ;;  %2744 = vmatprep.subr.bf16.mxu0 %v4723_v29  ;;  %v4850_v36 = vcombine.low %v1416_v27, %v1420_v28  ;;  %v4677_v27 = vcombine.high %v1241_v9, %v1245_v11  ;;  %v4805_v28 = vcombine.high %v1369_v21, %v1373_v22 }
 0x363   :  { %v1284_v2 = vld [vmem:[#allocation2 + $0x320] sm:$0xff]  ;;  %2745 = vmatpush2.bf16.msra.mxu0 %v4722_v35  ;;  %v5753_v29 = vpack.c.bf16 %v5738_v49, %v5730_v45  ;;  %v4669_v35 = vcombine.high %v1233_v39, %v1237_v1  ;;  %v1353_v45 = vld [vmem:[#allocation2 + $0x548] sm:$0xff] }
 0x364   :  { %v1408_v33 = vld [vmem:[#allocation2 + $0x700] sm:$0xff]  ;;  %v4715_v5 = vcombine.high %v1280_v30, %v1284_v2  ;;  %2787 = vmatprep.subr.bf16.mxu1 %v4851_v0  ;;  %v4714_v42 = vcombine.low %v1280_v30, %v1284_v2  ;;  %v1361_v0 = vld [vmem:[#allocation2 + $0x588] sm:$0xff]  ;;  %v5757_v2 = vpack.c.bf16 %v5742_v51, %v5734_v47 }
 0x365   :  { %v1412_v34 = vld [vmem:[#allocation2 + $0x720] sm:$0xff]  ;;  %2788 = vmatpush2.bf16.msra.mxu1 %v4850_v36  ;;  %v1365_v30 = vld [vmem:[#allocation2 + $0x5a8] sm:$0xff] }
 0x366   :  { %v4843_v6 = vcombine.high %v1408_v33, %v1412_v34  ;;  %v1272_v13 = vld [vmem:[#allocation2 + $0x2c0] sm:$0xff]  ;;  %2746 = vmatprep.subr.bf16.mxu0 %v4715_v5  ;;  %v4842_v43 = vcombine.low %v1408_v33, %v1412_v34  ;;  %v4676_v33 = vcombine.low %v1241_v9, %v1245_v11  ;;  %v4804_v34 = vcombine.low %v1369_v21, %v1373_v22  ;;  %v1225_v5 = vld [vmem:[#allocation2 + $0x148] sm:$0xff] }
 0x367   :  { %v1276_v14 = vld [vmem:[#allocation2 + $0x2e0] sm:$0xff]  ;;  %2747 = vmatpush2.bf16.msra.mxu0 %v4714_v42  ;;  %v4797_v36 = vcombine.high %v1361_v0, %v1365_v30  ;;  %v1357_v49 = vld [vmem:[#allocation2 + $0x568] sm:$0xff]  ;;  %v4796_v47 = vcombine.low %v1361_v0, %v1365_v30 }
 0x368   :  { %v1400_v40 = vld [vmem:[#allocation2 + $0x6c0] sm:$0xff]  ;;  %v4707_v46 = vcombine.high %v1272_v13, %v1276_v14  ;;  %2789 = vmatprep.subr.bf16.mxu1 %v4843_v6  ;;  %v4706_v57 = vcombine.low %v1272_v13, %v1276_v14  ;;  %v1229_v6 = vld [vmem:[#allocation2 + $0x168] sm:$0xff]  ;;  %v4668_v13 = vcombine.low %v1233_v39, %v1237_v1  ;;  %v4789_v14 = vcombine.high %v1353_v45, %v1357_v49 }
 0x369   :  { %v1404_v41 = vld [vmem:[#allocation2 + $0x6e0] sm:$0xff]  ;;  %2790 = vmatpush2.bf16.msra.mxu1 %v4842_v43  ;;  %v4661_v51 = vcombine.high %v1225_v5, %v1229_v6  ;;  %v1345_v42 = vld [vmem:[#allocation2 + $0x508] sm:$0xff] }
 0x36a   :  { %v4835_v48 = vcombine.high %v1400_v40, %v1404_v41  ;;  %v1264_v50 = vld [vmem:[#allocation2 + $0x280] sm:$0xff]  ;;  %2748 = vmatprep.subr.bf16.mxu0 %v4707_v46  ;;  %v4834_v38 = vcombine.low %v1400_v40, %v1404_v41  ;;  %v1217_v40 = vld [vmem:[#allocation2 + $0x108] sm:$0xff]  ;;  %v4660_v46 = vcombine.low %v1225_v5, %v1229_v6 }
 0x36b   :  { %v1268_v52 = vld [vmem:[#allocation2 + $0x2a0] sm:$0xff]  ;;  %2749 = vmatpush2.bf16.msra.mxu0 %v4706_v57  ;;  %v1221_v41 = vld [vmem:[#allocation2 + $0x128] sm:$0xff] }
 0x36c   :  { %v1392_v55 = vld [vmem:[#allocation2 + $0x680] sm:$0xff]  ;;  %v4699_v59 = vcombine.high %v1264_v50, %v1268_v52  ;;  %2791 = vmatprep.subr.bf16.mxu1 %v4835_v48  ;;  %v4698_v3 = vcombine.low %v1264_v50, %v1268_v52  ;;  %v1349_v43 = vld [vmem:[#allocation2 + $0x528] sm:$0xff]  ;;  %v4788_v48 = vcombine.low %v1353_v45, %v1357_v49  ;;  %v4653_v50 = vcombine.high %v1217_v40, %v1221_v41 }
 0x36d   :  { %v1396_v56 = vld [vmem:[#allocation2 + $0x6a0] sm:$0xff]  ;;  %2792 = vmatpush2.bf16.msra.mxu1 %v4834_v38  ;;  %v4781_v52 = vcombine.high %v1345_v42, %v1349_v43  ;;  %v1337_v57 = vld [vmem:[#allocation2 + $0x4c8] sm:$0xff] }
 0x36e   :  { %v4827_v60 = vcombine.high %v1392_v55, %v1396_v56  ;;  %v1256_v61 = vld [vmem:[#allocation2 + $0x240] sm:$0xff]  ;;  %2750 = vmatprep.subr.bf16.mxu0 %v4699_v59  ;;  %v4826_v4 = vcombine.low %v1392_v55, %v1396_v56  ;;  %v1209_v55 = vld [vmem:[#allocation2 + $0xc8] sm:$0xff]  ;;  %v4652_v59 = vcombine.low %v1217_v40, %v1221_v41 }
 0x36f   :  { %v1260_v62 = vld [vmem:[#allocation2 + $0x260] sm:$0xff]  ;;  %2751 = vmatpush2.bf16.msra.mxu0 %v4698_v3  ;;  %v1213_v56 = vld [vmem:[#allocation2 + $0xe8] sm:$0xff] }
 0x370   :  { %v1384_v63 = vld [vmem:[#allocation2 + $0x640] sm:$0xff]  ;;  %v4691_v7 = vcombine.high %v1256_v61, %v1260_v62  ;;  %2793 = vmatprep.subr.bf16.mxu1 %v4827_v60  ;;  %v4690_v17 = vcombine.low %v1256_v61, %v1260_v62  ;;  %v1341_v38 = vld [vmem:[#allocation2 + $0x4e8] sm:$0xff]  ;;  %v4780_v60 = vcombine.low %v1345_v42, %v1349_v43  ;;  %v4645_v61 = vcombine.high %v1209_v55, %v1213_v56 }
 0x371   :  { %v1388_v37 = vld [vmem:[#allocation2 + $0x660] sm:$0xff]  ;;  %2794 = vmatpush2.bf16.msra.mxu1 %v4826_v4  ;;  %v4773_v62 = vcombine.high %v1337_v57, %v1341_v38  ;;  %v1329_v3 = vld [vmem:[#allocation2 + $0x488] sm:$0xff] }
 0x372   :  { %v4819_v8 = vcombine.high %v1384_v63, %v1388_v37  ;;  %v1248_v10 = vld [vmem:[#allocation2 + $0x200] sm:$0xff]  ;;  %2752 = vmatprep.subr.bf16.mxu0 %v4691_v7  ;;  %v4818_v18 = vcombine.low %v1384_v63, %v1388_v37  ;;  %v1201_v63 = vld [vmem:[#allocation2 + $0x88] sm:$0xff]  ;;  %v4644_v7 = vcombine.low %v1209_v55, %v1213_v56 }
 0x373   :  { %v1252_v12 = vld [vmem:[#allocation2 + $0x220] sm:$0xff]  ;;  %2753 = vmatpush2.bf16.msra.mxu0 %v4690_v17  ;;  %v1205_v37 = vld [vmem:[#allocation2 + $0xa8] sm:$0xff] }
 0x374   :  { %v1376_v15 = vld [vmem:[#allocation2 + $0x600] sm:$0xff]  ;;  %v4683_v19 = vcombine.high %v1248_v10, %v1252_v12  ;;  %2795 = vmatprep.subr.bf16.mxu1 %v4819_v8  ;;  %v4682_v24 = vcombine.low %v1248_v10, %v1252_v12  ;;  %v1333_v4 = vld [vmem:[#allocation2 + $0x4a8] sm:$0xff]  ;;  %v4772_v8 = vcombine.low %v1337_v57, %v1341_v38  ;;  %v4637_v10 = vcombine.high %v1201_v63, %v1205_v37 }
 0x375   :  { %v1380_v16 = vld [vmem:[#allocation2 + $0x620] sm:$0xff]  ;;  %2796 = vmatpush2.bf16.msra.mxu1 %v4818_v18  ;;  %v4765_v12 = vcombine.high %v1329_v3, %v1333_v4  ;;  %v1321_v17 = vld [vmem:[#allocation2 + $0x448] sm:$0xff] }
 0x376   :  { %v4811_v20 = vcombine.high %v1376_v15, %v1380_v16  ;;  %2754 = vmatprep.subr.bf16.mxu0 %v4683_v19  ;;  %v4810_v26 = vcombine.low %v1376_v15, %v1380_v16  ;;  %v1193_v15 = vld [vmem:[#allocation2 + $0x48] sm:$0xff]  ;;  %v4636_v19 = vcombine.low %v1201_v63, %v1205_v37 }
 0x377   :  { %2755 = vmatpush2.bf16.msra.mxu0 %v4682_v24  ;;  %v1197_v16 = vld [vmem:[#allocation2 + $0x68] sm:$0xff] }
 0x378   :  { %2797 = vmatprep.subr.bf16.mxu1 %v4811_v20  ;;  %2810 = vmatprep.subr.bf16.mxu0 %v4677_v27  ;;  %v1325_v18 = vld [vmem:[#allocation2 + $0x468] sm:$0xff]  ;;  %v4764_v20 = vcombine.low %v1329_v3, %v1333_v4  ;;  %v4629_v9 = vcombine.high %v1193_v15, %v1197_v16  ;;  %v4628_v27 = vcombine.low %v1193_v15, %v1197_v16 }
 0x379   :  { %2798 = vmatpush2.bf16.msra.mxu1 %v4810_v26  ;;  %v4757_v11 = vcombine.high %v1321_v17, %v1325_v18  ;;  %v1185_v21 = vld [vmem:[#allocation2 + $0x8] sm:$0xff] }
 0x37a   :  { %2853 = vmatprep.subr.bf16.mxu1 %v4805_v28  ;;  %2757 = vmatmul.mubr.bf16.vlgmr.msra.gmra.mxu0 %v5753_v29  ;;  %v1189_v22 = vld [vmem:[#allocation2 + $0x28] sm:$0xff]  ;;  %v4756_v28 = vcombine.low %v1321_v17, %v1325_v18 }
 0x37b   :  { %2811 = vmatpush1.bf16.msra.mxu0 %v4676_v33  ;;  %2842 = vmatprep.mubr.bf16.mxu0 %v5745_v53  ;;  %v1313_v24 = vld [vmem:[#allocation2 + $0x408] sm:$0xff]  ;;  %v4621_v39 = vcombine.high %v1185_v21, %v1189_v22 }
 0x37c   :  { %2800 = vmatmul.mubr.bf16.vlgmr.msra.gmra.mxu1 %v5757_v2  ;;  %2812 = vmatprep.subr.bf16.mxu0 %v4669_v35  ;;  %v1317_v26 = vld [vmem:[#allocation2 + $0x428] sm:$0xff]  ;;  %v4620_v35 = vcombine.low %v1185_v21, %v1189_v22 }
 0x37d   :  { %2854 = vmatpush1.bf16.msra.mxu1 %v4804_v34  ;;  %2885 = vmatprep.mubr.bf16.mxu1 %v5747_v54  ;;  %v4749_v1 = vcombine.high %v1313_v24, %v1317_v26  ;;  %v1305_v0 = vld [vmem:[#allocation2 + $0x3c8] sm:$0xff] }
 0x37e   :  { %2855 = vmatprep.subr.bf16.mxu1 %v4797_v36  ;;  %v1309_v30 = vld [vmem:[#allocation2 + $0x3e8] sm:$0xff]  ;;  %v4748_v36 = vcombine.low %v1313_v24, %v1317_v26 }
 0x37f   :  { %2813 = vmatpush1.bf16.msra.mxu0 %v4668_v13  ;;  %v1433_v33 = vld [vmem:[#allocation2 + $0x7c8] sm:$0xff]  ;;  %v4741_v5 = vcombine.high %v1305_v0, %v1309_v30 }
 0x380   :  { %2814 = vmatprep.subr.bf16.mxu0 %v4661_v51  ;;  %v1437_v34 = vld [vmem:[#allocation2 + $0x7e8] sm:$0xff]  ;;  %v4740_v51 = vcombine.low %v1305_v0, %v1309_v30 }
 0x381   :  { %2856 = vmatpush1.bf16.msra.mxu1 %v4796_v47  ;;  %v4869_v6 = vcombine.high %v1433_v33, %v1437_v34  ;;  %v1297_v45 = vld [vmem:[#allocation2 + $0x388] sm:$0xff] }
 0x382   :  { %2857 = vmatprep.subr.bf16.mxu1 %v4789_v14  ;;  %v1301_v49 = vld [vmem:[#allocation2 + $0x3a8] sm:$0xff]  ;;  %v4868_v14 = vcombine.low %v1433_v33, %v1437_v34 }
 0x383   :  { %2815 = vmatpush1.bf16.msra.mxu0 %v4660_v46  ;;  %v1425_v13 = vld [vmem:[#allocation2 + $0x788] sm:$0xff]  ;;  %v4733_v40 = vcombine.high %v1297_v45, %v1301_v49 }
 0x384   :  { %2816 = vmatprep.subr.bf16.mxu0 %v4653_v50  ;;  %v1429_v47 = vld [vmem:[#allocation2 + $0x7a8] sm:$0xff]  ;;  %v4732_v50 = vcombine.low %v1297_v45, %v1301_v49 }
 0x385   :  { %2858 = vmatpush1.bf16.msra.mxu1 %v4788_v48  ;;  %v4861_v41 = vcombine.high %v1425_v13, %v1429_v47  ;;  %v1289_v42 = vld [vmem:[#allocation2 + $0x348] sm:$0xff] }
 0x386   :  { %2859 = vmatprep.subr.bf16.mxu1 %v4781_v52  ;;  %v1293_v43 = vld [vmem:[#allocation2 + $0x368] sm:$0xff]  ;;  %v4860_v52 = vcombine.low %v1425_v13, %v1429_v47  ;;  %v1242_v13 = vld [vmem:[#allocation2 + $0x1d0] sm:$0xff] }
 0x387   :  { %2817 = vmatpush1.bf16.msra.mxu0 %v4652_v59  ;;  %v1417_v46 = vld [vmem:[#allocation2 + $0x748] sm:$0xff]  ;;  %v4725_v55 = vcombine.high %v1289_v42, %v1293_v43  ;;  %v1246_v47 = vld [vmem:[#allocation2 + $0x1f0] sm:$0xff] }
 0x388   :  { %2818 = vmatprep.subr.bf16.mxu0 %v4645_v61  ;;  %v1421_v48 = vld [vmem:[#allocation2 + $0x768] sm:$0xff]  ;;  %v4724_v61 = vcombine.low %v1289_v42, %v1293_v43  ;;  %v4679_v42 = vcombine.high %v1242_v13, %v1246_v47 }
 0x389   :  { %2860 = vmatpush1.bf16.msra.mxu1 %v4780_v60  ;;  %v4853_v56 = vcombine.high %v1417_v46, %v1421_v48  ;;  %v1281_v57 = vld [vmem:[#allocation2 + $0x308] sm:$0xff] }
 0x38a   :  { %2861 = vmatprep.subr.bf16.mxu1 %v4773_v62  ;;  %v1285_v38 = vld [vmem:[#allocation2 + $0x328] sm:$0xff]  ;;  %v4852_v62 = vcombine.low %v1417_v46, %v1421_v48  ;;  %v1234_v46 = vld [vmem:[#allocation2 + $0x190] sm:$0xff] }
 0x38b   :  { %2819 = vmatpush1.bf16.msra.mxu0 %v4644_v7  ;;  %v1409_v59 = vld [vmem:[#allocation2 + $0x708] sm:$0xff]  ;;  %v4717_v63 = vcombine.high %v1281_v57, %v1285_v38  ;;  %v1238_v48 = vld [vmem:[#allocation2 + $0x1b0] sm:$0xff] }
 0x38c   :  { %2820 = vmatprep.subr.bf16.mxu0 %v4637_v10  ;;  %v1413_v60 = vld [vmem:[#allocation2 + $0x728] sm:$0xff]  ;;  %v4716_v10 = vcombine.low %v1281_v57, %v1285_v38  ;;  %v4671_v57 = vcombine.high %v1234_v46, %v1238_v48 }
 0x38d   :  { %2862 = vmatpush1.bf16.msra.mxu1 %v4772_v8  ;;  %v4845_v37 = vcombine.high %v1409_v59, %v1413_v60  ;;  %v1273_v3 = vld [vmem:[#allocation2 + $0x2c8] sm:$0xff] }
 0x38e   :  { %2863 = vmatprep.subr.bf16.mxu1 %v4765_v12  ;;  %v1277_v4 = vld [vmem:[#allocation2 + $0x2e8] sm:$0xff]  ;;  %v4844_v12 = vcombine.low %v1409_v59, %v1413_v60  ;;  %v1226_v59 = vld [vmem:[#allocation2 + $0x150] sm:$0xff] }
 0x38f   :  { %2821 = vmatpush1.bf16.msra.mxu0 %v4636_v19  ;;  %v1401_v7 = vld [vmem:[#allocation2 + $0x6c8] sm:$0xff]  ;;  %v4709_v15 = vcombine.high %v1273_v3, %v1277_v4  ;;  %v1230_v60 = vld [vmem:[#allocation2 + $0x170] sm:$0xff] }
 0x390   :  { %2822 = vmatprep.subr.bf16.mxu0 %v4629_v9  ;;  %v1405_v8 = vld [vmem:[#allocation2 + $0x6e8] sm:$0xff]  ;;  %v4708_v9 = vcombine.low %v1273_v3, %v1277_v4  ;;  %v4663_v3 = vcombine.high %v1226_v59, %v1230_v60 }
 0x391   :  { %2864 = vmatpush1.bf16.msra.mxu1 %v4764_v20  ;;  %v4837_v16 = vcombine.high %v1401_v7, %v1405_v8  ;;  %v1265_v17 = vld [vmem:[#allocation2 + $0x288] sm:$0xff] }
 0x392   :  { %2865 = vmatprep.subr.bf16.mxu1 %v4757_v11  ;;  %v1269_v18 = vld [vmem:[#allocation2 + $0x2a8] sm:$0xff]  ;;  %v4836_v11 = vcombine.low %v1401_v7, %v1405_v8  ;;  %v1218_v7 = vld [vmem:[#allocation2 + $0x110] sm:$0xff] }
 0x393   :  { %2823 = vmatpush1.bf16.msra.mxu0 %v4628_v27  ;;  %v1393_v19 = vld [vmem:[#allocation2 + $0x688] sm:$0xff]  ;;  %v4701_v21 = vcombine.high %v1265_v17, %v1269_v18  ;;  %v1222_v8 = vld [vmem:[#allocation2 + $0x130] sm:$0xff] }
 0x394   :  { %2824 = vmatprep.subr.bf16.mxu0 %v4621_v39  ;;  %v1397_v20 = vld [vmem:[#allocation2 + $0x6a8] sm:$0xff]  ;;  %v4700_v39 = vcombine.low %v1265_v17, %v1269_v18  ;;  %v4655_v17 = vcombine.high %v1218_v7, %v1222_v8 }
 0x395   :  { %2866 = vmatpush1.bf16.msra.mxu1 %v4756_v28  ;;  %v4829_v22 = vcombine.high %v1393_v19, %v1397_v20  ;;  %v1257_v24 = vld [vmem:[#allocation2 + $0x248] sm:$0xff] }
 0x396   :  { %2867 = vmatprep.subr.bf16.mxu1 %v4749_v1  ;;  %v1261_v26 = vld [vmem:[#allocation2 + $0x268] sm:$0xff]  ;;  %v4828_v1 = vcombine.low %v1393_v19, %v1397_v20  ;;  %v1210_v19 = vld [vmem:[#allocation2 + $0xd0] sm:$0xff] }
 0x397   :  { %2825 = vmatpush1.bf16.msra.mxu0 %v4620_v35  ;;  %v1385_v27 = vld [vmem:[#allocation2 + $0x648] sm:$0xff]  ;;  %v4693_v0 = vcombine.high %v1257_v24, %v1261_v26  ;;  %v1214_v20 = vld [vmem:[#allocation2 + $0xf0] sm:$0xff] }
 0x398   :  { %2826 = vmatprep.subr.bf16.mxu0 %v4741_v5  ;;  %v1389_v28 = vld [vmem:[#allocation2 + $0x668] sm:$0xff]  ;;  %v4692_v5 = vcombine.low %v1257_v24, %v1261_v26  ;;  %v4647_v24 = vcombine.high %v1210_v19, %v1214_v20 }
 0x399   :  { %2868 = vmatpush1.bf16.msra.mxu1 %v4748_v36  ;;  %v4821_v30 = vcombine.high %v1385_v27, %v1389_v28  ;;  %v1249_v33 = vld [vmem:[#allocation2 + $0x208] sm:$0xff] }
 0x39a   :  { %2869 = vmatprep.subr.bf16.mxu1 %v4869_v6  ;;  %v1253_v34 = vld [vmem:[#allocation2 + $0x228] sm:$0xff]  ;;  %v4820_v6 = vcombine.low %v1385_v27, %v1389_v28  ;;  %v1202_v27 = vld [vmem:[#allocation2 + $0x90] sm:$0xff] }
 0x39b   :  { %2827 = vmatpush2.bf16.msra.mxu0 %v4740_v51  ;;  %v1377_v35 = vld [vmem:[#allocation2 + $0x608] sm:$0xff]  ;;  %v4685_v45 = vcombine.high %v1249_v33, %v1253_v34  ;;  %v1370_v51 = vld [vmem:[#allocation2 + $0x5d0] sm:$0xff] }
 0x39c   :  { %2828 = vmatprep.subr.bf16.mxu0 %v4733_v40  ;;  %v1381_v36 = vld [vmem:[#allocation2 + $0x628] sm:$0xff]  ;;  %v4684_v40 = vcombine.low %v1249_v33, %v1253_v34  ;;  %v1206_v28 = vld [vmem:[#allocation2 + $0xb0] sm:$0xff] }
 0x39d   :  { %2870 = vmatpush2.bf16.msra.mxu1 %v4868_v14  ;;  %v4813_v49 = vcombine.high %v1377_v35, %v1381_v36  ;;  %v1374_v14 = vld [vmem:[#allocation2 + $0x5f0] sm:$0xff]  ;;  %v4639_v33 = vcombine.high %v1202_v27, %v1206_v28 }
 0x39e   :  { %2871 = vmatprep.subr.bf16.mxu1 %v4861_v41  ;;  %v4812_v41 = vcombine.low %v1377_v35, %v1381_v36  ;;  %v4807_v43 = vcombine.high %v1370_v51, %v1374_v14  ;;  %v1194_v35 = vld [vmem:[#allocation2 + $0x50] sm:$0xff] }
 0x39f   :  { %2829 = vmatpush2.bf16.msra.mxu0 %v4732_v50  ;;  %v1362_v50 = vld [vmem:[#allocation2 + $0x590] sm:$0xff] }
 0x3a0   :  { %2830 = vmatprep.subr.bf16.mxu0 %v4725_v55  ;;  %v4678_v55 = vcombine.low %v1242_v13, %v1246_v47  ;;  %v1198_v36 = vld [vmem:[#allocation2 + $0x70] sm:$0xff] }
 0x3a1   :  { %2872 = vmatpush2.bf16.msra.mxu1 %v4860_v52  ;;  %v1366_v52 = vld [vmem:[#allocation2 + $0x5b0] sm:$0xff]  ;;  %v4631_v13 = vcombine.high %v1194_v35, %v1198_v36 }
 0x3a2   :  { %2873 = vmatprep.subr.bf16.mxu1 %v4853_v56  ;;  %v4806_v56 = vcombine.low %v1370_v51, %v1374_v14  ;;  %v4799_v38 = vcombine.high %v1362_v50, %v1366_v52  ;;  %v1186_v51 = vld [vmem:[#allocation2 + $0x10] sm:$0xff] }
 0x3a3   :  { %2831 = vmatpush2.bf16.msra.mxu0 %v4724_v61  ;;  %v1354_v61 = vld [vmem:[#allocation2 + $0x550] sm:$0xff] }
 0x3a4   :  { %2832 = vmatprep.subr.bf16.mxu0 %v4717_v63  ;;  %v4670_v63 = vcombine.low %v1234_v46, %v1238_v48  ;;  %v1190_v14 = vld [vmem:[#allocation2 + $0x30] sm:$0xff] }
 0x3a5   :  { %2874 = vmatpush2.bf16.msra.mxu1 %v4852_v62  ;;  %v1358_v62 = vld [vmem:[#allocation2 + $0x570] sm:$0xff]  ;;  %v4623_v46 = vcombine.high %v1186_v51, %v1190_v14 }
 0x3a6   :  { %2875 = vmatprep.subr.bf16.mxu1 %v4845_v37  ;;  %v4798_v37 = vcombine.low %v1362_v50, %v1366_v52  ;;  %v4791_v4 = vcombine.high %v1354_v61, %v1358_v62  ;;  %v1306_v50 = vld [vmem:[#allocation2 + $0x3d0] sm:$0xff] }
 0x3a7   :  { %2833 = vmatpush2.bf16.msra.mxu0 %v4716_v10  ;;  %v1346_v10 = vld [vmem:[#allocation2 + $0x510] sm:$0xff] }
 0x3a8   :  { %2834 = vmatprep.subr.bf16.mxu0 %v4709_v15  ;;  %v4662_v15 = vcombine.low %v1226_v59, %v1230_v60  ;;  %v1310_v52 = vld [vmem:[#allocation2 + $0x3f0] sm:$0xff] }
 0x3a9   :  { %2876 = vmatpush2.bf16.msra.mxu1 %v4844_v12  ;;  %v1350_v12 = vld [vmem:[#allocation2 + $0x530] sm:$0xff]  ;;  %v4743_v59 = vcombine.high %v1306_v50, %v1310_v52 }
 0x3aa   :  { %2877 = vmatprep.subr.bf16.mxu1 %v4837_v16  ;;  %v4790_v16 = vcombine.low %v1354_v61, %v1358_v62  ;;  %v4783_v18 = vcombine.high %v1346_v10, %v1350_v12  ;;  %v1298_v61 = vld [vmem:[#allocation2 + $0x390] sm:$0xff] }
 0x3ab   :  { %2835 = vmatpush2.bf16.msra.mxu0 %v4708_v9  ;;  %v1338_v9 = vld [vmem:[#allocation2 + $0x4d0] sm:$0xff] }
 0x3ac   :  { %2836 = vmatprep.subr.bf16.mxu0 %v4701_v21  ;;  %v4654_v21 = vcombine.low %v1218_v7, %v1222_v8  ;;  %v1302_v62 = vld [vmem:[#allocation2 + $0x3b0] sm:$0xff] }
 0x3ad   :  { %2878 = vmatpush2.bf16.msra.mxu1 %v4836_v11  ;;  %v1342_v11 = vld [vmem:[#allocation2 + $0x4f0] sm:$0xff]  ;;  %v4735_v7 = vcombine.high %v1298_v61, %v1302_v62 }
 0x3ae   :  { %2879 = vmatprep.subr.bf16.mxu1 %v4829_v22  ;;  %v4782_v22 = vcombine.low %v1346_v10, %v1350_v12  ;;  %v4775_v26 = vcombine.high %v1338_v9, %v1342_v11  ;;  %v1290_v10 = vld [vmem:[#allocation2 + $0x350] sm:$0xff] }
 0x3af   :  { %2837 = vmatpush2.bf16.msra.mxu0 %v4700_v39  ;;  %v1330_v39 = vld [vmem:[#allocation2 + $0x490] sm:$0xff] }
 0x3b0   :  { %2838 = vmatprep.subr.bf16.mxu0 %v4693_v0  ;;  %v4646_v0 = vcombine.low %v1210_v19, %v1214_v20  ;;  %v1294_v12 = vld [vmem:[#allocation2 + $0x370] sm:$0xff] }
 0x3b1   :  { %2880 = vmatpush2.bf16.msra.mxu1 %v4828_v1  ;;  %v1334_v1 = vld [vmem:[#allocation2 + $0x4b0] sm:$0xff]  ;;  %v4727_v19 = vcombine.high %v1290_v10, %v1294_v12 }
 0x3b2   :  { %2881 = vmatprep.subr.bf16.mxu1 %v4821_v30  ;;  %v4774_v30 = vcombine.low %v1338_v9, %v1342_v11  ;;  %v4767_v34 = vcombine.high %v1330_v39, %v1334_v1  ;;  %v1282_v9 = vld [vmem:[#allocation2 + $0x310] sm:$0xff] }
 0x3b3   :  { %2839 = vmatpush2.bf16.msra.mxu0 %v4692_v5  ;;  %v1322_v5 = vld [vmem:[#allocation2 + $0x450] sm:$0xff] }
 0x3b4   :  { %2840 = vmatprep.subr.bf16.mxu0 %v4685_v45  ;;  %v4638_v45 = vcombine.low %v1202_v27, %v1206_v28  ;;  %v1286_v11 = vld [vmem:[#allocation2 + $0x330] sm:$0xff] }
 0x3b5   :  { %2882 = vmatpush2.bf16.msra.mxu1 %v4820_v6  ;;  %v1326_v6 = vld [vmem:[#allocation2 + $0x470] sm:$0xff]  ;;  %v4719_v27 = vcombine.high %v1282_v9, %v1286_v11 }
 0x3b6   :  { %2883 = vmatprep.subr.bf16.mxu1 %v4813_v49  ;;  %v4766_v49 = vcombine.low %v1330_v39, %v1334_v1  ;;  %v4759_v47 = vcombine.high %v1322_v5, %v1326_v6  ;;  %v1274_v39 = vld [vmem:[#allocation2 + $0x2d0] sm:$0xff] }
 0x3b7   :  { %2841 = vmatpush2.bf16.msra.mxu0 %v4684_v40  ;;  %v1314_v40 = vld [vmem:[#allocation2 + $0x410] sm:$0xff] }
 0x3b8   :  { %2896 = vmatprep.subr.bf16.mxu0 %v4679_v42  ;;  %v4630_v42 = vcombine.low %v1194_v35, %v1198_v36  ;;  %v1278_v1 = vld [vmem:[#allocation2 + $0x2f0] sm:$0xff] }
 0x3b9   :  { %2884 = vmatpush2.bf16.msra.mxu1 %v4812_v41  ;;  %v1318_v41 = vld [vmem:[#allocation2 + $0x430] sm:$0xff]  ;;  %v4711_v35 = vcombine.high %v1274_v39, %v1278_v1 }
 0x3ba   :  { %2939 = vmatprep.subr.bf16.mxu1 %v4807_v43  ;;  %2843 = vmatmul.mubr.bf16.vlgmr.msra.gmra.mxu0 %v5753_v29  ;;  %v4758_v43 = vcombine.low %v1322_v5, %v1326_v6  ;;  %v4751_v48 = vcombine.high %v1314_v40, %v1318_v41  ;;  %v1266_v5 = vld [vmem:[#allocation2 + $0x290] sm:$0xff] }
 0x3bb   :  { %2897 = vmatpush1.bf16.msra.mxu0 %v4678_v55  ;;  %2928 = vmatprep.mubr.bf16.mxu0 %v5745_v53  ;;  %v1434_v55 = vld [vmem:[#allocation2 + $0x7d0] sm:$0xff] }
 0x3bc   :  { %2886 = vmatmul.mubr.bf16.vlgmr.msra.gmra.mxu1 %v5757_v2  ;;  %2898 = vmatprep.subr.bf16.mxu0 %v4671_v57  ;;  %v4622_v57 = vcombine.low %v1186_v51, %v1190_v14  ;;  %v1270_v6 = vld [vmem:[#allocation2 + $0x2b0] sm:$0xff] }
 0x3bd   :  { %2940 = vmatpush1.bf16.msra.mxu1 %v4806_v56  ;;  %2971 = vmatprep.mubr.bf16.mxu1 %v5747_v54  ;;  %v1438_v56 = vld [vmem:[#allocation2 + $0x7f0] sm:$0xff]  ;;  %v4703_v51 = vcombine.high %v1266_v5, %v1270_v6 }
 0x3be   :  { %2941 = vmatprep.subr.bf16.mxu1 %v4799_v38  ;;  %v4750_v38 = vcombine.low %v1314_v40, %v1318_v41  ;;  %v4871_v60 = vcombine.high %v1434_v55, %v1438_v56  ;;  %v1258_v40 = vld [vmem:[#allocation2 + $0x250] sm:$0xff] }
 0x3bf   :  { %2899 = vmatpush1.bf16.msra.mxu0 %v4670_v63  ;;  %v1426_v63 = vld [vmem:[#allocation2 + $0x790] sm:$0xff] }
 0x3c0   :  { %2900 = vmatprep.subr.bf16.mxu0 %v4663_v3  ;;  %v4742_v3 = vcombine.low %v1306_v50, %v1310_v52  ;;  %v1262_v41 = vld [vmem:[#allocation2 + $0x270] sm:$0xff] }
 0x3c1   :  { %2942 = vmatpush1.bf16.msra.mxu1 %v4798_v37  ;;  %v1430_v37 = vld [vmem:[#allocation2 + $0x7b0] sm:$0xff]  ;;  %v4695_v50 = vcombine.high %v1258_v40, %v1262_v41 }
 0x3c2   :  { %2943 = vmatprep.subr.bf16.mxu1 %v4791_v4  ;;  %v4870_v4 = vcombine.low %v1434_v55, %v1438_v56  ;;  %v4863_v8 = vcombine.high %v1426_v63, %v1430_v37  ;;  %v1250_v55 = vld [vmem:[#allocation2 + $0x210] sm:$0xff] }
 0x3c3   :  { %2901 = vmatpush1.bf16.msra.mxu0 %v4662_v15  ;;  %v1418_v15 = vld [vmem:[#allocation2 + $0x750] sm:$0xff] }
 0x3c4   :  { %2902 = vmatprep.subr.bf16.mxu0 %v4655_v17  ;;  %v4734_v17 = vcombine.low %v1298_v61, %v1302_v62  ;;  %v1254_v56 = vld [vmem:[#allocation2 + $0x230] sm:$0xff] }
 0x3c5   :  { %2944 = vmatpush1.bf16.msra.mxu1 %v4790_v16  ;;  %v1422_v16 = vld [vmem:[#allocation2 + $0x770] sm:$0xff]  ;;  %v4687_v61 = vcombine.high %v1250_v55, %v1254_v56 }
 0x3c6   :  { %2945 = vmatprep.subr.bf16.mxu1 %v4783_v18  ;;  %v4862_v18 = vcombine.low %v1426_v63, %v1430_v37  ;;  %v4855_v20 = vcombine.high %v1418_v15, %v1422_v16  ;;  %v1243_v63 = vld [vmem:[#allocation2 + $0x1d8] sm:$0xff] }
 0x3c7   :  { %2903 = vmatpush1.bf16.msra.mxu0 %v4654_v21  ;;  %v1410_v21 = vld [vmem:[#allocation2 + $0x710] sm:$0xff]  ;;  %v1247_v37 = vld [vmem:[#allocation2 + $0x1f8] sm:$0xff] }
 0x3c8   :  { %2904 = vmatprep.subr.bf16.mxu0 %v4647_v24  ;;  %v4726_v24 = vcombine.low %v1290_v10, %v1294_v12  ;;  %v4681_v10 = vcombine.high %v1243_v63, %v1247_v37 }
 0x3c9   :  { %2946 = vmatpush1.bf16.msra.mxu1 %v4782_v22  ;;  %v1414_v22 = vld [vmem:[#allocation2 + $0x730] sm:$0xff] }
 0x3ca   :  { %2947 = vmatprep.subr.bf16.mxu1 %v4775_v26  ;;  %v4854_v26 = vcombine.low %v1418_v15, %v1422_v16  ;;  %v4847_v28 = vcombine.high %v1410_v21, %v1414_v22  ;;  %v1235_v15 = vld [vmem:[#allocation2 + $0x198] sm:$0xff] }
 0x3cb   :  { %2905 = vmatpush1.bf16.msra.mxu0 %v4646_v0  ;;  %v1402_v0 = vld [vmem:[#allocation2 + $0x6d0] sm:$0xff]  ;;  %v1239_v16 = vld [vmem:[#allocation2 + $0x1b8] sm:$0xff] }
 0x3cc   :  { %2906 = vmatprep.subr.bf16.mxu0 %v4639_v33  ;;  %v4718_v33 = vcombine.low %v1282_v9, %v1286_v11  ;;  %v4673_v9 = vcombine.high %v1235_v15, %v1239_v16 }
 0x3cd   :  { %2948 = vmatpush1.bf16.msra.mxu1 %v4774_v30  ;;  %v1406_v30 = vld [vmem:[#allocation2 + $0x6f0] sm:$0xff] }
 0x3ce   :  { %2949 = vmatprep.subr.bf16.mxu1 %v4767_v34  ;;  %v4846_v34 = vcombine.low %v1410_v21, %v1414_v22  ;;  %v4839_v36 = vcombine.high %v1402_v0, %v1406_v30  ;;  %v1227_v21 = vld [vmem:[#allocation2 + $0x158] sm:$0xff] }
 0x3cf   :  { %2907 = vmatpush1.bf16.msra.mxu0 %v4638_v45  ;;  %v1394_v45 = vld [vmem:[#allocation2 + $0x690] sm:$0xff]  ;;  %v1231_v22 = vld [vmem:[#allocation2 + $0x178] sm:$0xff] }
 0x3d0   :  { %2908 = vmatprep.subr.bf16.mxu0 %v4631_v13  ;;  %v4710_v13 = vcombine.low %v1274_v39, %v1278_v1  ;;  %v4665_v39 = vcombine.high %v1227_v21, %v1231_v22 }
 0x3d1   :  { %2950 = vmatpush1.bf16.msra.mxu1 %v4766_v49  ;;  %v1398_v49 = vld [vmem:[#allocation2 + $0x6b0] sm:$0xff] }
 0x3d2   :  { %2951 = vmatprep.subr.bf16.mxu1 %v4759_v47  ;;  %v4838_v47 = vcombine.low %v1402_v0, %v1406_v30  ;;  %v4831_v14 = vcombine.high %v1394_v45, %v1398_v49  ;;  %v1219_v0 = vld [vmem:[#allocation2 + $0x118] sm:$0xff] }
 0x3d3   :  { %2909 = vmatpush1.bf16.msra.mxu0 %v4630_v42  ;;  %v1386_v42 = vld [vmem:[#allocation2 + $0x650] sm:$0xff]  ;;  %v1223_v30 = vld [vmem:[#allocation2 + $0x138] sm:$0xff] }
 0x3d4   :  { %2910 = vmatprep.subr.bf16.mxu0 %v4623_v46  ;;  %v4702_v46 = vcombine.low %v1266_v5, %v1270_v6  ;;  %v4657_v5 = vcombine.high %v1219_v0, %v1223_v30 }
 0x3d5   :  { %2952 = vmatpush1.bf16.msra.mxu1 %v4758_v43  ;;  %v1390_v43 = vld [vmem:[#allocation2 + $0x670] sm:$0xff] }
 0x3d6   :  { %2953 = vmatprep.subr.bf16.mxu1 %v4751_v48  ;;  %v4830_v48 = vcombine.low %v1394_v45, %v1398_v49  ;;  %v4823_v52 = vcombine.high %v1386_v42, %v1390_v43  ;;  %v1211_v45 = vld [vmem:[#allocation2 + $0xd8] sm:$0xff] }
 0x3d7   :  { %2911 = vmatpush1.bf16.msra.mxu0 %v4622_v57  ;;  %v1378_v57 = vld [vmem:[#allocation2 + $0x610] sm:$0xff]  ;;  %v1215_v49 = vld [vmem:[#allocation2 + $0xf8] sm:$0xff] }
 0x3d8   :  { %2912 = vmatprep.subr.bf16.mxu0 %v4743_v59  ;;  %v4694_v59 = vcombine.low %v1258_v40, %v1262_v41  ;;  %v1203_v40 = vld [vmem:[#allocation2 + $0x98] sm:$0xff] }
 0x3d9   :  { %2954 = vmatpush1.bf16.msra.mxu1 %v4750_v38  ;;  %v1382_v38 = vld [vmem:[#allocation2 + $0x630] sm:$0xff]  ;;  %v1207_v41 = vld [vmem:[#allocation2 + $0xb8] sm:$0xff] }
 0x3da   :  { %2955 = vmatprep.subr.bf16.mxu1 %v4871_v60  ;;  %v4822_v60 = vcombine.low %v1386_v42, %v1390_v43  ;;  %v4815_v62 = vcombine.high %v1378_v57, %v1382_v38  ;;  %v1331_v42 = vld [vmem:[#allocation2 + $0x498] sm:$0xff] }
 0x3db   :  { %2913 = vmatpush2.bf16.msra.mxu0 %v4742_v3  ;;  %v1371_v3 = vld [vmem:[#allocation2 + $0x5d8] sm:$0xff] }
 0x3dc   :  { %2914 = vmatprep.subr.bf16.mxu0 %v4735_v7  ;;  %v4686_v7 = vcombine.low %v1250_v55, %v1254_v56  ;;  %v1335_v43 = vld [vmem:[#allocation2 + $0x4b8] sm:$0xff] }
 0x3dd   :  { %2956 = vmatpush2.bf16.msra.mxu1 %v4870_v4  ;;  %v1375_v4 = vld [vmem:[#allocation2 + $0x5f8] sm:$0xff] }
 0x3de   :  { %2957 = vmatprep.subr.bf16.mxu1 %v4863_v8  ;;  %v4814_v8 = vcombine.low %v1378_v57, %v1382_v38  ;;  %v4809_v12 = vcombine.high %v1371_v3, %v1375_v4  ;;  %v1195_v55 = vld [vmem:[#allocation2 + $0x58] sm:$0xff] }
 0x3df   :  { %2915 = vmatpush2.bf16.msra.mxu0 %v4734_v17  ;;  %v1363_v17 = vld [vmem:[#allocation2 + $0x598] sm:$0xff] }
 0x3e0   :  { %2916 = vmatprep.subr.bf16.mxu0 %v4727_v19  ;;  %v4680_v19 = vcombine.low %v1243_v63, %v1247_v37  ;;  %v1199_v56 = vld [vmem:[#allocation2 + $0x78] sm:$0xff] }
 0x3e1   :  { %2958 = vmatpush2.bf16.msra.mxu1 %v4862_v18  ;;  %v1367_v18 = vld [vmem:[#allocation2 + $0x5b8] sm:$0xff] }
 0x3e2   :  { %2959 = vmatprep.subr.bf16.mxu1 %v4855_v20  ;;  %v4808_v20 = vcombine.low %v1371_v3, %v1375_v4  ;;  %v4801_v11 = vcombine.high %v1363_v17, %v1367_v18  ;;  %v1323_v57 = vld [vmem:[#allocation2 + $0x458] sm:$0xff] }
 0x3e3   :  { %2917 = vmatpush2.bf16.msra.mxu0 %v4726_v24  ;;  %v1355_v24 = vld [vmem:[#allocation2 + $0x558] sm:$0xff] }
 0x3e4   :  { %2918 = vmatprep.subr.bf16.mxu0 %v4719_v27  ;;  %v4672_v27 = vcombine.low %v1235_v15, %v1239_v16  ;;  %v1327_v38 = vld [vmem:[#allocation2 + $0x478] sm:$0xff] }
 0x3e5   :  { %2960 = vmatpush2.bf16.msra.mxu1 %v4854_v26  ;;  %v1359_v26 = vld [vmem:[#allocation2 + $0x578] sm:$0xff] }
 0x3e6   :  { %2961 = vmatprep.subr.bf16.mxu1 %v4847_v28  ;;  %v4800_v28 = vcombine.low %v1363_v17, %v1367_v18  ;;  %v4793_v1 = vcombine.high %v1355_v24, %v1359_v26  ;;  %v1187_v63 = vld [vmem:[#allocation2 + $0x18] sm:$0xff] }
 0x3e7   :  { %2919 = vmatpush2.bf16.msra.mxu0 %v4718_v33  ;;  %v1347_v33 = vld [vmem:[#allocation2 + $0x518] sm:$0xff] }
 0x3e8   :  { %2920 = vmatprep.subr.bf16.mxu0 %v4711_v35  ;;  %v4664_v35 = vcombine.low %v1227_v21, %v1231_v22  ;;  %v1191_v37 = vld [vmem:[#allocation2 + $0x38] sm:$0xff] }
 0x3e9   :  { %2962 = vmatpush2.bf16.msra.mxu1 %v4846_v34  ;;  %v1351_v34 = vld [vmem:[#allocation2 + $0x538] sm:$0xff] }
 0x3ea   :  { %2963 = vmatprep.subr.bf16.mxu1 %v4839_v36  ;;  %v4792_v36 = vcombine.low %v1355_v24, %v1359_v26  ;;  %v4785_v6 = vcombine.high %v1347_v33, %v1351_v34  ;;  %v1315_v3 = vld [vmem:[#allocation2 + $0x418] sm:$0xff] }
 0x3eb   :  { %2921 = vmatpush2.bf16.msra.mxu0 %v4710_v13  ;;  %v1339_v13 = vld [vmem:[#allocation2 + $0x4d8] sm:$0xff] }
 0x3ec   :  { %2922 = vmatprep.subr.bf16.mxu0 %v4703_v51  ;;  %v4656_v51 = vcombine.low %v1219_v0, %v1223_v30  ;;  %v1319_v4 = vld [vmem:[#allocation2 + $0x438] sm:$0xff] }
 0x3ed   :  { %2964 = vmatpush2.bf16.msra.mxu1 %v4838_v47  ;;  %v1343_v47 = vld [vmem:[#allocation2 + $0x4f8] sm:$0xff] }
 0x3ee   :  { %2965 = vmatprep.subr.bf16.mxu1 %v4831_v14  ;;  %v4649_v14 = vcombine.high %v1211_v45, %v1215_v49  ;;  %v1307_v15 = vld [vmem:[#allocation2 + $0x3d8] sm:$0xff] }
 0x3ef   :  { %2923 = vmatpush2.bf16.msra.mxu0 %v4702_v46  ;;  %v4648_v46 = vcombine.low %v1211_v45, %v1215_v49  ;;  %v1311_v16 = vld [vmem:[#allocation2 + $0x3f8] sm:$0xff] }
 0x3f0   :  { %2924 = vmatprep.subr.bf16.mxu0 %v4695_v50  ;;  %v4641_v50 = vcombine.high %v1203_v40, %v1207_v41  ;;  %v1435_v17 = vld [vmem:[#allocation2 + $0x7d8] sm:$0xff] }
 0x3f1   :  { %2966 = vmatpush2.bf16.msra.mxu1 %v4830_v48  ;;  %v4776_v48 = vcombine.low %v1339_v13, %v1343_v47  ;;  %v1439_v18 = vld [vmem:[#allocation2 + $0x7f8] sm:$0xff] }
 0x3f2   :  { %2967 = vmatprep.subr.bf16.mxu1 %v4823_v52  ;;  %v4769_v52 = vcombine.high %v1331_v42, %v1335_v43  ;;  %v1299_v21 = vld [vmem:[#allocation2 + $0x398] sm:$0xff] }
 0x3f3   :  { %2925 = vmatpush2.bf16.msra.mxu0 %v4694_v59  ;;  %v4640_v59 = vcombine.low %v1203_v40, %v1207_v41  ;;  %v1303_v22 = vld [vmem:[#allocation2 + $0x3b8] sm:$0xff] }
 0x3f4   :  { %2926 = vmatprep.subr.bf16.mxu0 %v4687_v61  ;;  %v4633_v61 = vcombine.high %v1195_v55, %v1199_v56  ;;  %v1427_v24 = vld [vmem:[#allocation2 + $0x798] sm:$0xff] }
 0x3f5   :  { %2968 = vmatpush2.bf16.msra.mxu1 %v4822_v60  ;;  %v4768_v60 = vcombine.low %v1331_v42, %v1335_v43  ;;  %v1431_v26 = vld [vmem:[#allocation2 + $0x7b8] sm:$0xff] }
 0x3f6   :  { %2969 = vmatprep.subr.bf16.mxu1 %v4815_v62  ;;  %v4761_v62 = vcombine.high %v1323_v57, %v1327_v38  ;;  %v1291_v0 = vld [vmem:[#allocation2 + $0x358] sm:$0xff] }
 0x3f7   :  { %2927 = vmatpush2.bf16.msra.mxu0 %v4686_v7  ;;  %v4632_v7 = vcombine.low %v1195_v55, %v1199_v56  ;;  %v1295_v30 = vld [vmem:[#allocation2 + $0x378] sm:$0xff] }
 0x3f8   :  { %2982 = vmatprep.subr.bf16.mxu0 %v4681_v10  ;;  %v4625_v10 = vcombine.high %v1187_v63, %v1191_v37  ;;  %v1283_v45 = vld [vmem:[#allocation2 + $0x318] sm:$0xff] }
 0x3f9   :  { %2970 = vmatpush2.bf16.msra.mxu1 %v4814_v8  ;;  %v4760_v8 = vcombine.low %v1323_v57, %v1327_v38  ;;  %v1287_v49 = vld [vmem:[#allocation2 + $0x338] sm:$0xff] }
 0x3fa   :  { %3025 = vmatprep.subr.bf16.mxu1 %v4809_v12  ;;  %2929 = vmatmul.mubr.bf16.vlgmr.msra.gmra.mxu0 %v5753_v29  ;;  %v4753_v12 = vcombine.high %v1315_v3, %v1319_v4  ;;  %v1275_v40 = vld [vmem:[#allocation2 + $0x2d8] sm:$0xff] }
 0x3fb   :  { %2983 = vmatpush1.bf16.msra.mxu0 %v4680_v19  ;;  %3014 = vmatprep.mubr.bf16.mxu0 %v5745_v53  ;;  %v4784_v53 = vcombine.low %v1347_v33, %v1351_v34  ;;  %v4624_v19 = vcombine.low %v1187_v63, %v1191_v37  ;;  %v1419_v33 = vld [vmem:[#allocation2 + $0x758] sm:$0xff] }
 0x3fc   :  { %2972 = vmatmul.mubr.bf16.vlgmr.msra.gmra.mxu1 %v5757_v2  ;;  %2984 = vmatprep.subr.bf16.mxu0 %v4673_v9  ;;  %v4745_v9 = vcombine.high %v1307_v15, %v1311_v16  ;;  %v1423_v34 = vld [vmem:[#allocation2 + $0x778] sm:$0xff] }
 0x3fd   :  { %3026 = vmatpush1.bf16.msra.mxu1 %v4808_v20  ;;  %3057 = vmatprep.mubr.bf16.mxu1 %v5747_v54  ;;  %v4777_v54 = vcombine.high %v1339_v13, %v1343_v47  ;;  %v4752_v20 = vcombine.low %v1315_v3, %v1319_v4  ;;  %v1411_v13 = vld [vmem:[#allocation2 + $0x718] sm:$0xff] }
 0x3fe   :  { %3027 = vmatprep.subr.bf16.mxu1 %v4801_v11  ;;  %v4873_v11 = vcombine.high %v1435_v17, %v1439_v18  ;;  %v1415_v47 = vld [vmem:[#allocation2 + $0x738] sm:$0xff] }
 0x3ff   :  { %2985 = vmatpush1.bf16.msra.mxu0 %v4672_v27  ;;  %v4744_v27 = vcombine.low %v1307_v15, %v1311_v16  ;;  %v1279_v41 = vld [vmem:[#allocation2 + $0x2f8] sm:$0xff] }
 0x400   :  { %2986 = vmatprep.subr.bf16.mxu0 %v4665_v39  ;;  %v4737_v39 = vcombine.high %v1299_v21, %v1303_v22  ;;  %v1403_v42 = vld [vmem:[#allocation2 + $0x6d8] sm:$0xff] }
 0x401   :  { %3028 = vmatpush1.bf16.msra.mxu1 %v4800_v28  ;;  %v4872_v28 = vcombine.low %v1435_v17, %v1439_v18  ;;  %v1407_v43 = vld [vmem:[#allocation2 + $0x6f8] sm:$0xff] }
 0x402   :  { %3029 = vmatprep.subr.bf16.mxu1 %v4793_v1  ;;  %v4865_v1 = vcombine.high %v1427_v24, %v1431_v26  ;;  %v1267_v55 = vld [vmem:[#allocation2 + $0x298] sm:$0xff] }
 0x403   :  { %2987 = vmatpush1.bf16.msra.mxu0 %v4664_v35  ;;  %v4736_v35 = vcombine.low %v1299_v21, %v1303_v22  ;;  %v1271_v56 = vld [vmem:[#allocation2 + $0x2b8] sm:$0xff] }
 0x404   :  { %2988 = vmatprep.subr.bf16.mxu0 %v4657_v5  ;;  %v4729_v5 = vcombine.high %v1291_v0, %v1295_v30  ;;  %v1395_v57 = vld [vmem:[#allocation2 + $0x698] sm:$0xff] }
 0x405   :  { %3030 = vmatpush1.bf16.msra.mxu1 %v4792_v36  ;;  %v4864_v36 = vcombine.low %v1427_v24, %v1431_v26  ;;  %v1399_v38 = vld [vmem:[#allocation2 + $0x6b8] sm:$0xff] }
 0x406   :  { %3031 = vmatprep.subr.bf16.mxu1 %v4785_v6  ;;  %v4857_v6 = vcombine.high %v1419_v33, %v1423_v34  ;;  %v1259_v63 = vld [vmem:[#allocation2 + $0x258] sm:$0xff] }
 0x407   :  { %2989 = vmatpush1.bf16.msra.mxu0 %v4656_v51  ;;  %v4728_v51 = vcombine.low %v1291_v0, %v1295_v30  ;;  %v1263_v37 = vld [vmem:[#allocation2 + $0x278] sm:$0xff] }
 0x408   :  { %2990 = vmatprep.subr.bf16.mxu0 %v4649_v14  ;;  %v4721_v14 = vcombine.high %v1283_v45, %v1287_v49  ;;  %v1387_v3 = vld [vmem:[#allocation2 + $0x658] sm:$0xff] }
 0x409   :  { %3032 = vmatpush1.bf16.msra.mxu1 %v4784_v53  ;;  %v4856_v53 = vcombine.low %v1419_v33, %v1423_v34  ;;  %v1391_v4 = vld [vmem:[#allocation2 + $0x678] sm:$0xff] }
 0x40a   :  { %3033 = vmatprep.subr.bf16.mxu1 %v4777_v54  ;;  %v4849_v54 = vcombine.high %v1411_v13, %v1415_v47  ;;  %v1251_v15 = vld [vmem:[#allocation2 + $0x218] sm:$0xff] }
 0x40b   :  { %2991 = vmatpush1.bf16.msra.mxu0 %v4648_v46  ;;  %v4720_v46 = vcombine.low %v1283_v45, %v1287_v49  ;;  %v1255_v16 = vld [vmem:[#allocation2 + $0x238] sm:$0xff] }
 0x40c   :  { %2992 = vmatprep.subr.bf16.mxu0 %v4641_v50  ;;  %v4713_v50 = vcombine.high %v1275_v40, %v1279_v41  ;;  %v1379_v17 = vld [vmem:[#allocation2 + $0x618] sm:$0xff]  ;;  %v4688_v21 = vcombine.low %v1251_v15, %v1255_v16 }
 0x40d   :  { %3034 = vmatpush1.bf16.msra.mxu1 %v4776_v48  ;;  %v4848_v48 = vcombine.low %v1411_v13, %v1415_v47  ;;  %v1383_v18 = vld [vmem:[#allocation2 + $0x638] sm:$0xff] }
 0x40e   :  { %3035 = vmatprep.subr.bf16.mxu1 %v4769_v52  ;;  %v4841_v52 = vcombine.high %v1403_v42, %v1407_v43  ;;  %v4816_v22 = vcombine.low %v1379_v17, %v1383_v18 }
 0x40f   :  { %2993 = vmatpush1.bf16.msra.mxu0 %v4640_v59  ;;  %v4712_v59 = vcombine.low %v1275_v40, %v1279_v41 }
 0x410   :  { %2994 = vmatprep.subr.bf16.mxu0 %v4633_v61  ;;  %v4705_v61 = vcombine.high %v1267_v55, %v1271_v56 }
 0x411   :  { %3036 = vmatpush1.bf16.msra.mxu1 %v4768_v60  ;;  %v4840_v60 = vcombine.low %v1403_v42, %v1407_v43 }
 0x412   :  { %3037 = vmatprep.subr.bf16.mxu1 %v4761_v62  ;;  %v4833_v62 = vcombine.high %v1395_v57, %v1399_v38 }
 0x413   :  { %2995 = vmatpush1.bf16.msra.mxu0 %v4632_v7  ;;  %v4704_v7 = vcombine.low %v1267_v55, %v1271_v56 }
 0x414   :  { %2996 = vmatprep.subr.bf16.mxu0 %v4625_v10  ;;  %v4697_v10 = vcombine.high %v1259_v63, %v1263_v37 }
 0x415   :  { %3038 = vmatpush1.bf16.msra.mxu1 %v4760_v8  ;;  %v4832_v8 = vcombine.low %v1395_v57, %v1399_v38 }
 0x416   :  { %3039 = vmatprep.subr.bf16.mxu1 %v4753_v12  ;;  %v4825_v12 = vcombine.high %v1387_v3, %v1391_v4 }
 0x417   :  { %2997 = vmatpush1.bf16.msra.mxu0 %v4624_v19  ;;  %v4696_v19 = vcombine.low %v1259_v63, %v1263_v37 }
 0x418   :  { %2998 = vmatprep.subr.bf16.mxu0 %v4745_v9  ;;  %v4689_v9 = vcombine.high %v1251_v15, %v1255_v16 }
 0x419   :  { %3040 = vmatpush1.bf16.msra.mxu1 %v4752_v20  ;;  %v4824_v20 = vcombine.low %v1387_v3, %v1391_v4 }
 0x41a   :  { %3041 = vmatprep.subr.bf16.mxu1 %v4873_v11  ;;  %v4817_v11 = vcombine.high %v1379_v17, %v1383_v18 }
 0x41b   :  { %2999 = vmatpush2.bf16.msra.mxu0 %v4744_v27 }
 0x41c   :  { %3000 = vmatprep.subr.bf16.mxu0 %v4737_v39 }
 0x41d   :  { %3042 = vmatpush2.bf16.msra.mxu1 %v4872_v28 }
 0x41e   :  { %3043 = vmatprep.subr.bf16.mxu1 %v4865_v1 }
 0x41f   :  { %3001 = vmatpush2.bf16.msra.mxu0 %v4736_v35 }
 0x420   :  { %3002 = vmatprep.subr.bf16.mxu0 %v4729_v5 }
 0x421   :  { %3044 = vmatpush2.bf16.msra.mxu1 %v4864_v36 }
 0x422   :  { %3045 = vmatprep.subr.bf16.mxu1 %v4857_v6 }
 0x423   :  { %3003 = vmatpush2.bf16.msra.mxu0 %v4728_v51 }
 0x424   :  { %3004 = vmatprep.subr.bf16.mxu0 %v4721_v14 }
 0x425   :  { %3046 = vmatpush2.bf16.msra.mxu1 %v4856_v53 }
 0x426   :  { %3047 = vmatprep.subr.bf16.mxu1 %v4849_v54 }
 0x427   :  { %3005 = vmatpush2.bf16.msra.mxu0 %v4720_v46 }
 0x428   :  { %3006 = vmatprep.subr.bf16.mxu0 %v4713_v50 }
 0x429   :  { %3048 = vmatpush2.bf16.msra.mxu1 %v4848_v48 }
 0x42a   :  { %3049 = vmatprep.subr.bf16.mxu1 %v4841_v52 }
 0x42b   :  { %3007 = vmatpush2.bf16.msra.mxu0 %v4712_v59 }
 0x42c   :  { %3008 = vmatprep.subr.bf16.mxu0 %v4705_v61 }
 0x42d   :  { %3050 = vmatpush2.bf16.msra.mxu1 %v4840_v60 }
 0x42e   :  { %3051 = vmatprep.subr.bf16.mxu1 %v4833_v62 }
 0x42f   :  { %3009 = vmatpush2.bf16.msra.mxu0 %v4704_v7 }
 0x430   :  { %3010 = vmatprep.subr.bf16.mxu0 %v4697_v10 }
 0x431   :  { %3052 = vmatpush2.bf16.msra.mxu1 %v4832_v8 }
 0x432   :  { %3053 = vmatprep.subr.bf16.mxu1 %v4825_v12 }
 0x433   :  { %3011 = vmatpush2.bf16.msra.mxu0 %v4696_v19 }
 0x434   :  { %3012 = vmatprep.subr.bf16.mxu0 %v4689_v9 }
 0x435   :  { %3054 = vmatpush2.bf16.msra.mxu1 %v4824_v20 }
 0x436   :  { %3055 = vmatprep.subr.bf16.mxu1 %v4817_v11 }
 0x437   :  { %3013 = vmatpush2.bf16.msra.mxu0 %v4688_v21 }
 0x439   :  { %3056 = vmatpush2.bf16.msra.mxu1 %v4816_v22 }
 0x43a   :  { %3015 = vmatmul.mubr.bf16.vlgmr.msra.gmra.mxu0 %v5753_v29  ;;  %v2758_v24 = vpop.f32.mrf.mxu0 }
 0x43c   :  { %3058 = vmatmul.mubr.bf16.vlgmr.msra.gmra.mxu1 %v5757_v2  ;;  %v2801_v26 = vpop.f32.mrf.mxu1  ;;  %v2760_v27 = vpop.f32.mrf.mxu0 }
 0x43d   :  { %v5781_v40 = vadd.f32 %v2801_v26, %v2758_v24 }
 0x43e   :  { %v2803_v28 = vpop.f32.mrf.mxu1  ;;  %v2762_v39 = vpop.f32.mrf.mxu0 }
 0x43f   :  { %v5775_v47 = vadd.f32 %v2803_v28, %v2760_v27  ;;  %v3140_v52 = vmul.f32 %v5781_v40, %v5781_v40 }
 0x440   :  { %v2805_v1 = vpop.f32.mrf.mxu1  ;;  %v2764_v0 = vpop.f32.mrf.mxu0 }
 0x441   :  { %v5777_v51 = vadd.f32 %v2805_v1, %v2762_v39  ;;  %v3141_v42 = vmul.f32 %v5775_v47, %v5775_v47 }
 0x442   :  { %v2807_v30 = vpop.f32.mrf.mxu1 }
 0x443   :  { %v5773_v13 = vadd.f32 %v2807_v30, %v2764_v0  ;;  %v3148_v43 = vmul.f32 %v5777_v51, %v5777_v51  ;;  %v3076_v38 = vadd.f32 %v5777_v51, %v5781_v40 }
 0x445   :  { %v3083_v53 = vadd.f32 %v5773_v13, %v5775_v47  ;;  %v3149_v41 = vmul.f32 %v5773_v13, %v5773_v13  ;;  %v3156_v59 = vadd.f32 %v3148_v43, %v3140_v52  ;;  %v3077_v12 = vrot.slane %v3076_v38, 4 }
 0x447   :  { %v3084_v46 = vrot.slane %v3083_v53, 4  ;;  %v3163_v55 = vadd.f32 %v3149_v41, %v3141_v42  ;;  %v3157_v15 = vrot.slane %v3156_v59, 4  ;;  %v3078_v39 = vadd.f32 %v3077_v12, %v3076_v38 }
 0x449   :  { %v3085_v60 = vadd.f32 %v3084_v46, %v3083_v53  ;;  %v3164_v3 = vrot.slane %v3163_v55, 4  ;;  %v3158_v1 = vadd.f32 %v3157_v15, %v3156_v59  ;;  %v3079_v53 = vrot.slane %v3078_v39, 2 }
 0x44b   :  { %v3086_v16 = vrot.slane %v3085_v60, 2  ;;  %v3165_v9 = vadd.f32 %v3164_v3, %v3163_v55  ;;  %v3159_v42 = vrot.slane %v3158_v1, 2  ;;  %v3080_v59 = vadd.f32 %v3079_v53, %v3078_v39 }
 0x44d   :  { %v3160_v3 = vadd.f32 %v3159_v42, %v3158_v1 }
 0x47a   :  { %v2844_v33 = vpop.f32.mrf.mxu0 }
 0x47c   :  { %v2887_v34 = vpop.f32.mrf.mxu1  ;;  %v2846_v35 = vpop.f32.mrf.mxu0 }
 0x47d   :  { %v5797_v61 = vadd.f32 %v2887_v34, %v2844_v33 }
 0x47e   :  { %v2889_v36 = vpop.f32.mrf.mxu1  ;;  %v2848_v5 = vpop.f32.mrf.mxu0 }
 0x47f   :  { %v5799_v62 = vadd.f32 %v2889_v36, %v2846_v35  ;;  %v3142_v11 = vmul.f32 %v5797_v61, %v5797_v61  ;;  %v3087_v35 = vadd.f32 %v3086_v16, %v3085_v60  ;;  %v3166_v36 = vrot.slane %v3165_v9, 2 }
 0x480   :  { %v2891_v6 = vpop.f32.mrf.mxu1  ;;  %v2850_v45 = vpop.f32.mrf.mxu0 }
 0x481   :  { %v5791_v56 = vadd.f32 %v2891_v6, %v2848_v5  ;;  %v3143_v17 = vmul.f32 %v5799_v62, %v5799_v62  ;;  %v3088_v43 = vrot.slane %v3087_v35, 1  ;;  %v3167_v46 = vadd.f32 %v3166_v36, %v3165_v9 }
 0x482   :  { %v2893_v49 = vpop.f32.mrf.mxu1 }
 0x483   :  { %v5793_v57 = vadd.f32 %v2893_v49, %v2850_v45  ;;  %v3090_v4 = vadd.f32 %v5791_v56, %v5797_v61  ;;  %v3150_v18 = vmul.f32 %v5791_v56, %v5791_v56 }
 0x485   :  { %v3097_v7 = vadd.f32 %v5793_v57, %v5799_v62  ;;  %v3151_v8 = vmul.f32 %v5793_v57, %v5793_v57  ;;  %v3091_v21 = vrot.slane %v3090_v4, 4  ;;  %v3170_v0 = vadd.f32 %v3150_v18, %v3142_v11 }
 0x486   :  { %v3081_v18 = vrot.slane %v3080_v59, 1 }
 0x487   :  { %v3098_v22 = vrot.slane %v3097_v7, 4  ;;  %v3177_v24 = vadd.f32 %v3151_v8, %v3143_v17  ;;  %v3092_v5 = vadd.f32 %v3091_v21, %v3090_v4  ;;  %v3089_v4 = vadd.f32 %v3088_v43, %v3087_v35 }
 0x489   :  { %v3099_v6 = vadd.f32 %v3098_v22, %v3097_v7  ;;  %v3178_v45 = vrot.slane %v3177_v24, 4  ;;  %v3168_v7 = vrot.slane %v3167_v46, 1  ;;  %v3161_v22 = vrot.slane %v3160_v3, 1 }
 0x48b   :  { %v3179_v52 = vadd.f32 %v3178_v45, %v3177_v24  ;;  %v5833_v24 = vmul.f32 0.0625, %v3089_v4  ;;  %v3162_v45 = vadd.f32 %v3161_v22, %v3160_v3 }
 0x48d   :  { %v3180_v15 = vrot.slane %v3179_v52, 2 }
 0x4ba   :  { %v2930_v29 = vpop.f32.mrf.mxu0 }
 0x4bc   :  { %v2973_v2 = vpop.f32.mrf.mxu1  ;;  %v2932_v14 = vpop.f32.mrf.mxu0 }
 0x4bd   :  { %v5819_v26 = vadd.f32 %v2973_v2, %v2930_v29 }
 0x4be   :  { %v2975_v54 = vpop.f32.mrf.mxu1  ;;  %v2934_v48 = vpop.f32.mrf.mxu0 }
 0x4bf   :  { %v5813_v19 = vadd.f32 %v2975_v54, %v2932_v14  ;;  %v3144_v49 = vmul.f32 %v5819_v26, %v5819_v26  ;;  %v3171_v14 = vrot.slane %v3170_v0, 4 }
 0x4c0   :  { %v2977_v50 = vpop.f32.mrf.mxu1  ;;  %v2936_v63 = vpop.f32.mrf.mxu0 }
 0x4c1   :  { %v5815_v20 = vadd.f32 %v2977_v50, %v2934_v48  ;;  %v3145_v30 = vmul.f32 %v5813_v19, %v5813_v19  ;;  %v3093_v48 = vrot.slane %v3092_v5, 2  ;;  %v3100_v50 = vrot.slane %v3099_v6, 2 }
 0x4c2   :  { %v2979_v37 = vpop.f32.mrf.mxu1  ;;  %v3172_v60 = vadd.f32 %v3171_v14, %v3170_v0  ;;  %v3181_v0 = vadd.f32 %v3180_v15, %v3179_v52 }
 0x4c3   :  { %v5807_v10 = vadd.f32 %v2979_v37, %v2936_v63  ;;  %v3104_v33 = vadd.f32 %v5815_v20, %v5819_v26  ;;  %v3152_v34 = vmul.f32 %v5815_v20, %v5815_v20  ;;  %v3094_v8 = vadd.f32 %v3093_v48, %v3092_v5 }
 0x4c4   :  { %v3101_v12 = vadd.f32 %v3100_v50, %v3099_v6  ;;  %v3173_v11 = vrot.slane %v3172_v60, 2 }
 0x4c5   :  { %v3111_v27 = vadd.f32 %v5807_v10, %v5813_v19  ;;  %v3153_v28 = vmul.f32 %v5807_v10, %v5807_v10  ;;  %v3105_v54 = vrot.slane %v3104_v33, 4  ;;  %v3184_v41 = vadd.f32 %v3152_v34, %v3144_v49 }
 0x4c6   :  { %v3102_v39 = vrot.slane %v3101_v12, 1  ;;  %v3174_v35 = vadd.f32 %v3173_v11, %v3172_v60 }
 0x4c7   :  { %v3112_v29 = vrot.slane %v3111_v27, 4  ;;  %v3191_v2 = vadd.f32 %v3153_v28, %v3145_v30  ;;  %v3106_v63 = vadd.f32 %v3105_v54, %v3104_v33  ;;  %v3185_v37 = vrot.slane %v3184_v41, 4 }
 0x4c8   :  { %v3095_v28 = vrot.slane %v3094_v8, 1  ;;  %v3082_v33 = vadd.f32 %v3081_v18, %v3080_v59  ;;  %v3103_v14 = vadd.f32 %v3102_v39, %v3101_v12  ;;  %v3182_v54 = vrot.slane %v3181_v0, 1 }
 0x4c9   :  { %v3113_v55 = vadd.f32 %v3112_v29, %v3111_v27  ;;  %v3192_v38 = vrot.slane %v3191_v2, 4  ;;  %v3107_v9 = vrot.slane %v3106_v63, 2  ;;  %v3186_v21 = vadd.f32 %v3185_v37, %v3184_v41 }
 0x4ca   :  { %v3169_v27 = vadd.f32 %v3168_v7, %v3167_v46  ;;  %v3221_v29 = vmul.f32 %v5833_v24, %v5833_v24  ;;  %v5839_v46 = vmul.f32 0.0625, %v3082_v33  ;;  %v3175_v52 = vrot.slane %v3174_v35, 1 }
 0x4cb   :  { %v3114_v16 = vrot.slane %v3113_v55, 2  ;;  %v3193_v17 = vadd.f32 %v3192_v38, %v3191_v2  ;;  %v3108_v36 = vadd.f32 %v3107_v9, %v3106_v63  ;;  %v3187_v5 = vrot.slane %v3186_v21, 2 }
 0x4cc   :  { %v5835_v49 = vmul.f32 0.0625, %v3169_v27  ;;  %v3096_v2 = vadd.f32 %v3095_v28, %v3094_v8  ;;  %v5845_v63 = vmul.f32 0.0625, %v3162_v45  ;;  %v5852_v8 = vmul.f32 0.0625, %v3103_v14 }
 0x4cd   :  { %v3115_v30 = vadd.f32 %v3114_v16, %v3113_v55  ;;  %v3194_v1 = vrot.slane %v3193_v17, 2  ;;  %v3109_v55 = vrot.slane %v3108_v36, 1  ;;  %v3188_v38 = vadd.f32 %v3187_v5, %v3186_v21 }
 0x4ce   :  { %v3229_v37 = vsub.f32 %v5835_v49, %v3221_v29  ;;  %v5848_v3 = vmul.f32 0.0625, %v3096_v2  ;;  %v3183_v12 = vadd.f32 %v3182_v54, %v3181_v0  ;;  %v3176_v22 = vadd.f32 %v3175_v52, %v3174_v35 }
 0x4cf   :  { %v3116_v41 = vrot.slane %v3115_v30, 1  ;;  %v3195_v42 = vadd.f32 %v3194_v1, %v3193_v17  ;;  %v3110_v27 = vadd.f32 %v3109_v55, %v3108_v36  ;;  %v3189_v28 = vrot.slane %v3188_v38, 1 }
 0x4d0   :  { %v3223_v5 = vmul.f32 %v5852_v8, %v5852_v8  ;;  %v3214_v2 = vmul.f32 0.0625, %v3176_v22  ;;  %v3220_v55 = vmul.f32 %v5839_v46, %v5839_v46 }
 0x4d1   :  { %v3117_v15 = vadd.f32 %v3116_v41, %v3115_v30  ;;  %v3196_v16 = vrot.slane %v3195_v42, 1  ;;  %v5874_v14 = vmul.f32 0.0625, %v3110_v27  ;;  %v3190_v54 = vadd.f32 %v3189_v28, %v3188_v38 }
 0x4d3   :  { %v3197_v35 = vadd.f32 %v3196_v16, %v3195_v42  ;;  %v3224_v38 = vmul.f32 %v5874_v14, %v5874_v14 }
 0x4d5   :  { %v3217_v42 = vmul.f32 0.0625, %v3197_v35 }
 0x4fa   :  { %v3016_v34 = vpop.f32.mrf.mxu0 }
 0x4fc   :  { %v3059_v6 = vpop.f32.mrf.mxu1  ;;  %v3018_v53 = vpop.f32.mrf.mxu0 }
 0x4fd   :  { %v5841_v48 = vadd.f32 %v3059_v6, %v3016_v34  ;;  %v3215_v34 = vmul.f32 0.0625, %v3183_v12  ;;  %v5870_v6 = vmul.f32 0.0625, %v3117_v15 }
 0x4fe   :  { %v3061_v43 = vpop.f32.mrf.mxu1  ;;  %v3020_v50 = vpop.f32.mrf.mxu0 }
 0x4ff   :  { %v5843_v59 = vadd.f32 %v3061_v43, %v3018_v53  ;;  %v3146_v18 = vmul.f32 %v5841_v48, %v5841_v48  ;;  %v3222_v53 = vmul.f32 %v5848_v3, %v5848_v3 }
 0x500   :  { %v3063_v60 = vpop.f32.mrf.mxu1  ;;  %v3022_v7 = vpop.f32.mrf.mxu0 }
 0x501   :  { %v5850_v4 = vadd.f32 %v3063_v60, %v3020_v50  ;;  %v3147_v39 = vmul.f32 %v5843_v59, %v5843_v59  ;;  %v3231_v60 = vsub.f32 %v3215_v34, %v3223_v5 }
 0x502   :  { %v3065_v17 = vpop.f32.mrf.mxu1 }
 0x503   :  { %v3118_v11 = vadd.f32 %v5850_v4, %v5841_v48  ;;  %v3154_v9 = vmul.f32 %v5850_v4, %v5850_v4  ;;  %v5860_v21 = vadd.f32 %v3065_v17, %v3022_v7  ;;  %v3225_v7 = vmul.f32 %v5870_v6, %v5870_v6 }
 0x505   :  { %v3119_v0 = vrot.slane %v3118_v11, 4  ;;  %v3198_v30 = vadd.f32 %v3154_v9, %v3146_v18  ;;  %v3125_v1 = vadd.f32 %v5860_v21, %v5843_v59  ;;  %v3155_v33 = vmul.f32 %v5860_v21, %v5860_v21 }
 0x506   :  { %v3237_v18 = vadd.f32 0.8, %v3229_v37  ;;  %v3216_v9 = vmul.f32 0.0625, %v3190_v54 }
 0x507   :  { %v3120_v36 = vadd.f32 %v3119_v0, %v3118_v11  ;;  %v3199_v45 = vrot.slane %v3198_v30, 4  ;;  %v3126_v49 = vrot.slane %v3125_v1, 4  ;;  %v3205_v29 = vadd.f32 %v3155_v33, %v3147_v39 }
 0x508   :  { %v3230_v11 = vsub.f32 %v3214_v2, %v3222_v53  ;;  %v3228_v0 = vsub.f32 %v5845_v63, %v3220_v55  ;;  %5174 = vrsqrt.f32 %v3237_v18  ;;  %v3232_v37 = vsub.f32 %v3216_v9, %v3224_v38 }
 0x509   :  { %v3121_v41 = vrot.slane %v3120_v36, 2  ;;  %v3200_v43 = vadd.f32 %v3199_v45, %v3198_v30  ;;  %v3127_v50 = vadd.f32 %v3126_v49, %v3125_v1  ;;  %v3206_v52 = vrot.slane %v3205_v29, 4 }
 0x50a   :  { %v3239_v30 = vadd.f32 0.8, %v3231_v60  ;;  %v3233_v1 = vsub.f32 %v3217_v42, %v3225_v7  ;;  %v3236_v53 = vadd.f32 0.8, %v3228_v0 }
 0x50b   :  { %v3122_v12 = vadd.f32 %v3121_v41, %v3120_v36  ;;  %v3201_v15 = vrot.slane %v3200_v43, 2  ;;  %v3128_v16 = vrot.slane %v3127_v50, 2  ;;  %v3207_v17 = vadd.f32 %v3206_v52, %v3205_v29 }
 0x50c   :  { %v3238_v36 = vadd.f32 0.8, %v3230_v11  ;;  %5176 = vrsqrt.f32 %v3239_v30  ;;  %v3241_v54 = vadd.f32 0.8, %v3233_v1  ;;  %v3240_v52 = vadd.f32 0.8, %v3232_v37 }
 0x50d   :  { %v3123_v22 = vrot.slane %v3122_v12, 1  ;;  %v3202_v27 = vadd.f32 %v3201_v15, %v3200_v43  ;;  %v3129_v28 = vadd.f32 %v3128_v16, %v3127_v50  ;;  %v3208_v39 = vrot.slane %v3207_v17, 2  ;;  %v3070_v37 = vld [vmem:[#allocation12 + $0x5] ss:$8 sm:$0xf0] }
 0x50e   :  { %5178 = vrsqrt.f32 %v3238_v36  ;;  %v3069_v36 = vld [vmem:[#allocation12 + $0x5] ss:$8 sm:$0xf] }
 0x50f   :  { %v3124_v33 = vadd.f32 %v3123_v22, %v3122_v12  ;;  %v3203_v34 = vrot.slane %v3202_v27, 1  ;;  %v3130_v5 = vrot.slane %v3129_v28, 1  ;;  %v3209_v35 = vadd.f32 %v3208_v39, %v3207_v17 }
 0x510   :  { %5180 = vrsqrt.f32 %v3236_v53 }
 0x511   :  { %v5883_v45 = vmul.f32 0.0625, %v3124_v33  ;;  %v3204_v49 = vadd.f32 %v3203_v34, %v3202_v27  ;;  %v3131_v29 = vadd.f32 %v3130_v5, %v3129_v28  ;;  %v3210_v2 = vrot.slane %v3209_v35, 1 }
 0x512   :  { %5182 = vrsqrt.f32 %v3241_v54 }
 0x513   :  { %v3218_v41 = vmul.f32 0.0625, %v3204_v49  ;;  %v3226_v63 = vmul.f32 %v5883_v45, %v5883_v45  ;;  %v3139_v43 = vmul.f32 0.0625, %v3131_v29  ;;  %v3211_v50 = vadd.f32 %v3210_v2, %v3209_v35 }
 0x514   :  { %5184 = vrsqrt.f32 %v3240_v52  ;;  %v3071_v2 = vor.u32 %v3070_v37, %v3069_v36  ;;  %v3342_v52 = vsub.s32 7, %v5632_v23 }
 0x515   :  { %v3234_v55 = vsub.f32 %v3218_v41, %v3226_v63  ;;  %v3219_v60 = vmul.f32 0.0625, %v3211_v50  ;;  %v3227_v42 = vmul.f32 %v3139_v43, %v3139_v43  ;;  %v5175_v16 = vpop.eup %5174  ;;  %v3330_v41 = vsub.s32 4, %v5632_v23 }
 0x516   :  { %v3334_v63 = vsub.s32 5, %v5632_v23  ;;  %v3338_v50 = vsub.s32 6, %v5632_v23 }
 0x517   :  { %v3242_v7 = vadd.f32 0.8, %v3234_v55  ;;  %v3235_v12 = vsub.f32 %v3219_v60, %v3227_v42 }
 0x519   :  { %v3243_v15 = vadd.f32 0.8, %v3235_v12  ;;  %5186 = vrsqrt.f32 %v3242_v7  ;;  %v5177_v17 = vpop.eup %5176 }
 0x51b   :  { %5188 = vrsqrt.f32 %v3243_v15  ;;  %v5179_v18 = vpop.eup %5178 }
 0x51c   :  { %v3261_v9 = vcombine.low %v5179_v18, %v5177_v17 }
 0x51d   :  { %v5181_v11 = vpop.eup %5180 }
 0x51e   :  { %v3260_v22 = vcombine.low %v5181_v11, %v5175_v16  ;;  %v3277_v39 = vrot.slane %v3261_v9, %v5635_v25 }
 0x51f   :  { %v5183_v38 = vpop.eup %5182 }
 0x520   :  { %v3270_v1 = vrot.slane %v3260_v22, %v5635_v25 }
 0x521   :  { %v5185_v27 = vpop.eup %5184 }
 0x522   :  { %v3262_v0 = vcombine.low %v5185_v27, %v5183_v38  ;;  %v3292_v34 = vcombine.low %v3270_v1, %v3277_v39 }
 0x524   :  { %v3284_v5 = vrot.slane %v3262_v0, %v5635_v25  ;;  %v3300_v29 = vrot.slane %v3292_v34, %v5635_v25 }
 0x526   :  { %v5187_v28 = vpop.eup %5186 }
 0x528   :  { %v5189_v30 = vpop.eup %5188 }
 0x529   :  { %v3263_v33 = vcombine.low %v5187_v28, %v5189_v30 }
 0x52b   :  { %v3291_v35 = vrot.slane %v3263_v33, %v5635_v25 }
 0x52d   :  { %v3293_v49 = vcombine.low %v3284_v5, %v3291_v35  ;;  %v3074_v5 = vld [vmem:[#allocation12 + $0x6] ss:$8 sm:$0xf0] }
 0x52f   :  { %v3307_v53 = vrot.slane %v3293_v49, %v5635_v25 }
 0x531   :  { %v3308_v54 = vcombine.low %v3300_v29, %v3307_v53 }
 0x533   :  { %v3310_v55 = vmul.f32 %v3308_v54, %v3071_v2 }
 0x535   :  { %v3315_v60 = vrot.slane %v3310_v55, %v5640_v31  ;;  %v3319_v42 = vrot.slane %v3310_v55, %v5643_v32  ;;  %v3323_v7 = vrot.slane %v3310_v55, %v5705_v58  ;;  %v3327_v12 = vrot.slane %v3310_v55, %v5708_v44 }
 0x536   :  { %v3331_v15 = vrot.slane %v3310_v55, %v3330_v41  ;;  %v3335_v16 = vrot.slane %v3310_v55, %v3334_v63  ;;  %v3339_v17 = vrot.slane %v3310_v55, %v3338_v50  ;;  %v3343_v18 = vrot.slane %v3310_v55, %v3342_v52 }
 0x537   :  { %v3352_v11 = vmul.f32 %v3315_v60, %v5839_v46  ;;  %v3353_v9 = vmul.f32 %v3319_v42, %v5833_v24  ;;  %v3354_v38 = vmul.f32 %v3323_v7, %v5848_v3  ;;  %v3355_v23 = vmul.f32 %v3327_v12, %v5852_v8  ;;  %v3073_v8 = vld [vmem:[#allocation12 + $0x6] ss:$8 sm:$0xf] }
 0x538   :  { %v3356_v22 = vmul.f32 %v3331_v15, %v5874_v14  ;;  %v3357_v27 = vmul.f32 %v3335_v16, %v5870_v6  ;;  %v3358_v28 = vmul.f32 %v3339_v17, %v5883_v45  ;;  %v3359_v39 = vmul.f32 %v3343_v18, %v3139_v43 }
 0x539   :  { %v3368_v0 = vcombine.low %v3352_v11, %v3353_v9  ;;  %v3369_v30 = vcombine.low %v3354_v38, %v3355_v23  ;;  %v3075_v45 = vor.u32 %v3074_v5, %v3073_v8  ;;  %v3419_v36 = vmul.f32 %v3315_v60, %v5781_v40 }
 0x53a   :  { %v3370_v1 = vcombine.low %v3356_v22, %v3357_v27  ;;  %v3371_v33 = vcombine.low %v3358_v28, %v3359_v39  ;;  %v3420_v37 = vmul.f32 %v3319_v42, %v5775_v47  ;;  %v3421_v29 = vmul.f32 %v3323_v7, %v5797_v61 }
 0x53b   :  { %v3378_v34 = vrot.slane %v3368_v0, %v5635_v25  ;;  %v3385_v46 = vrot.slane %v3369_v30, %v5635_v25  ;;  %v3422_v2 = vmul.f32 %v3327_v12, %v5799_v62  ;;  %v3423_v53 = vmul.f32 %v3331_v15, %v5819_v26 }
 0x53c   :  { %v3392_v24 = vrot.slane %v3370_v1, %v5635_v25  ;;  %v3399_v3 = vrot.slane %v3371_v33, %v5635_v25  ;;  %v3424_v54 = vmul.f32 %v3335_v16, %v5813_v19  ;;  %v3425_v55 = vmul.f32 %v3339_v17, %v5841_v48 }
 0x53d   :  { %v3400_v14 = vcombine.low %v3378_v34, %v3385_v46  ;;  %v3426_v11 = vmul.f32 %v3343_v18, %v5843_v59  ;;  %v3427_v9 = vmul.f32 %v3315_v60, %v5777_v51  ;;  %v3428_v40 = vmul.f32 %v3319_v42, %v5773_v13 }
 0x53e   :  { %v3401_v35 = vcombine.low %v3392_v24, %v3399_v3  ;;  %v3429_v47 = vmul.f32 %v3323_v7, %v5791_v56  ;;  %v3430_v38 = vmul.f32 %v3327_v12, %v5793_v57  ;;  %v3431_v61 = vmul.f32 %v3331_v15, %v5815_v20 }
 0x53f   :  { %v3408_v6 = vrot.slane %v3400_v14, %v5635_v25  ;;  %v3432_v62 = vmul.f32 %v3335_v16, %v5807_v10  ;;  %v3433_v26 = vmul.f32 %v3339_v17, %v5850_v4  ;;  %v3434_v19 = vmul.f32 %v3343_v18, %v5860_v21 }
 0x540   :  { %v3415_v43 = vrot.slane %v3401_v35, %v5635_v25 }
 0x542   :  { %v3416_v49 = vcombine.low %v3408_v6, %v3415_v43 }
 0x544   :  { %v3418_v25 = vsub.f32 %v3075_v45, %v3416_v49 }
 0x546   :  { %v3439_v48 = vrot.slane %v3418_v25, %v5640_v31  ;;  %v3443_v59 = vrot.slane %v3418_v25, %v5643_v32  ;;  %v3447_v51 = vrot.slane %v3418_v25, %v5705_v58  ;;  %v3451_v13 = vrot.slane %v3418_v25, %v5708_v44 }
 0x547   :  { %v3455_v60 = vrot.slane %v3418_v25, %v3330_v41  ;;  %v3459_v56 = vrot.slane %v3418_v25, %v3334_v63  ;;  %v3463_v42 = vrot.slane %v3418_v25, %v3338_v50  ;;  %v3467_v57 = vrot.slane %v3418_v25, %v3342_v52 }
 0x548   :  { %v3476_v7 = vadd.f32 %v3439_v48, %v3419_v36  ;;  %v3477_v20 = vadd.f32 %v3443_v59, %v3420_v37  ;;  %v3478_v12 = vadd.f32 %v3447_v51, %v3421_v29  ;;  %v3479_v10 = vadd.f32 %v3451_v13, %v3422_v2 }
 0x549   :  { %v3480_v15 = vadd.f32 %v3455_v60, %v3423_v53  ;;  %v3481_v4 = vadd.f32 %v3459_v56, %v3424_v54  ;;  %v3482_v16 = vadd.f32 %v3463_v42, %v3425_v55  ;;  %v3483_v21 = vadd.f32 %v3467_v57, %v3426_v11 }
 0x54a   :  { %v3484_v17 = vadd.f32 %v3439_v48, %v3427_v9  ;;  %v3485_v18 = vadd.f32 %v3443_v59, %v3428_v40  ;;  %v3486_v23 = vadd.f32 %v3447_v51, %v3429_v47  ;;  %v3487_v22 = vadd.f32 %v3451_v13, %v3430_v38 }
 0x54b   :  { %v3488_v27 = vadd.f32 %v3455_v60, %v3431_v61  ;;  %v3489_v58 = vadd.f32 %v3459_v56, %v3432_v62  ;;  %v3490_v28 = vadd.f32 %v3463_v42, %v3433_v26  ;;  %v3491_v44 = vadd.f32 %v3467_v57, %v3434_v19 }
 0x54c   :  { %vm3492_vm0 = vcmp.ge.f32.partialorder %v3476_v7, 0.0  ;;  %vm3493_vm1 = vcmp.ge.f32.partialorder %v3477_v20, 0.0  ;;  %vm3494_vm2 = vcmp.ge.f32.partialorder %v3478_v12, 0.0  ;;  %vm3495_vm3 = vcmp.ge.f32.partialorder %v3479_v10, 0.0 }
 0x54d   :  { %vm3496_vm4 = vcmp.ge.f32.partialorder %v3480_v15, 0.0  ;;  %vm3497_vm5 = vcmp.ge.f32.partialorder %v3481_v4, 0.0  ;;  %vm3498_vm6 = vcmp.ge.f32.partialorder %v3482_v16, 0.0  ;;  %vm3499_vm7 = vcmp.ge.f32.partialorder %v3483_v21, 0.0 }
 0x54e   :  { %vm3500_vm8 = vcmp.ge.f32.partialorder %v3484_v17, 0.0  ;;  %vm3501_vm9 = vcmp.ge.f32.partialorder %v3485_v18, 0.0  ;;  %vm3502_vm10 = vcmp.ge.f32.partialorder %v3486_v23, 0.0  ;;  %vm3503_vm11 = vcmp.ge.f32.partialorder %v3487_v22, 0.0 }
 0x54f   :  { %vm3504_vm12 = vcmp.ge.f32.partialorder %v3488_v27, 0.0  ;;  %vm3505_vm13 = vcmp.ge.f32.partialorder %v3489_v58, 0.0  ;;  %vm3506_vm14 = vcmp.ge.f32.partialorder %v3490_v28, 0.0  ;;  %vm3507_vm15 = vcmp.ge.f32.partialorder %v3491_v44, 0.0 }
 0x550   :  { %v3508_v41 = vmul.f32 0.2, %v3476_v7  ;;  %v3509_v63 = vmul.f32 0.2, %v3477_v20  ;;  %v3510_v50 = vmul.f32 0.2, %v3478_v12 }
 0x551   :  { %v3511_v52 = vmul.f32 0.2, %v3479_v10  ;;  %v3512_v39 = vmul.f32 0.2, %v3480_v15  ;;  %v3513_v0 = vmul.f32 0.2, %v3481_v4 }
 0x552   :  { %v3514_v30 = vmul.f32 0.2, %v3482_v16  ;;  %v3515_v1 = vmul.f32 0.2, %v3483_v21  ;;  %v3516_v33 = vmul.f32 0.2, %v3484_v17  ;;  %v5935_v34 = vsel %vm3492_vm0, %v3476_v7, %v3508_v41 }
 0x553   :  { %v3517_v46 = vmul.f32 0.2, %v3485_v18  ;;  %v3518_v24 = vmul.f32 0.2, %v3486_v23  ;;  %v3519_v3 = vmul.f32 0.2, %v3487_v22  ;;  %v3525_v8 = vsel %vm3493_vm1, %v3477_v20, %v3509_v63 }
 0x554   :  { %v3520_v5 = vmul.f32 0.2, %v3488_v27  ;;  %v3521_v14 = vmul.f32 0.2, %v3489_v58  ;;  %v3522_v35 = vmul.f32 0.2, %v3490_v28  ;;  %v5939_v6 = vsel %vm3494_vm2, %v3478_v12, %v3510_v50 }
 0x555   :  { %v3523_v45 = vmul.f32 0.2, %v3491_v44  ;;  %v3527_v43 = vsel %vm3495_vm3, %v3479_v10, %v3511_v52  ;;  %v5943_v36 = vsel %vm3496_vm4, %v3480_v15, %v3512_v39  ;;  %v5946_v37 = vsel %vm3497_vm5, %v3481_v4, %v3513_v0 }
 0x556   :  { %v5949_v49 = vsel %vm3498_vm6, %v3482_v16, %v3514_v30  ;;  %v5952_v29 = vsel %vm3499_vm7, %v3483_v21, %v3515_v1  ;;  %v5955_v2 = vsel %vm3500_vm8, %v3484_v17, %v3516_v33  ;;  %v3533_v53 = vsel %vm3501_vm9, %v3485_v18, %v3517_v46 }
 0x557   :  { %v5959_v54 = vsel %vm3502_vm10, %v3486_v23, %v3518_v24  ;;  %v3535_v55 = vsel %vm3503_vm11, %v3487_v22, %v3519_v3  ;;  %v5963_v11 = vsel %vm3504_vm12, %v3488_v27, %v3520_v5  ;;  %v5966_v9 = vsel %vm3505_vm13, %v3489_v58, %v3521_v14 }
 0x558   :  { %v5969_v25 = vsel %vm3506_vm14, %v3490_v28, %v3522_v35  ;;  %v5972_v40 = vsel %vm3507_vm15, %v3491_v44, %v3523_v45 }
 0x559   :  { %5538 = dma.done.wait [#allocation4 + $0x1], 16384 }
 0x55a   :  { %5539 = vsyncadd [#allocation4 + $0x1], 4294950912  ;;  %v3673_v47 = vpack.c.bf16 %v3533_v53, %v3525_v8  ;;  %v3675_v38 = vpack.c.bf16 %v3535_v55, %v3527_v43  ;;  %v5190_v61 = vld [vmem:[#allocation3 + $0x74] ss:$8 sps:$4 sm:$0xff]   ;;  %v5194_v26 = vld [vmem:[#allocation3 + $0x70] ss:$8 sps:$4 sm:$0xff]  }
 0x55b   :  { %v5192_v62 = vld [vmem:[#allocation3 + $0x174] ss:$8 sps:$4 sm:$0xff]   ;;  %4333 = vmatprep.subr.bf16.mxu0 %v5190_v61  ;;  %v5195_v19 = vld [vmem:[#allocation3 + $0x170] ss:$8 sps:$4 sm:$0xff]   ;;  %v5196_v48 = vld [vmem:[#allocation3 + $0x64] ss:$8 sps:$4 sm:$0xff]  }
 0x55c   :  { %4365 = vmatprep.mubr.bf16.mxu0 %v3673_v47  ;;  %4408 = vmatprep.mubr.bf16.mxu1 %v3675_v38  ;;  %v5198_v59 = vld [vmem:[#allocation3 + $0x164] ss:$8 sps:$4 sm:$0xff]   ;;  %v5200_v51 = vld [vmem:[#allocation3 + $0x60] ss:$8 sps:$4 sm:$0xff]   ;;  %v5202_v60 = vld [vmem:[#allocation3 + $0x54] ss:$8 sps:$4 sm:$0xff]  }
 0x55d   :  { %4376 = vmatprep.subr.bf16.mxu1 %v5192_v62  ;;  %4334 = vmatpush1.bf16.msra.mxu0 %v5194_v26  ;;  %v5201_v13 = vld [vmem:[#allocation3 + $0x160] ss:$8 sps:$4 sm:$0xff]   ;;  %v5204_v56 = vld [vmem:[#allocation3 + $0x154] ss:$8 sps:$4 sm:$0xff]   ;;  %v5206_v42 = vld [vmem:[#allocation3 + $0x50] ss:$8 sps:$4 sm:$0xff]  }
 0x55e   :  { %4377 = vmatpush1.bf16.msra.mxu1 %v5195_v19  ;;  %4335 = vmatprep.subr.bf16.mxu0 %v5196_v48  ;;  %v5207_v57 = vld [vmem:[#allocation3 + $0x150] ss:$8 sps:$4 sm:$0xff]   ;;  %v5208_v7 = vld [vmem:[#allocation3 + $0x44] ss:$8 sps:$4 sm:$0xff]   ;;  %v5212_v12 = vld [vmem:[#allocation3 + $0x40] ss:$8 sps:$4 sm:$0xff]  }
 0x55f   :  { %4378 = vmatprep.subr.bf16.mxu1 %v5198_v59  ;;  %v5210_v20 = vld [vmem:[#allocation3 + $0x144] ss:$8 sps:$4 sm:$0xff]   ;;  %v5213_v10 = vld [vmem:[#allocation3 + $0x140] ss:$8 sps:$4 sm:$0xff]   ;;  %v5214_v15 = vld [vmem:[#allocation3 + $0x34] ss:$8 sps:$4 sm:$0xff]  }
 0x560   :  { %v5216_v4 = vld [vmem:[#allocation3 + $0x134] ss:$8 sps:$4 sm:$0xff]   ;;  %v5218_v16 = vld [vmem:[#allocation3 + $0x30] ss:$8 sps:$4 sm:$0xff]   ;;  %v5220_v17 = vld [vmem:[#allocation3 + $0x24] ss:$8 sps:$4 sm:$0xff]  }
 0x561   :  { %4336 = vmatpush1.bf16.msra.mxu0 %v5200_v51  ;;  %v5219_v21 = vld [vmem:[#allocation3 + $0x130] ss:$8 sps:$4 sm:$0xff]   ;;  %v5222_v18 = vld [vmem:[#allocation3 + $0x124] ss:$8 sps:$4 sm:$0xff]   ;;  %v5224_v23 = vld [vmem:[#allocation3 + $0x20] ss:$8 sps:$4 sm:$0xff]  }
 0x562   :  { %4379 = vmatpush1.bf16.msra.mxu1 %v5201_v13  ;;  %4337 = vmatprep.subr.bf16.mxu0 %v5202_v60  ;;  %v5225_v22 = vld [vmem:[#allocation3 + $0x120] ss:$8 sps:$4 sm:$0xff]   ;;  %v5226_v27 = vld [vmem:[#allocation3 + $0x14] ss:$8 sps:$4 sm:$0xff]   ;;  %v5230_v28 = vld [vmem:[#allocation3 + $0x10] ss:$8 sps:$4 sm:$0xff]  }
 0x563   :  { %4380 = vmatprep.subr.bf16.mxu1 %v5204_v56  ;;  %v5228_v58 = vld [vmem:[#allocation3 + $0x114] ss:$8 sps:$4 sm:$0xff]   ;;  %v5231_v44 = vld [vmem:[#allocation3 + $0x110] ss:$8 sps:$4 sm:$0xff]   ;;  %v5232_v41 = vld [vmem:[#allocation3 + $0x4] ss:$8 sps:$4 sm:$0xff]  }
 0x564   :  { %v5234_v63 = vld [vmem:[#allocation3 + $0x104] ss:$8 sps:$4 sm:$0xff]   ;;  %v5236_v50 = vld [vmem:[#allocation3] ss:$8 sps:$4 sm:$0xff]   ;;  %v5238_v39 = vld [vmem:[#allocation3 + $0xf4] ss:$8 sps:$4 sm:$0xff]  }
 0x565   :  { %4338 = vmatpush1.bf16.msra.mxu0 %v5206_v42  ;;  %v5237_v52 = vld [vmem:[#allocation3 + $0x100] ss:$8 sps:$4 sm:$0xff]   ;;  %v5240_v0 = vld [vmem:[#allocation3 + $0x1f4] ss:$8 sps:$4 sm:$0xff]   ;;  %v5242_v30 = vld [vmem:[#allocation3 + $0xf0] ss:$8 sps:$4 sm:$0xff]  }
 0x566   :  { %4381 = vmatpush1.bf16.msra.mxu1 %v5207_v57  ;;  %4339 = vmatprep.subr.bf16.mxu0 %v5208_v7  ;;  %v5243_v1 = vld [vmem:[#allocation3 + $0x1f0] ss:$8 sps:$4 sm:$0xff]   ;;  %v5244_v33 = vld [vmem:[#allocation3 + $0xe4] ss:$8 sps:$4 sm:$0xff]   ;;  %v5248_v24 = vld [vmem:[#allocation3 + $0xe0] ss:$8 sps:$4 sm:$0xff]  }
 0x567   :  { %4382 = vmatprep.subr.bf16.mxu1 %v5210_v20  ;;  %v5246_v46 = vld [vmem:[#allocation3 + $0x1e4] ss:$8 sps:$4 sm:$0xff]   ;;  %v5249_v3 = vld [vmem:[#allocation3 + $0x1e0] ss:$8 sps:$4 sm:$0xff]   ;;  %v5250_v8 = vld [vmem:[#allocation3 + $0xd4] ss:$8 sps:$4 sm:$0xff]  }
 0x568   :  { %v5252_v5 = vld [vmem:[#allocation3 + $0x1d4] ss:$8 sps:$4 sm:$0xff]   ;;  %v5254_v14 = vld [vmem:[#allocation3 + $0xd0] ss:$8 sps:$4 sm:$0xff]   ;;  %v5256_v45 = vld [vmem:[#allocation3 + $0xc4] ss:$8 sps:$4 sm:$0xff]  }
 0x569   :  { %4340 = vmatpush1.bf16.msra.mxu0 %v5212_v12  ;;  %v5255_v35 = vld [vmem:[#allocation3 + $0x1d0] ss:$8 sps:$4 sm:$0xff]   ;;  %v5258_v43 = vld [vmem:[#allocation3 + $0x1c4] ss:$8 sps:$4 sm:$0xff]   ;;  %v5260_v53 = vld [vmem:[#allocation3 + $0xc0] ss:$8 sps:$4 sm:$0xff]  }
 0x56a   :  { %4383 = vmatpush1.bf16.msra.mxu1 %v5213_v10  ;;  %4341 = vmatprep.subr.bf16.mxu0 %v5214_v15  ;;  %v5261_v55 = vld [vmem:[#allocation3 + $0x1c0] ss:$8 sps:$4 sm:$0xff]   ;;  %v5262_v47 = vld [vmem:[#allocation3 + $0xb4] ss:$8 sps:$4 sm:$0xff]   ;;  %v5266_v61 = vld [vmem:[#allocation3 + $0xb0] ss:$8 sps:$4 sm:$0xff]   ;;  %v3672_v15 = vpack.c.bf16 %v5955_v2, %v5935_v34 }
 0x56b   :  { %4384 = vmatprep.subr.bf16.mxu1 %v5216_v4  ;;  %v5264_v38 = vld [vmem:[#allocation3 + $0x1b4] ss:$8 sps:$4 sm:$0xff]   ;;  %v5267_v62 = vld [vmem:[#allocation3 + $0x1b0] ss:$8 sps:$4 sm:$0xff]   ;;  %v5268_v26 = vld [vmem:[#allocation3 + $0xa4] ss:$8 sps:$4 sm:$0xff]   ;;  %v3674_v4 = vpack.c.bf16 %v5959_v54, %v5939_v6 }
 0x56c   :  { %v5270_v19 = vld [vmem:[#allocation3 + $0x1a4] ss:$8 sps:$4 sm:$0xff]   ;;  %v5272_v48 = vld [vmem:[#allocation3 + $0xa0] ss:$8 sps:$4 sm:$0xff]   ;;  %v5274_v51 = vld [vmem:[#allocation3 + $0x94] ss:$8 sps:$4 sm:$0xff]  }
 0x56d   :  { %4342 = vmatpush1.bf16.msra.mxu0 %v5218_v16  ;;  %v5273_v59 = vld [vmem:[#allocation3 + $0x1a0] ss:$8 sps:$4 sm:$0xff]   ;;  %v5276_v13 = vld [vmem:[#allocation3 + $0x194] ss:$8 sps:$4 sm:$0xff]   ;;  %v5278_v60 = vld [vmem:[#allocation3 + $0x90] ss:$8 sps:$4 sm:$0xff]  }
 0x56e   :  { %4385 = vmatpush1.bf16.msra.mxu1 %v5219_v21  ;;  %4343 = vmatprep.subr.bf16.mxu0 %v5220_v17  ;;  %v5279_v56 = vld [vmem:[#allocation3 + $0x190] ss:$8 sps:$4 sm:$0xff]   ;;  %v5280_v42 = vld [vmem:[#allocation3 + $0x84] ss:$8 sps:$4 sm:$0xff]   ;;  %v5284_v7 = vld [vmem:[#allocation3 + $0x80] ss:$8 sps:$4 sm:$0xff]  }
 0x56f   :  { %4386 = vmatprep.subr.bf16.mxu1 %v5222_v18  ;;  %v5282_v57 = vld [vmem:[#allocation3 + $0x184] ss:$8 sps:$4 sm:$0xff]   ;;  %v5285_v20 = vld [vmem:[#allocation3 + $0x180] ss:$8 sps:$4 sm:$0xff]   ;;  %v5288_v12 = vld [vmem:[#allocation3 + $0x274] ss:$8 sps:$4 sm:$0xff]  }
 0x570   :  { %v5291_v10 = vld [vmem:[#allocation3 + $0x374] ss:$8 sps:$4 sm:$0xff]   ;;  %v5286_v16 = vld [vmem:[#allocation3 + $0x270] ss:$8 sps:$4 sm:$0xff]   ;;  %v5294_v17 = vld [vmem:[#allocation3 + $0x264] ss:$8 sps:$4 sm:$0xff]  }
 0x571   :  { %4344 = vmatpush1.bf16.msra.mxu0 %v5224_v23  ;;  %v5289_v21 = vld [vmem:[#allocation3 + $0x370] ss:$8 sps:$4 sm:$0xff]   ;;  %v5297_v18 = vld [vmem:[#allocation3 + $0x364] ss:$8 sps:$4 sm:$0xff]   ;;  %v3677_v23 = vpack.c.bf16 %v5966_v9, %v5946_v37  ;;  %v5292_v34 = vld [vmem:[#allocation3 + $0x260] ss:$8 sps:$4 sm:$0xff]  }
 0x572   :  { %4387 = vmatpush1.bf16.msra.mxu1 %v5225_v22  ;;  %4345 = vmatprep.subr.bf16.mxu0 %v5226_v27  ;;  %v3679_v22 = vpack.c.bf16 %v5972_v40, %v5952_v29  ;;  %v5295_v2 = vld [vmem:[#allocation3 + $0x360] ss:$8 sps:$4 sm:$0xff]   ;;  %v5300_v6 = vld [vmem:[#allocation3 + $0x254] ss:$8 sps:$4 sm:$0xff]   ;;  %v5298_v27 = vld [vmem:[#allocation3 + $0x250] ss:$8 sps:$4 sm:$0xff]  }
 0x573   :  { %4388 = vmatprep.subr.bf16.mxu1 %v5228_v58  ;;  %v5303_v54 = vld [vmem:[#allocation3 + $0x354] ss:$8 sps:$4 sm:$0xff]   ;;  %v5301_v58 = vld [vmem:[#allocation3 + $0x350] ss:$8 sps:$4 sm:$0xff]   ;;  %v5306_v37 = vld [vmem:[#allocation3 + $0x244] ss:$8 sps:$4 sm:$0xff]  }
 0x574   :  { %v5309_v29 = vld [vmem:[#allocation3 + $0x344] ss:$8 sps:$4 sm:$0xff]   ;;  %v5304_v9 = vld [vmem:[#allocation3 + $0x240] ss:$8 sps:$4 sm:$0xff]  }
 0x575   :  { %4346 = vmatpush1.bf16.msra.mxu0 %v5230_v28  ;;  %v5307_v40 = vld [vmem:[#allocation3 + $0x340] ss:$8 sps:$4 sm:$0xff]   ;;  %v5312_v28 = vld [vmem:[#allocation3 + $0x234] ss:$8 sps:$4 sm:$0xff]  }
 0x576   :  { %4389 = vmatpush1.bf16.msra.mxu1 %v5231_v44  ;;  %4347 = vmatprep.subr.bf16.mxu0 %v5232_v41  ;;  %v5315_v44 = vld [vmem:[#allocation3 + $0x334] ss:$8 sps:$4 sm:$0xff]   ;;  %v5310_v41 = vld [vmem:[#allocation3 + $0x230] ss:$8 sps:$4 sm:$0xff]  }
 0x577   :  { %4390 = vmatprep.subr.bf16.mxu1 %v5234_v63  ;;  %v5313_v63 = vld [vmem:[#allocation3 + $0x330] ss:$8 sps:$4 sm:$0xff]  }
 0x579   :  { %4348 = vmatpush1.bf16.msra.mxu0 %v5236_v50  ;;  %v5318_v50 = vld [vmem:[#allocation3 + $0x224] ss:$8 sps:$4 sm:$0xff]  }
 0x57a   :  { %4391 = vmatpush1.bf16.msra.mxu1 %v5237_v52  ;;  %4349 = vmatprep.subr.bf16.mxu0 %v5238_v39  ;;  %v5321_v52 = vld [vmem:[#allocation3 + $0x324] ss:$8 sps:$4 sm:$0xff]   ;;  %v5316_v39 = vld [vmem:[#allocation3 + $0x220] ss:$8 sps:$4 sm:$0xff]  }
 0x57b   :  { %4392 = vmatprep.subr.bf16.mxu1 %v5240_v0  ;;  %v5319_v0 = vld [vmem:[#allocation3 + $0x320] ss:$8 sps:$4 sm:$0xff]  }
 0x57d   :  { %4350 = vmatpush2.bf16.msra.mxu0 %v5242_v30  ;;  %v5324_v30 = vld [vmem:[#allocation3 + $0x214] ss:$8 sps:$4 sm:$0xff]  }
 0x57e   :  { %4393 = vmatpush2.bf16.msra.mxu1 %v5243_v1  ;;  %4351 = vmatprep.subr.bf16.mxu0 %v5244_v33  ;;  %v5327_v1 = vld [vmem:[#allocation3 + $0x314] ss:$8 sps:$4 sm:$0xff]   ;;  %v5322_v33 = vld [vmem:[#allocation3 + $0x210] ss:$8 sps:$4 sm:$0xff]  }
 0x57f   :  { %4394 = vmatprep.subr.bf16.mxu1 %v5246_v46  ;;  %v5325_v46 = vld [vmem:[#allocation3 + $0x310] ss:$8 sps:$4 sm:$0xff]  }
 0x581   :  { %4352 = vmatpush2.bf16.msra.mxu0 %v5248_v24  ;;  %v5330_v24 = vld [vmem:[#allocation3 + $0x204] ss:$8 sps:$4 sm:$0xff]  }
 0x582   :  { %4395 = vmatpush2.bf16.msra.mxu1 %v5249_v3  ;;  %4353 = vmatprep.subr.bf16.mxu0 %v5250_v8  ;;  %v5333_v3 = vld [vmem:[#allocation3 + $0x304] ss:$8 sps:$4 sm:$0xff]   ;;  %v5328_v8 = vld [vmem:[#allocation3 + $0x200] ss:$8 sps:$4 sm:$0xff]  }
 0x583   :  { %4396 = vmatprep.subr.bf16.mxu1 %v5252_v5  ;;  %v5331_v5 = vld [vmem:[#allocation3 + $0x300] ss:$8 sps:$4 sm:$0xff]  }
 0x585   :  { %4354 = vmatpush2.bf16.msra.mxu0 %v5254_v14  ;;  %v5336_v14 = vld [vmem:[#allocation3 + $0x2f4] ss:$8 sps:$4 sm:$0xff]  }
 0x586   :  { %4397 = vmatpush2.bf16.msra.mxu1 %v5255_v35  ;;  %4355 = vmatprep.subr.bf16.mxu0 %v5256_v45  ;;  %v5339_v35 = vld [vmem:[#allocation3 + $0x3f4] ss:$8 sps:$4 sm:$0xff]   ;;  %v5334_v45 = vld [vmem:[#allocation3 + $0x2f0] ss:$8 sps:$4 sm:$0xff]  }
 0x587   :  { %4398 = vmatprep.subr.bf16.mxu1 %v5258_v43  ;;  %v5337_v43 = vld [vmem:[#allocation3 + $0x3f0] ss:$8 sps:$4 sm:$0xff]  }
 0x589   :  { %4356 = vmatpush2.bf16.msra.mxu0 %v5260_v53  ;;  %v5342_v53 = vld [vmem:[#allocation3 + $0x2e4] ss:$8 sps:$4 sm:$0xff]  }
 0x58a   :  { %4399 = vmatpush2.bf16.msra.mxu1 %v5261_v55  ;;  %4357 = vmatprep.subr.bf16.mxu0 %v5262_v47  ;;  %v5345_v55 = vld [vmem:[#allocation3 + $0x3e4] ss:$8 sps:$4 sm:$0xff]   ;;  %v5340_v47 = vld [vmem:[#allocation3 + $0x2e0] ss:$8 sps:$4 sm:$0xff]  }
 0x58b   :  { %4400 = vmatprep.subr.bf16.mxu1 %v5264_v38  ;;  %v5343_v38 = vld [vmem:[#allocation3 + $0x3e0] ss:$8 sps:$4 sm:$0xff]  }
 0x58d   :  { %4358 = vmatpush2.bf16.msra.mxu0 %v5266_v61  ;;  %v5348_v61 = vld [vmem:[#allocation3 + $0x2d4] ss:$8 sps:$4 sm:$0xff]  }
 0x58e   :  { %4401 = vmatpush2.bf16.msra.mxu1 %v5267_v62  ;;  %4359 = vmatprep.subr.bf16.mxu0 %v5268_v26  ;;  %v5351_v62 = vld [vmem:[#allocation3 + $0x3d4] ss:$8 sps:$4 sm:$0xff]   ;;  %v5346_v26 = vld [vmem:[#allocation3 + $0x2d0] ss:$8 sps:$4 sm:$0xff]  }
 0x58f   :  { %4402 = vmatprep.subr.bf16.mxu1 %v5270_v19  ;;  %v5349_v19 = vld [vmem:[#allocation3 + $0x3d0] ss:$8 sps:$4 sm:$0xff]  }
 0x591   :  { %4360 = vmatpush2.bf16.msra.mxu0 %v5272_v48  ;;  %v5354_v48 = vld [vmem:[#allocation3 + $0x2c4] ss:$8 sps:$4 sm:$0xff]  }
 0x592   :  { %4403 = vmatpush2.bf16.msra.mxu1 %v5273_v59  ;;  %4361 = vmatprep.subr.bf16.mxu0 %v5274_v51  ;;  %v5357_v59 = vld [vmem:[#allocation3 + $0x3c4] ss:$8 sps:$4 sm:$0xff]   ;;  %v5352_v51 = vld [vmem:[#allocation3 + $0x2c0] ss:$8 sps:$4 sm:$0xff]  }
 0x593   :  { %4404 = vmatprep.subr.bf16.mxu1 %v5276_v13  ;;  %v5355_v13 = vld [vmem:[#allocation3 + $0x3c0] ss:$8 sps:$4 sm:$0xff]  }
 0x595   :  { %4362 = vmatpush2.bf16.msra.mxu0 %v5278_v60  ;;  %v5360_v60 = vld [vmem:[#allocation3 + $0x2b4] ss:$8 sps:$4 sm:$0xff]  }
 0x596   :  { %4405 = vmatpush2.bf16.msra.mxu1 %v5279_v56  ;;  %4363 = vmatprep.subr.bf16.mxu0 %v5280_v42  ;;  %v5363_v56 = vld [vmem:[#allocation3 + $0x3b4] ss:$8 sps:$4 sm:$0xff]   ;;  %v5358_v42 = vld [vmem:[#allocation3 + $0x2b0] ss:$8 sps:$4 sm:$0xff]  }
 0x597   :  { %4406 = vmatprep.subr.bf16.mxu1 %v5282_v57  ;;  %v5361_v57 = vld [vmem:[#allocation3 + $0x3b0] ss:$8 sps:$4 sm:$0xff]  }
 0x599   :  { %4364 = vmatpush2.bf16.msra.mxu0 %v5284_v7  ;;  %v5366_v7 = vld [vmem:[#allocation3 + $0x2a4] ss:$8 sps:$4 sm:$0xff]  }
 0x59a   :  { %4407 = vmatpush2.bf16.msra.mxu1 %v5285_v20  ;;  %4419 = vmatprep.subr.bf16.mxu0 %v5288_v12  ;;  %v5369_v20 = vld [vmem:[#allocation3 + $0x3a4] ss:$8 sps:$4 sm:$0xff]   ;;  %v5364_v12 = vld [vmem:[#allocation3 + $0x2a0] ss:$8 sps:$4 sm:$0xff]  }
 0x59b   :  { %4462 = vmatprep.subr.bf16.mxu1 %v5291_v10  ;;  %v5367_v10 = vld [vmem:[#allocation3 + $0x3a0] ss:$8 sps:$4 sm:$0xff]  }
 0x59c   :  { %4366 = vmatmul.mubr.bf16.vlgmr.msra.gmra.mxu0 %v3672_v15  ;;  %v5372_v15 = vld [vmem:[#allocation3 + $0x294] ss:$8 sps:$4 sm:$0xff]  }
 0x59d   :  { %4409 = vmatmul.mubr.bf16.vlgmr.msra.gmra.mxu1 %v3674_v4  ;;  %4420 = vmatpush1.bf16.msra.mxu0 %v5286_v16  ;;  %v5375_v4 = vld [vmem:[#allocation3 + $0x394] ss:$8 sps:$4 sm:$0xff]   ;;  %v5370_v16 = vld [vmem:[#allocation3 + $0x290] ss:$8 sps:$4 sm:$0xff]  }
 0x59e   :  { %4463 = vmatpush1.bf16.msra.mxu1 %v5289_v21  ;;  %4421 = vmatprep.subr.bf16.mxu0 %v5294_v17  ;;  %v5373_v21 = vld [vmem:[#allocation3 + $0x390] ss:$8 sps:$4 sm:$0xff]   ;;  %v5378_v17 = vld [vmem:[#allocation3 + $0x284] ss:$8 sps:$4 sm:$0xff]  }
 0x59f   :  { %4464 = vmatprep.subr.bf16.mxu1 %v5297_v18  ;;  %4451 = vmatprep.mubr.bf16.mxu0 %v3677_v23  ;;  %v5381_v18 = vld [vmem:[#allocation3 + $0x384] ss:$8 sps:$4 sm:$0xff]   ;;  %v5376_v23 = vld [vmem:[#allocation3 + $0x280] ss:$8 sps:$4 sm:$0xff]  }
 0x5a0   :  { %4494 = vmatprep.mubr.bf16.mxu1 %v3679_v22  ;;  %v5379_v22 = vld [vmem:[#allocation3 + $0x380] ss:$8 sps:$4 sm:$0xff]  }
 0x5a1   :  { %4422 = vmatpush1.bf16.msra.mxu0 %v5292_v34  ;;  %v3676_v34 = vpack.c.bf16 %v5963_v11, %v5943_v36 }
 0x5a2   :  { %4465 = vmatpush1.bf16.msra.mxu1 %v5295_v2  ;;  %4423 = vmatprep.subr.bf16.mxu0 %v5300_v6  ;;  %v3678_v2 = vpack.c.bf16 %v5969_v25, %v5949_v49 }
 0x5a3   :  { %4466 = vmatprep.subr.bf16.mxu1 %v5303_v54 }
 0x5a5   :  { %4424 = vmatpush1.bf16.msra.mxu0 %v5298_v27  ;;  %v3681_v27 = vld [vmem:[#allocation12 + $0x7] ss:$8 sm:$0x3] }
 0x5a6   :  { %4467 = vmatpush1.bf16.msra.mxu1 %v5301_v58  ;;  %4425 = vmatprep.subr.bf16.mxu0 %v5306_v37 }
 0x5a7   :  { %4468 = vmatprep.subr.bf16.mxu1 %v5309_v29  ;;  %v3686_v29 = vrot.slane %v3681_v27, %v5640_v31 }
 0x5a9   :  { %4426 = vmatpush1.bf16.msra.mxu0 %v5304_v9  ;;  %v3690_v9 = vrot.slane %v3681_v27, %v5643_v32 }
 0x5aa   :  { %4469 = vmatpush1.bf16.msra.mxu1 %v5307_v40  ;;  %4427 = vmatprep.subr.bf16.mxu0 %v5312_v28 }
 0x5ab   :  { %4470 = vmatprep.subr.bf16.mxu1 %v5315_v44 }
 0x5ad   :  { %4428 = vmatpush1.bf16.msra.mxu0 %v5310_v41 }
 0x5ae   :  { %4471 = vmatpush1.bf16.msra.mxu1 %v5313_v63  ;;  %4429 = vmatprep.subr.bf16.mxu0 %v5318_v50 }
 0x5af   :  { %4472 = vmatprep.subr.bf16.mxu1 %v5321_v52 }
 0x5b1   :  { %4430 = vmatpush1.bf16.msra.mxu0 %v5316_v39 }
 0x5b2   :  { %4473 = vmatpush1.bf16.msra.mxu1 %v5319_v0  ;;  %4431 = vmatprep.subr.bf16.mxu0 %v5324_v30 }
 0x5b3   :  { %4474 = vmatprep.subr.bf16.mxu1 %v5327_v1 }
 0x5b5   :  { %4432 = vmatpush1.bf16.msra.mxu0 %v5322_v33 }
 0x5b6   :  { %4475 = vmatpush1.bf16.msra.mxu1 %v5325_v46  ;;  %4433 = vmatprep.subr.bf16.mxu0 %v5330_v24 }
 0x5b7   :  { %4476 = vmatprep.subr.bf16.mxu1 %v5333_v3 }
 0x5b9   :  { %4434 = vmatpush1.bf16.msra.mxu0 %v5328_v8 }
 0x5ba   :  { %4477 = vmatpush1.bf16.msra.mxu1 %v5331_v5  ;;  %4435 = vmatprep.subr.bf16.mxu0 %v5336_v14 }
 0x5bb   :  { %4478 = vmatprep.subr.bf16.mxu1 %v5339_v35 }
 0x5bd   :  { %4436 = vmatpush2.bf16.msra.mxu0 %v5334_v45 }
 0x5be   :  { %4479 = vmatpush2.bf16.msra.mxu1 %v5337_v43  ;;  %4437 = vmatprep.subr.bf16.mxu0 %v5342_v53 }
 0x5bf   :  { %4480 = vmatprep.subr.bf16.mxu1 %v5345_v55 }
 0x5c1   :  { %4438 = vmatpush2.bf16.msra.mxu0 %v5340_v47 }
 0x5c2   :  { %4481 = vmatpush2.bf16.msra.mxu1 %v5343_v38  ;;  %4439 = vmatprep.subr.bf16.mxu0 %v5348_v61 }
 0x5c3   :  { %4482 = vmatprep.subr.bf16.mxu1 %v5351_v62 }
 0x5c5   :  { %4440 = vmatpush2.bf16.msra.mxu0 %v5346_v26 }
 0x5c6   :  { %4483 = vmatpush2.bf16.msra.mxu1 %v5349_v19  ;;  %4441 = vmatprep.subr.bf16.mxu0 %v5354_v48 }
 0x5c7   :  { %4484 = vmatprep.subr.bf16.mxu1 %v5357_v59 }
 0x5c9   :  { %4442 = vmatpush2.bf16.msra.mxu0 %v5352_v51 }
 0x5ca   :  { %4485 = vmatpush2.bf16.msra.mxu1 %v5355_v13  ;;  %4443 = vmatprep.subr.bf16.mxu0 %v5360_v60 }
 0x5cb   :  { %4486 = vmatprep.subr.bf16.mxu1 %v5363_v56 }
 0x5cd   :  { %4444 = vmatpush2.bf16.msra.mxu0 %v5358_v42 }
 0x5ce   :  { %4487 = vmatpush2.bf16.msra.mxu1 %v5361_v57  ;;  %4445 = vmatprep.subr.bf16.mxu0 %v5366_v7 }
 0x5cf   :  { %4488 = vmatprep.subr.bf16.mxu1 %v5369_v20 }
 0x5d1   :  { %4446 = vmatpush2.bf16.msra.mxu0 %v5364_v12 }
 0x5d2   :  { %4489 = vmatpush2.bf16.msra.mxu1 %v5367_v10  ;;  %4447 = vmatprep.subr.bf16.mxu0 %v5372_v15 }
 0x5d3   :  { %4490 = vmatprep.subr.bf16.mxu1 %v5375_v4 }
 0x5d5   :  { %4448 = vmatpush2.bf16.msra.mxu0 %v5370_v16 }
 0x5d6   :  { %4491 = vmatpush2.bf16.msra.mxu1 %v5373_v21  ;;  %4449 = vmatprep.subr.bf16.mxu0 %v5378_v17 }
 0x5d7   :  { %4492 = vmatprep.subr.bf16.mxu1 %v5381_v18 }
 0x5d9   :  { %4450 = vmatpush2.bf16.msra.mxu0 %v5376_v23 }
 0x5da   :  { %4493 = vmatpush2.bf16.msra.mxu1 %v5379_v22 }
 0x5dc   :  { %4452 = vmatmul.mubr.bf16.vlgmr.msra.gmra.mxu0 %v3676_v34 }
 0x5dd   :  { %4495 = vmatmul.mubr.bf16.vlgmr.msra.gmra.mxu1 %v3678_v2 }
 0x65c   :  { %v4367_v6 = vpop.f32.mrf.mxu0 }
 0x65d   :  { %v4410_v54 = vpop.f32.mrf.mxu1  ;;  %v4368_v44 = vadd.f32 %v4367_v6, %v3686_v29 }
 0x65e   :  { %v4369_v58 = vpop.f32.mrf.mxu0 }
 0x65f   :  { %v4412_v37 = vpop.f32.mrf.mxu1  ;;  %v4370_v36 = vadd.f32 %v4369_v58, %v3690_v9  ;;  %v4411_v49 = vadd.f32 %v4410_v54, %v4368_v44 }
 0x660   :  { %v4371_v40 = vpop.f32.mrf.mxu0 }
 0x661   :  { %v4414_v28 = vpop.f32.mrf.mxu1  ;;  %v4372_v25 = vadd.f32 %v4371_v40, %v3686_v29  ;;  %v4413_v52 = vadd.f32 %v4412_v37, %v4370_v36 }
 0x662   :  { %v4373_v11 = vpop.f32.mrf.mxu0 }
 0x663   :  { %v4416_v41 = vpop.f32.mrf.mxu1  ;;  %v4374_v39 = vadd.f32 %v4373_v11, %v3690_v9  ;;  %v4415_v33 = vadd.f32 %v4414_v28, %v4372_v25 }
 0x665   :  { %v4417_v3 = vadd.f32 %v4416_v41, %v4374_v39 }
 0x69c   :  { %v4453_v63 = vpop.f32.mrf.mxu0 }
 0x69d   :  { %v4496_v50 = vpop.f32.mrf.mxu1  ;;  %v4454_v0 = vadd.f32 %v4453_v63, %v4411_v49 }
 0x69e   :  { %v4455_v30 = vpop.f32.mrf.mxu0 }
 0x69f   :  { %v4498_v1 = vpop.f32.mrf.mxu1  ;;  %v4497_v46 = vadd.f32 %v4496_v50, %v4454_v0  ;;  %v4456_v31 = vadd.f32 %v4455_v30, %v4413_v52 }
 0x6a0   :  { %v4457_v24 = vpop.f32.mrf.mxu0 }
 0x6a1   :  { %v4500_v32 = vpop.f32.mrf.mxu1  ;;  %5382 = vtanh.f32 %v4497_v46  ;;  %v4499_v8 = vadd.f32 %v4498_v1, %v4456_v31  ;;  %v4458_v5 = vadd.f32 %v4457_v24, %v4415_v33 }
 0x6a2   :  { %v4459_v14 = vpop.f32.mrf.mxu0 }
 0x6a3   :  { %5384 = vtanh.f32 %v4499_v8  ;;  %v4501_v35 = vadd.f32 %v4500_v32, %v4458_v5  ;;  %v4460_v45 = vadd.f32 %v4459_v14, %v4417_v3  ;;  %v4502_v43 = vpop.f32.mrf.mxu1 }
 0x6a5   :  { %5386 = vtanh.f32 %v4501_v35  ;;  %v4503_v53 = vadd.f32 %v4502_v43, %v4460_v45 }
 0x6a7   :  { %5388 = vtanh.f32 %v4503_v53 }
 0x6ae   :  { %v5383_v55 = vpop.eup %5382 }
 0x6af   :  { %4509 = vst [vmem:[%s6007_s7] sm:$0xff] %v5383_v55 }
 0x6b0   :  { %v5385_v47 = vpop.eup %5384 }
 0x6b1   :  { %4510 = vst [vmem:[%s6007_s7 + $0x8] sm:$0xff] %v5385_v47 }
 0x6b2   :  { %v5387_v38 = vpop.eup %5386 }
 0x6b3   :  { %4511 = vst [vmem:[%s6007_s7 + $0x10] sm:$0xff] %v5387_v38 }
 0x6b4   :  { %v5389_v61 = vpop.eup %5388 }
 0x6b5   :  { %4512 = vst [vmem:[%s6007_s7 + $0x18] sm:$0xff] %v5389_v61 }
 0x6b6   :  { %4517 = vsyncpa [#allocation6], 1 }
 0x6b7   :  { %4518 = vsyncpa [#allocation8], 1 }
 0x6b8   :  { %4519 = vsyncpa [#allocation11], 1 }
 0x6b9   :  { %4520 = vsyncmov [#allocation4] }
 0x6bc   :  { %s4521_s19 = vpop.sfrf %4520 }
 0x6bd   :  { %p5002_p7 = scmp.ne.s32.totalorder %s4521_s19, 0 }
 0x6bf   :  { %4525 = shalt.err (%p5002_p7)  }
 0x6c0   :  { %4527 = vsyncmov [#allocation4 + $0x1] }
 0x6c3   :  { %s4528_s20 = vpop.sfrf %4527 }
 0x6c4   :  { %p5003_p8 = scmp.ne.s32.totalorder %s4528_s20, 0 }
 0x6c6   :  { %4532 = shalt.err (%p5003_p8)  }

</bundles_post_ra>
